<compile_context>
chip_gen: v7x
topology: tpu7x:2x2x1
jax: 0.10.0
libtpu: 0.0.40
codegen_flags: <defaults>
</compile_context>

<pallas_src>
import jax
import jax.numpy as jnp
import numpy as np
from jax.experimental import pallas as pl
from jax.experimental.pallas import tpu as pltpu


# --------------------------------------------------------------------------
# Shared math: pairwise-difference product + signed 6th root (with eps).
# --------------------------------------------------------------------------
def _signed_sixth_root_product(xflat, H):
    a = xflat[:, 0 * H:1 * H]
    b = xflat[:, 1 * H:2 * H]
    c = xflat[:, 2 * H:3 * H]
    d = xflat[:, 3 * H:4 * H]
    # product of all 6 pairwise differences (i < j)
    m = (a - b) * (a - c) * (a - d) * (b - c) * (b - d) * (c - d)
    # signed 6th root with eps: pow -> EUP; nested where keeps sign(0) == 0
    # (exact PyTorch behaviour) without an extra sign()*mul on the VPU.
    root = jnp.power(jnp.abs(m) + 1e-6, 1.0 / 6.0)
    return jnp.where(m > 0, root, jnp.where(m < 0, -root, 0.0))


# --------------------------------------------------------------------------
# FUSED path: whole batch resident in VMEM, single kernel.
# --------------------------------------------------------------------------
def _fused_kernel(xf_ref, w1_ref, gamma_ref, beta_ref, w2_ref, b2_ref, o_ref):
    H = w1_ref.shape[0]
    n = xf_ref.shape[0]
    m = _signed_sixth_root_product(xf_ref[...], H)              # (N, H) f32

    # Linear1 on the MXU (bf16 inputs, f32 accumulation).  b1 omitted: it
    # cancels exactly against the batch mean subtracted below.
    h = jnp.dot(m.astype(jnp.bfloat16), w1_ref[...],
                preferred_element_type=jnp.float32)              # (N, H) f32

    # Global batch statistics (biased variance, eps=1e-5), gamma folded in.
    inv_n = 1.0 / n
    mean = jnp.sum(h, axis=0, keepdims=True) * inv_n             # (1, H)
    var = jnp.maximum(jnp.sum(h * h, axis=0, keepdims=True) * inv_n
                      - mean * mean, 0.0)
    scale = gamma_ref[...] * jax.lax.rsqrt(var + 1e-5)
    shift = beta_ref[...] - mean * scale

    hn = jnp.maximum(h * scale + shift, 0.0)                     # BN + ReLU
    o_ref[...] = (jnp.dot(hn.astype(jnp.bfloat16), w2_ref[...],
                          preferred_element_type=jnp.float32)
                  + b2_ref[...]).astype(o_ref.dtype)


# --------------------------------------------------------------------------
# TILED path, pass 1: diffs, signed 6th root, Linear1, per-tile stats.
# --------------------------------------------------------------------------
def _pass1_kernel(xf_ref, w1_ref, h_ref, sum_ref, sq_ref):
    H = w1_ref.shape[0]
    m = _signed_sixth_root_product(xf_ref[...], H)               # (n_tile, H)
    h = jnp.dot(m.astype(jnp.bfloat16), w1_ref[...],
                preferred_element_type=jnp.float32)              # (n_tile, H) f32
    h_ref[...] = h
    # per-tile sum / sum-of-squares for the global batch statistics
    sum_ref[...] = jnp.sum(h, axis=0, keepdims=True)[None]       # (1, 1, H)
    sq_ref[...] = jnp.sum(h * h, axis=0, keepdims=True)[None]    # (1, 1, H)


# --------------------------------------------------------------------------
# TILED path, pass 2: folded BatchNorm affine, ReLU, Linear2.
# --------------------------------------------------------------------------
def _pass2_kernel(h_ref, scale_ref, shift_ref, w2_ref, b2_ref, o_ref):
    hn = h_ref[...] * scale_ref[...] + shift_ref[...]            # BN (gamma folded)
    hn = jnp.maximum(hn, 0.0)                                    # ReLU
    o_ref[...] = (jnp.dot(hn.astype(jnp.bfloat16), w2_ref[...],
                          preferred_element_type=jnp.float32)
                  + b2_ref[...]).astype(o_ref.dtype)


def _pick_n_tile(N, H, requested):
    if requested is not None:
        assert N % requested == 0, "n_tile must divide N"
        return requested
    # target >=512 rows (~85% of HBM roofline for mem-bound tiles), bounded by
    # a conservative VMEM budget (fits the 32 MiB default scoped limit on
    # v6e/v7x and the 16 MiB default on v5e with margin for small H).
    budget = 24 * 1024 * 1024
    for t in (1024, 512, 256, 128, 64, 32, 16, 8):
        if N % t:
            continue
        est = (2 * (t * 4 * H * 4)        # double-buffered x tile
               + 2 * (t * H * 4)          # double-buffered h tile
               + 2 * H * H * 2            # resident bf16 weights
               + 64 * 1024)
        if est <= budget:
            return t
    return N  # fall back to a single full block


def tetra_differences_product(x, w1, b1, gamma, beta, w2, b2, *,
                              n_tile=None, force_tiled=False):
    """x: (N, 4, H) f32.  w1/w2 are nn.Linear-style (out, in) matrices.

    b1 is accepted for interface parity but unused: training-mode BatchNorm
    subtracts the batch mean right after Linear1, so b1 cancels exactly.
    """
    del b1
    N, four, H = x.shape
    assert four == 4

    xf = x.reshape(N, 4 * H)                                  # free reshape, no transpose
    w1_io = jnp.transpose(w1, (1, 0)).astype(jnp.bfloat16)    # (in, out), MXU-native
    w2_io = jnp.transpose(w2, (1, 0)).astype(jnp.bfloat16)
    gamma_r = gamma.reshape(1, H).astype(jnp.float32)
    beta_r = beta.reshape(1, H).astype(jnp.float32)
    b2_r = b2.reshape(1, H).astype(jnp.float32)

    # ---- FUSED path: whole batch fits comfortably in VMEM ----
    fused_bytes = (N * 4 * H * 4          # x
                   + 3 * N * H * 4        # m, h, hn live f32
                   + 2 * N * H * 2        # bf16 MXU operand copies
                   + 2 * H * H * 2        # weights
                   + 256 * 1024)
    if not force_tiled and fused_bytes <= 20 * 1024 * 1024:
        return pl.pallas_call(
            _fused_kernel,
            out_shape=jax.ShapeDtypeStruct((N, H), x.dtype),
            compiler_params=pltpu.CompilerParams(vmem_limit_bytes=32 * 1024 * 1024),
        )(xf, w1_io, gamma_r, beta_r, w2_io, b2_r)

    # ---- TILED path ----
    n_tile = _pick_n_tile(N, H, n_tile)
    n_blocks = N // n_tile

    cparams = pltpu.CompilerParams(
        dimension_semantics=("parallel",),          # megacore on v7x; no-op on v5e/v6e
        vmem_limit_bytes=32 * 1024 * 1024,
    )

    # pass 1: m -> 6th root -> Linear1, plus per-tile stats
    h, tile_sum, tile_sq = pl.pallas_call(
        _pass1_kernel,
        out_shape=(jax.ShapeDtypeStruct((N, H), jnp.float32),
                   jax.ShapeDtypeStruct((n_blocks, 1, H), jnp.float32),
                   jax.ShapeDtypeStruct((n_blocks, 1, H), jnp.float32)),
        grid=(n_blocks,),
        in_specs=[pl.BlockSpec((n_tile, 4 * H), lambda i: (i, 0)),
                  pl.BlockSpec((H, H), lambda i: (0, 0))],     # resident weight
        out_specs=(pl.BlockSpec((n_tile, H), lambda i: (i, 0)),
                   pl.BlockSpec((1, 1, H), lambda i: (i, 0, 0)),
                   pl.BlockSpec((1, 1, H), lambda i: (i, 0, 0))),
        compiler_params=cparams,
    )(xf, w1_io)

    # global batch statistics (tiny (H,)-sized math in plain JAX)
    mean = jnp.sum(tile_sum[:, 0, :], axis=0) / N
    var = jnp.maximum(jnp.sum(tile_sq[:, 0, :], axis=0) / N - mean * mean, 0.0)
    scale = gamma * jax.lax.rsqrt(var + 1e-5)                 # gamma folded in
    shift = beta - mean * scale

    # pass 2: BN affine -> ReLU -> Linear2
    out = pl.pallas_call(
        _pass2_kernel,
        out_shape=jax.ShapeDtypeStruct((N, H), x.dtype),
        grid=(n_blocks,),
        in_specs=[pl.BlockSpec((n_tile, H), lambda i: (i, 0)),
                  pl.BlockSpec((1, H), lambda i: (0, 0)),
                  pl.BlockSpec((1, H), lambda i: (0, 0)),
                  pl.BlockSpec((H, H), lambda i: (0, 0)),
                  pl.BlockSpec((1, H), lambda i: (0, 0))],
        out_specs=pl.BlockSpec((n_tile, H), lambda i: (i, 0)),
        compiler_params=cparams,
    )(h, scale.reshape(1, H), shift.reshape(1, H), w2_io, b2_r)
    return out


# --------------------------------------------------------------------------
# References for verification.
# --------------------------------------------------------------------------
def reference_f32(x, w1, b1, gamma, beta, w2, b2):
    """Faithful f32 reimplementation of the PyTorch module (training mode)."""
    nbs = [x[:, i, :] for i in range(4)]
    m = jnp.ones_like(nbs[0])
    for i in range(4):
        for j in range(i + 1, 4):
            m = m * (nbs[i] - nbs[j])
    m = jnp.sign(m) * jnp.power(jnp.abs(m) + 1e-6, 1.0 / 6.0)
    h = m @ w1.T + b1
    mean = jnp.mean(h, axis=0, keepdims=True)
    var = jnp.mean((h - mean) ** 2, axis=0, keepdims=True)
    h = (h - mean) / jnp.sqrt(var + 1e-5)
    h = h * gamma + beta
    h = jnp.maximum(h, 0.0)
    return h @ w2.T + b2


def reference_bf16(x, w1, b1, gamma, beta, w2, b2):
    """Mirrors the kernel math (bf16 MXU inputs, f32 stats) to isolate bugs
    from expected bf16 quantization error."""
    del b1
    nbs = [x[:, i, :] for i in range(4)]
    m = jnp.ones_like(nbs[0])
    for i in range(4):
        for j in range(i + 1, 4):
            m = m * (nbs[i] - nbs[j])
    root = jnp.power(jnp.abs(m) + 1e-6, 1.0 / 6.0)
    m = jnp.where(m > 0, root, jnp.where(m < 0, -root, 0.0))
    h = jnp.dot(m.astype(jnp.bfloat16), w1.T.astype(jnp.bfloat16),
                preferred_element_type=jnp.float32)
    mean = jnp.mean(h, axis=0, keepdims=True)
    var = jnp.maximum(jnp.mean(h * h, axis=0, keepdims=True) - mean * mean, 0.0)
    scale = gamma * jax.lax.rsqrt(var + 1e-5)
    shift = beta - mean * scale
    hn = jnp.maximum(h * scale + shift, 0.0)
    return (jnp.dot(hn.astype(jnp.bfloat16), w2.T.astype(jnp.bfloat16),
                    preferred_element_type=jnp.float32) + b2)


if __name__ == "__main__":
    N, H = 256, 32
    key = jax.random.PRNGKey(0)
    kx, kw1, kb1, kw2, kb2 = jax.random.split(key, 5)

    x = jax.random.normal(kx, (N, 4, H), dtype=jnp.float32)

    # Synthetic parameters; shapes match nn.Linear(H,H) x2 + BatchNorm1d(H).
    bound = 1.0 / np.sqrt(H)
    w1 = jax.random.uniform(kw1, (H, H), minval=-bound, maxval=bound, dtype=jnp.float32)
    b1 = jax.random.uniform(kb1, (H,), minval=-bound, maxval=bound, dtype=jnp.float32)
    w2 = jax.random.uniform(kw2, (H, H), minval=-bound, maxval=bound, dtype=jnp.float32)
    b2 = jax.random.uniform(kb2, (H,), minval=-bound, maxval=bound, dtype=jnp.float32)
    gamma = jnp.ones((H,), dtype=jnp.float32)    # BatchNorm1d default weight
    beta = jnp.zeros((H,), dtype=jnp.float32)    # BatchNorm1d default bias

    ref_q = reference_bf16(x, w1, b1, gamma, beta, w2, b2)
    ref = reference_f32(x, w1, b1, gamma, beta, w2, b2)

    # ---- fused single-VMEM-block path (selected automatically for small N) ----
    out_fused = tetra_differences_product(x, w1, b1, gamma, beta, w2, b2)
    out_fused = jax.block_until_ready(out_fused)
    assert out_fused.shape == (N, H)
    np.testing.assert_allclose(np.asarray(out_fused), np.asarray(ref_q),
                               rtol=2e-3, atol=2e-3)
    np.testing.assert_allclose(np.asarray(out_fused), np.asarray(ref),
                               rtol=5e-2, atol=5e-2)

    # ---- tiled two-pass path (grid of 2 blocks, pipelined over N) ----
    out_tiled = tetra_differences_product(x, w1, b1, gamma, beta, w2, b2,
                                          n_tile=128, force_tiled=True)
    out_tiled = jax.block_until_ready(out_tiled)
    assert out_tiled.shape == (N, H)
    np.testing.assert_allclose(np.asarray(out_tiled), np.asarray(ref_q),
                               rtol=2e-3, atol=2e-3)
    np.testing.assert_allclose(np.asarray(out_tiled), np.asarray(ref),
                               rtol=5e-2, atol=5e-2)

    print("KERNEL_OK")
</pallas_src>

<mosaic_0001>
module attributes {stable_mosaic.version = 11 : i64} {
  func.func @_fused_kernel(%arg0: memref<256x128xf32, #tpu.memory_space<vmem>>, %arg1: memref<32x32xbf16, #tpu.memory_space<vmem>>, %arg2: memref<1x32xf32, #tpu.memory_space<vmem>>, %arg3: memref<1x32xf32, #tpu.memory_space<vmem>>, %arg4: memref<32x32xbf16, #tpu.memory_space<vmem>>, %arg5: memref<1x32xf32, #tpu.memory_space<vmem>>, %arg6: memref<256x32xf32, #tpu.memory_space<vmem>>) attributes {dimension_semantics = [], scalar_prefetch = 0 : i64, scratch_operands = 0 : i64, tpu.core_type = #tpu.core_type<tc>} {
    %c0 = arith.constant 0 : index
    %c0_0 = arith.constant 0 : index
    %0 = vector.load %arg0[%c0, %c0_0] : memref<256x128xf32, #tpu.memory_space<vmem>>, vector<256x128xf32>
    %1 = vector.extract_strided_slice %0 {offsets = [0, 0], sizes = [256, 32], strides = [1, 1]} : vector<256x128xf32> to vector<256x32xf32>
    %2 = vector.extract_strided_slice %0 {offsets = [0, 32], sizes = [256, 32], strides = [1, 1]} : vector<256x128xf32> to vector<256x32xf32>
    %3 = vector.extract_strided_slice %0 {offsets = [0, 64], sizes = [256, 32], strides = [1, 1]} : vector<256x128xf32> to vector<256x32xf32>
    %4 = vector.extract_strided_slice %0 {offsets = [0, 96], sizes = [256, 32], strides = [1, 1]} : vector<256x128xf32> to vector<256x32xf32>
    %5 = arith.subf %1, %2 : vector<256x32xf32>
    %6 = arith.subf %1, %3 : vector<256x32xf32>
    %7 = arith.mulf %5, %6 : vector<256x32xf32>
    %8 = arith.subf %1, %4 : vector<256x32xf32>
    %9 = arith.mulf %7, %8 : vector<256x32xf32>
    %10 = arith.subf %2, %3 : vector<256x32xf32>
    %11 = arith.mulf %9, %10 : vector<256x32xf32>
    %12 = arith.subf %2, %4 : vector<256x32xf32>
    %13 = arith.mulf %11, %12 : vector<256x32xf32>
    %14 = arith.subf %3, %4 : vector<256x32xf32>
    %15 = arith.mulf %13, %14 : vector<256x32xf32>
    %16 = math.absf %15 : vector<256x32xf32>
    %cst = arith.constant 9.99999997E-7 : f32
    %17 = vector.broadcast %cst : f32 to vector<256x32xf32>
    %18 = arith.addf %16, %17 : vector<256x32xf32>
    %cst_1 = arith.constant 0.166666672 : f32
    %19 = vector.broadcast %cst_1 : f32 to vector<256x32xf32>
    %20 = math.powf %18, %19 : vector<256x32xf32>
    %cst_2 = arith.constant 0.000000e+00 : f32
    %21 = vector.broadcast %cst_2 : f32 to vector<256x32xf32>
    %22 = arith.cmpf ogt, %15, %21 : vector<256x32xf32>
    %cst_3 = arith.constant 0.000000e+00 : f32
    %23 = vector.broadcast %cst_3 : f32 to vector<256x32xf32>
    %24 = arith.cmpf olt, %15, %23 : vector<256x32xf32>
    %cst_4 = arith.constant 0.000000e+00 : f32
    %25 = vector.broadcast %cst_4 : f32 to vector<256x32xf32>
    %26 = arith.subf %25, %20 : vector<256x32xf32>
    %cst_5 = arith.constant 0.000000e+00 : f32
    %27 = vector.broadcast %cst_5 : f32 to vector<256x32xf32>
    %28 = arith.select %24, %26, %27 : vector<256x32xi1>, vector<256x32xf32>
    %29 = arith.select %22, %20, %28 : vector<256x32xi1>, vector<256x32xf32>
    %30 = arith.truncf %29 : vector<256x32xf32> to vector<256x32xbf16>
    %c0_6 = arith.constant 0 : index
    %c0_7 = arith.constant 0 : index
    %31 = vector.load %arg1[%c0_6, %c0_7] : memref<32x32xbf16, #tpu.memory_space<vmem>>, vector<32x32xbf16>
    %cst_8 = arith.constant dense<0.000000e+00> : vector<256x32xf32>
    %32 = tpu.matmul %30, %31, %cst_8 {dimension_numbers = #tpu.dot_dimension_numbers<[1], [0], [0], [1], [0, 0, 1, 1], [], []>} : vector<256x32xbf16>, vector<32x32xbf16>, vector<256x32xf32> -> vector<256x32xf32>
    %cst_9 = arith.constant dense<0.000000e+00> : vector<32xf32>
    %33 = vector.multi_reduction <add>, %32, %cst_9 [0] : vector<256x32xf32> to vector<32xf32>
    %34 = vector.shape_cast %33 : vector<32xf32> to vector<1x32xf32>
    %cst_10 = arith.constant 3.906250e-03 : f32
    %35 = vector.broadcast %cst_10 : f32 to vector<1x32xf32>
    %36 = arith.mulf %34, %35 : vector<1x32xf32>
    %37 = arith.mulf %32, %32 : vector<256x32xf32>
    %cst_11 = arith.constant dense<0.000000e+00> : vector<32xf32>
    %38 = vector.multi_reduction <add>, %37, %cst_11 [0] : vector<256x32xf32> to vector<32xf32>
    %39 = vector.shape_cast %38 : vector<32xf32> to vector<1x32xf32>
    %cst_12 = arith.constant 3.906250e-03 : f32
    %40 = vector.broadcast %cst_12 : f32 to vector<1x32xf32>
    %41 = arith.mulf %39, %40 : vector<1x32xf32>
    %42 = arith.mulf %36, %36 : vector<1x32xf32>
    %43 = arith.subf %41, %42 : vector<1x32xf32>
    %cst_13 = arith.constant 0.000000e+00 : f32
    %44 = vector.broadcast %cst_13 : f32 to vector<1x32xf32>
    %45 = arith.maximumf %43, %44 : vector<1x32xf32>
    %c0_14 = arith.constant 0 : index
    %c0_15 = arith.constant 0 : index
    %46 = vector.load %arg2[%c0_14, %c0_15] : memref<1x32xf32, #tpu.memory_space<vmem>>, vector<1x32xf32>
    %cst_16 = arith.constant 9.99999974E-6 : f32
    %47 = vector.broadcast %cst_16 : f32 to vector<1x32xf32>
    %48 = arith.addf %45, %47 : vector<1x32xf32>
    %49 = math.rsqrt %48 : vector<1x32xf32>
    %50 = arith.mulf %46, %49 : vector<1x32xf32>
    %c0_17 = arith.constant 0 : index
    %c0_18 = arith.constant 0 : index
    %51 = vector.load %arg3[%c0_17, %c0_18] : memref<1x32xf32, #tpu.memory_space<vmem>>, vector<1x32xf32>
    %52 = arith.mulf %36, %50 : vector<1x32xf32>
    %53 = arith.subf %51, %52 : vector<1x32xf32>
    %54 = vector.broadcast %50 : vector<1x32xf32> to vector<256x32xf32>
    %55 = arith.mulf %32, %54 : vector<256x32xf32>
    %56 = vector.broadcast %53 : vector<1x32xf32> to vector<256x32xf32>
    %57 = arith.addf %55, %56 : vector<256x32xf32>
    %cst_19 = arith.constant 0.000000e+00 : f32
    %58 = vector.broadcast %cst_19 : f32 to vector<256x32xf32>
    %59 = arith.maximumf %57, %58 : vector<256x32xf32>
    %60 = arith.truncf %59 : vector<256x32xf32> to vector<256x32xbf16>
    %c0_20 = arith.constant 0 : index
    %c0_21 = arith.constant 0 : index
    %61 = vector.load %arg4[%c0_20, %c0_21] : memref<32x32xbf16, #tpu.memory_space<vmem>>, vector<32x32xbf16>
    %cst_22 = arith.constant dense<0.000000e+00> : vector<256x32xf32>
    %62 = tpu.matmul %60, %61, %cst_22 {dimension_numbers = #tpu.dot_dimension_numbers<[1], [0], [0], [1], [0, 0, 1, 1], [], []>} : vector<256x32xbf16>, vector<32x32xbf16>, vector<256x32xf32> -> vector<256x32xf32>
    %c0_23 = arith.constant 0 : index
    %c0_24 = arith.constant 0 : index
    %63 = vector.load %arg5[%c0_23, %c0_24] : memref<1x32xf32, #tpu.memory_space<vmem>>, vector<1x32xf32>
    %64 = vector.broadcast %63 : vector<1x32xf32> to vector<256x32xf32>
    %65 = arith.addf %62, %64 : vector<256x32xf32>
    %c0_25 = arith.constant 0 : index
    %c0_26 = arith.constant 0 : index
    %66 = vector.load %arg6[%c0_25, %c0_26] : memref<256x32xf32, #tpu.memory_space<vmem>>, vector<256x32xf32>
    tpu.vector_store %arg6[%c0_25, %c0_26], %65 {strides = array<i32>} : memref<256x32xf32, #tpu.memory_space<vmem>>, vector<256x32xf32>,
    return
  }
}

</mosaic_0001>

<bundles_post_ra>
// kernel: tpu_custom_call.1
= control target key start
LH: loop header
LB: loop body
LE: loop exit
PB: predicated region body
PF: predicated region fallthrough
CT: control target
= control target key end

     0   :  { %11 = vsyncpa [#allocation3], 0  ;;  %s5650_s0 = inlined_call_operand.hbm [shape: f32[256,128], index: 0, kind: input, shape index: {}]   ;;  %s5651_s1 = inlined_call_operand.hbm [shape: bf16[32,32], index: 1, kind: input, shape index: {}]   ;;  %s5652_s2 = inlined_call_operand.vmem [shape: f32[1,32], index: 2, kind: input, shape index: {}]   ;;  %s5653_s3 = inlined_call_operand.vmem [shape: f32[1,32], index: 3, kind: input, shape index: {}]   ;;  %s5654_s4 = inlined_call_operand.hbm [shape: bf16[32,32], index: 4, kind: input, shape index: {}]   ;;  %s5655_s5 = inlined_call_operand.vmem [shape: f32[1,32], index: 5, kind: input, shape index: {}]   ;;  %s5656_s6 = inlined_call_operand.vmem [shape: f32[256,32], index: 6, kind: output, shape index: {}]  }
   0x1   :  { %12 = vsyncpa [#allocation5], 0  ;;  %s3315_s21 = smov [#allocation4]   ;;  %s3245_s25 = scalar_lea.hbm %s5651_s1, 256 }
   0x2   :  { %s30_s22 = sshll.u32 %s3315_s21, 4  ;;  %p3246_p0 = scmp.ne.s32.totalorder %s5651_s1, %s3245_s25  ;;  %s31_s22 = int_to_ptr.vmem [resolvable:$true] %s30_s22 }
   0x3   :  { %p3249_p1 = scmp.lt.u32.totalorder %s3245_s25, %s5651_s1 }
   0x5   :  { %p3251_p2 = pnand %p3249_p1, %p3246_p0 }
   0x7   :  { %3254 = shalt.err (!%p3251_p2)
}
   0x8   :  { %s3255_s30 = scalar_lea.vmem %s31_s22, 256  ;;  %p3260_p4 = scmp.lt.s32.totalorder %s31_s22, %s31_s22 }
   0x9   :  { %p3256_p3 = scmp.ne.s32.totalorder %s31_s22, %s3255_s30  ;;  %p3261_p5 = scmp.lt.s32.totalorder %s3255_s30, %s3255_s30 }
   0xb   :  { %p3262_p6 = por %p3261_p5, %p3260_p4 }
   0xd   :  { %p3263_p7 = pnand %p3262_p6, %p3256_p3 }
   0xf   :  { %3266 = shalt.err (!%p3263_p7)
}
  0x10   :  { %s3316_s7 = smov 64   ;;  %s3317_s8 = smov 4  }
  0x11   :  { %36 = dma.hbm_to_vmem [thread:$0]  %s5651_s1, 256, %s31_s22, [#allocation5], %s3316_s7, %s3316_s7, %s3317_s8  }
  0x12   :  { %s3318_s11 = smov [#allocation2]   ;;  %s3267_s15 = scalar_lea.hbm %s5650_s0, 4096 }
  0x13   :  { %s18_s12 = sshll.u32 %s3318_s11, 4  ;;  %p3268_p8 = scmp.ne.s32.totalorder %s5650_s0, %s3267_s15  ;;  %s19_s12 = int_to_ptr.vmem [resolvable:$true] %s18_s12 }
  0x14   :  { %p3271_p9 = scmp.lt.u32.totalorder %s3267_s15, %s5650_s0 }
  0x16   :  { %p3273_p10 = pnand %p3271_p9, %p3268_p8 }
  0x18   :  { %3276 = shalt.err (!%p3273_p10)
}
  0x19   :  { %s3277_s20 = scalar_lea.vmem %s19_s12, 4096  ;;  %p3282_p12 = scmp.lt.s32.totalorder %s19_s12, %s19_s12 }
  0x1a   :  { %p3278_p11 = scmp.ne.s32.totalorder %s19_s12, %s3277_s20  ;;  %p3283_p13 = scmp.lt.s32.totalorder %s3277_s20, %s3277_s20 }
  0x1c   :  { %p3284_p0 = por %p3283_p13, %p3282_p12 }
  0x1e   :  { %p3285_p1 = pnand %p3284_p0, %p3278_p11 }
  0x20   :  { %3288 = shalt.err (!%p3285_p1)
}
  0x21   :  { %s3319_s1 = smov 128   ;;  %s3320_s21 = smov 8  }
  0x22   :  { %24 = dma.hbm_to_vmem [thread:$0]  %s5650_s0, 4096, %s19_s12, [#allocation3], %s3319_s1, %s3319_s1, %s3320_s21  }
  0x23   :  { %s3321_s24 = smov [#allocation6]   ;;  %s3289_s28 = scalar_lea.hbm %s5654_s4, 256 }
  0x24   :  { %s46_s25 = sshll.u32 %s3321_s24, 4  ;;  %p3290_p2 = scmp.ne.s32.totalorder %s5654_s4, %s3289_s28  ;;  %s47_s25 = int_to_ptr.vmem [resolvable:$true] %s46_s25 }
  0x25   :  { %p3293_p3 = scmp.lt.u32.totalorder %s3289_s28, %s5654_s4 }
  0x27   :  { %p3295_p4 = pnand %p3293_p3, %p3290_p2 }
  0x29   :  { %3298 = shalt.err (!%p3295_p4)
}
  0x2a   :  { %s3299_s11 = scalar_lea.vmem %s47_s25, 256  ;;  %p3304_p6 = scmp.lt.s32.totalorder %s47_s25, %s47_s25 }
  0x2b   :  { %p3300_p5 = scmp.ne.s32.totalorder %s47_s25, %s3299_s11  ;;  %p3305_p7 = scmp.lt.s32.totalorder %s3299_s11, %s3299_s11 }
  0x2d   :  { %p3306_p8 = por %p3305_p7, %p3304_p6 }
  0x2f   :  { %p3307_p9 = pnand %p3306_p8, %p3300_p5 }
  0x31   :  { %3310 = shalt.err (!%p3307_p9)
}
  0x32   :  { %52 = dma.hbm_to_vmem [thread:$0]  %s5654_s4, 256, %s47_s25, [#allocation5], %s3316_s7, %s3316_s7, %s3317_s8  }
  0x33   :  { %3311 = dma.done.wait [#allocation3], 4096  }
  0x34   :  { %3312 = vsyncadd [#allocation3], 4294963200 }
  0x35   :  { %3313 = dma.done.wait [#allocation5], 512  }
  0x36   :  { %3314 = vsyncadd [#allocation5], 4294966784  ;;  %v3401_v0 = vld [vmem:[#allocation2 + $0x10] sm:$0xff]  ;;  %v3403_v1 = vld [vmem:[#allocation2] sm:$0xff]  ;;  %s3322_s13 = smov 96   ;;  %s3323_s4 = smov 32  }
  0x37   :  { %133 = vrot.lane.b32.xlu1 %v3401_v0, %s3322_s13  ;;  %129 = vrot.lane.b32.xlu0 %v3403_v1, %s3322_s13  ;;  %v3409_v2 = vld [vmem:[#allocation2 + $0x18] sm:$0xff]  ;;  %v3411_v3 = vld [vmem:[#allocation2 + $0x8] sm:$0xff]  ;;  %v3427_v5 = vld [vmem:[#allocation2 + $0x20] sm:$0xff] }
  0x38   :  { %v3425_v4 = vld [vmem:[#allocation2 + $0x28] sm:$0xff]  ;;  %v3433_v6 = vld [vmem:[#allocation2 + $0x38] sm:$0xff]  ;;  %v3435_v7 = vld [vmem:[#allocation2 + $0x30] sm:$0xff] }
  0x39   :  { %v3449_v8 = vld [vmem:[#allocation2 + $0x48] sm:$0xff]  ;;  %v3451_v9 = vld [vmem:[#allocation2 + $0x40] sm:$0xff]  ;;  %v3457_v10 = vld [vmem:[#allocation2 + $0x58] sm:$0xff] }
  0x3a   :  { %5689 = vst [vmem:[#allocation9_spill] sm:$0xff] %v3449_v8  ;;  %5690 = vst [vmem:[#allocation10_spill] sm:$0xff] %v3451_v9  ;;  %v3459_v11 = vld [vmem:[#allocation2 + $0x50] sm:$0xff]  ;;  %v3473_v12 = vld [vmem:[#allocation2 + $0x68] sm:$0xff] }
  0x3b   :  { %135 = vrot.lane.b32.xlu1 %v3409_v2, %s3322_s13  ;;  %131 = vrot.lane.b32.xlu0 %v3411_v3, %s3322_s13  ;;  %v3475_v13 = vld [vmem:[#allocation2 + $0x60] sm:$0xff]  ;;  %v3481_v14 = vld [vmem:[#allocation2 + $0x78] sm:$0xff]  ;;  %v3483_v15 = vld [vmem:[#allocation2 + $0x70] sm:$0xff] }
  0x3c   :  { %v3497_v16 = vld [vmem:[#allocation2 + $0x88] sm:$0xff]  ;;  %v3499_v17 = vld [vmem:[#allocation2 + $0x80] sm:$0xff]  ;;  %v3505_v18 = vld [vmem:[#allocation2 + $0x98] sm:$0xff] }
  0x3d   :  { %v3507_v19 = vld [vmem:[#allocation2 + $0x90] sm:$0xff]  ;;  %v3521_v20 = vld [vmem:[#allocation2 + $0xa8] sm:$0xff]  ;;  %v3523_v21 = vld [vmem:[#allocation2 + $0xa0] sm:$0xff] }
  0x3e   :  { %v3529_v22 = vld [vmem:[#allocation2 + $0xb8] sm:$0xff]  ;;  %v3531_v23 = vld [vmem:[#allocation2 + $0xb0] sm:$0xff]  ;;  %v3545_v24 = vld [vmem:[#allocation2 + $0xc8] sm:$0xff] }
  0x3f   :  { %259 = vrot.lane.b32.xlu1 %v3411_v3, %s3316_s7  ;;  %257 = vrot.lane.b32.xlu0 %v3403_v1, %s3316_s7  ;;  %5691 = vst [vmem:[#allocation11_spill] sm:$0xff] %v3545_v24  ;;  %v3547_v25 = vld [vmem:[#allocation2 + $0xc0] sm:$0xff]  ;;  %v3553_v26 = vld [vmem:[#allocation2 + $0xd8] sm:$0xff]  ;;  %v3555_v27 = vld [vmem:[#allocation2 + $0xd0] sm:$0xff] }
  0x40   :  { %5692 = vst [vmem:[#allocation12_spill] sm:$0xff] %v3547_v25  ;;  %5693 = vst [vmem:[#allocation13_spill] sm:$0xff] %v3553_v26  ;;  %v94_v28 = vld [vmem:[#allocation2 + $0xe8] sm:$0xff]  ;;  %v93_v29 = vld [vmem:[#allocation2 + $0xe0] sm:$0xff] }
  0x41   :  { %5694 = vst [vmem:[#allocation14_spill] sm:$0xff] %v3555_v27  ;;  %v96_v32 = vld [vmem:[#allocation2 + $0xf8] sm:$0xff]  ;;  %v95_v33 = vld [vmem:[#allocation2 + $0xf0] sm:$0xff] }
  0x43   :  { %263 = vrot.lane.b32.xlu1 %v3409_v2, %s3316_s7  ;;  %261 = vrot.lane.b32.xlu0 %v3401_v0, %s3316_s7 }
  0x47   :  { %139 = vrot.lane.b32.xlu1 %v3425_v4, %s3322_s13  ;;  %137 = vrot.lane.b32.xlu0 %v3427_v5, %s3322_s13 }
  0x4b   :  { %143 = vrot.lane.b32.xlu1 %v3433_v6, %s3322_s13  ;;  %141 = vrot.lane.b32.xlu0 %v3435_v7, %s3322_s13 }
  0x4f   :  { %267 = vrot.lane.b32.xlu1 %v3425_v4, %s3316_s7  ;;  %265 = vrot.lane.b32.xlu0 %v3427_v5, %s3316_s7 }
  0x53   :  { %271 = vrot.lane.b32.xlu1 %v3433_v6, %s3316_s7  ;;  %269 = vrot.lane.b32.xlu0 %v3435_v7, %s3316_s7 }
  0x57   :  { %147 = vrot.lane.b32.xlu1 %v3449_v8, %s3322_s13  ;;  %145 = vrot.lane.b32.xlu0 %v3451_v9, %s3322_s13 }
  0x5b   :  { %151 = vrot.lane.b32.xlu1 %v3457_v10, %s3322_s13  ;;  %149 = vrot.lane.b32.xlu0 %v3459_v11, %s3322_s13 }
  0x5f   :  { %275 = vrot.lane.b32.xlu1 %v3449_v8, %s3316_s7  ;;  %273 = vrot.lane.b32.xlu0 %v3451_v9, %s3316_s7 }
  0x63   :  { %279 = vrot.lane.b32.xlu1 %v3457_v10, %s3316_s7  ;;  %277 = vrot.lane.b32.xlu0 %v3459_v11, %s3316_s7 }
  0x67   :  { %155 = vrot.lane.b32.xlu1 %v3473_v12, %s3322_s13  ;;  %153 = vrot.lane.b32.xlu0 %v3475_v13, %s3322_s13 }
  0x6b   :  { %159 = vrot.lane.b32.xlu1 %v3481_v14, %s3322_s13  ;;  %157 = vrot.lane.b32.xlu0 %v3483_v15, %s3322_s13 }
  0x6f   :  { %283 = vrot.lane.b32.xlu1 %v3473_v12, %s3316_s7  ;;  %281 = vrot.lane.b32.xlu0 %v3475_v13, %s3316_s7 }
  0x73   :  { %287 = vrot.lane.b32.xlu1 %v3481_v14, %s3316_s7  ;;  %285 = vrot.lane.b32.xlu0 %v3483_v15, %s3316_s7 }
  0x77   :  { %163 = vrot.lane.b32.xlu1 %v3497_v16, %s3322_s13  ;;  %161 = vrot.lane.b32.xlu0 %v3499_v17, %s3322_s13 }
  0x7b   :  { %167 = vrot.lane.b32.xlu1 %v3505_v18, %s3322_s13  ;;  %165 = vrot.lane.b32.xlu0 %v3507_v19, %s3322_s13 }
  0x7f   :  { %291 = vrot.lane.b32.xlu1 %v3497_v16, %s3316_s7  ;;  %289 = vrot.lane.b32.xlu0 %v3499_v17, %s3316_s7 }
  0x83   :  { %295 = vrot.lane.b32.xlu1 %v3505_v18, %s3316_s7  ;;  %293 = vrot.lane.b32.xlu0 %v3507_v19, %s3316_s7 }
  0x87   :  { %171 = vrot.lane.b32.xlu1 %v3521_v20, %s3322_s13  ;;  %169 = vrot.lane.b32.xlu0 %v3523_v21, %s3322_s13 }
  0x8b   :  { %175 = vrot.lane.b32.xlu1 %v3529_v22, %s3322_s13  ;;  %173 = vrot.lane.b32.xlu0 %v3531_v23, %s3322_s13 }
  0x8f   :  { %299 = vrot.lane.b32.xlu1 %v3521_v20, %s3316_s7  ;;  %297 = vrot.lane.b32.xlu0 %v3523_v21, %s3316_s7 }
  0x93   :  { %303 = vrot.lane.b32.xlu1 %v3529_v22, %s3316_s7  ;;  %301 = vrot.lane.b32.xlu0 %v3531_v23, %s3316_s7 }
  0x97   :  { %179 = vrot.lane.b32.xlu1 %v3545_v24, %s3322_s13  ;;  %177 = vrot.lane.b32.xlu0 %v3547_v25, %s3322_s13 }
  0x9b   :  { %183 = vrot.lane.b32.xlu1 %v3553_v26, %s3322_s13  ;;  %181 = vrot.lane.b32.xlu0 %v3555_v27, %s3322_s13 }
  0x9f   :  { %307 = vrot.lane.b32.xlu1 %v3545_v24, %s3316_s7  ;;  %305 = vrot.lane.b32.xlu0 %v3547_v25, %s3316_s7 }
  0xa3   :  { %311 = vrot.lane.b32.xlu1 %v3553_v26, %s3316_s7  ;;  %309 = vrot.lane.b32.xlu0 %v3555_v27, %s3316_s7 }
  0xa7   :  { %187 = vrot.lane.b32.xlu1 %v94_v28, %s3322_s13  ;;  %185 = vrot.lane.b32.xlu0 %v93_v29, %s3322_s13 }
  0xa9   :  { %v134_v30 = vpop.permute.xlu1 %133  ;;  %v130_v31 = vpop.permute.xlu0 %129 }
  0xaa   :  { %v225_v38 = vsub.f32 %v3403_v1, %v130_v31  ;;  %v227_v46 = vsub.f32 %v3401_v0, %v134_v30 }
  0xab   :  { %419 = vrot.lane.b32.xlu1 %v3411_v3, %s3323_s4  ;;  %417 = vrot.lane.b32.xlu0 %v3403_v1, %s3323_s4 }
  0xad   :  { %v136_v34 = vpop.permute.xlu1 %135  ;;  %v132_v35 = vpop.permute.xlu0 %131 }
  0xae   :  { %v226_v39 = vsub.f32 %v3411_v3, %v132_v35  ;;  %v228_v47 = vsub.f32 %v3409_v2, %v136_v34 }
  0xaf   :  { %191 = vrot.lane.b32.xlu1 %v96_v32, %s3322_s13  ;;  %189 = vrot.lane.b32.xlu0 %v95_v33, %s3322_s13 }
  0xb1   :  { %v260_v36 = vpop.permute.xlu1 %259  ;;  %v258_v37 = vpop.permute.xlu0 %257 }
  0xb2   :  { %v354_v40 = vsub.f32 %v3411_v3, %v260_v36  ;;  %v353_v41 = vsub.f32 %v3403_v1, %v258_v37 }
  0xb3   :  { %423 = vrot.lane.b32.xlu1 %v3409_v2, %s3323_s4  ;;  %421 = vrot.lane.b32.xlu0 %v3401_v0, %s3323_s4 }
  0xb4   :  { %v3585_v42 = vmul.f32 %v354_v40, %v226_v39  ;;  %v3587_v43 = vmul.f32 %v353_v41, %v225_v38 }
  0xb5   :  { %v264_v44 = vpop.permute.xlu1 %263  ;;  %v262_v45 = vpop.permute.xlu0 %261 }
  0xb6   :  { %v356_v48 = vsub.f32 %v3409_v2, %v264_v44  ;;  %v355_v49 = vsub.f32 %v3401_v0, %v262_v45 }
  0xb7   :  { %315 = vrot.lane.b32.xlu1 %v94_v28, %s3316_s7  ;;  %313 = vrot.lane.b32.xlu0 %v93_v29, %s3316_s7 }
  0xb8   :  { %v3595_v50 = vmul.f32 %v356_v48, %v228_v47  ;;  %v3597_v51 = vmul.f32 %v355_v49, %v227_v46 }
  0xb9   :  { %v140_v52 = vpop.permute.xlu1 %139  ;;  %v138_v53 = vpop.permute.xlu0 %137 }
  0xba   :  { %v3604_v58 = vsub.f32 %v3425_v4, %v140_v52  ;;  %v3607_v59 = vsub.f32 %v3427_v5, %v138_v53 }
  0xbb   :  { %319 = vrot.lane.b32.xlu1 %v96_v32, %s3316_s7  ;;  %317 = vrot.lane.b32.xlu0 %v95_v33, %s3316_s7 }
  0xbd   :  { %v144_v54 = vpop.permute.xlu1 %143  ;;  %v142_v55 = vpop.permute.xlu0 %141 }
  0xbe   :  { %v3620_v30 = vsub.f32 %v3433_v6, %v144_v54  ;;  %v3623_v31 = vsub.f32 %v3435_v7, %v142_v55 }
  0xbf   :  { %609 = vrot.lane.b32.xlu0 %v225_v38, %s3322_s13  ;;  %611 = vrot.lane.b32.xlu1 %v226_v39, %s3322_s13 }
  0xc1   :  { %v268_v56 = vpop.permute.xlu1 %267  ;;  %v266_v57 = vpop.permute.xlu0 %265 }
  0xc2   :  { %v358_v60 = vsub.f32 %v3425_v4, %v268_v56  ;;  %v357_v61 = vsub.f32 %v3427_v5, %v266_v57 }
  0xc3   :  { %613 = vrot.lane.b32.xlu0 %v227_v46, %s3322_s13  ;;  %615 = vrot.lane.b32.xlu1 %v228_v47, %s3322_s13 }
  0xc4   :  { %v3614_v62 = vmul.f32 %v358_v60, %v3604_v58  ;;  %v3617_v63 = vmul.f32 %v357_v61, %v3607_v59 }
  0xc5   :  { %v272_v28 = vpop.permute.xlu1 %271  ;;  %v270_v29 = vpop.permute.xlu0 %269 }
  0xc6   :  { %v360_v32 = vsub.f32 %v3433_v6, %v272_v28  ;;  %v359_v33 = vsub.f32 %v3435_v7, %v270_v29 }
  0xc7   :  { %771 = vrot.lane.b32.xlu1 %v354_v40, %s3322_s13  ;;  %769 = vrot.lane.b32.xlu0 %v353_v41, %s3322_s13 }
  0xc8   :  { %v3630_v34 = vmul.f32 %v360_v32, %v3620_v30  ;;  %v3633_v35 = vmul.f32 %v359_v33, %v3623_v31 }
  0xc9   :  { %v148_v36 = vpop.permute.xlu1 %147  ;;  %v146_v37 = vpop.permute.xlu0 %145 }
  0xca   :  { %5695 = vst [vmem:[#allocation15_spill] sm:$0xff] %v3630_v34  ;;  %5696 = vst [vmem:[#allocation16_spill] sm:$0xff] %v3633_v35  ;;  %v3642_v52 = vsub.f32 %v3449_v8, %v148_v36  ;;  %v3645_v53 = vsub.f32 %v3451_v9, %v146_v37 }
  0xcb   :  { %775 = vrot.lane.b32.xlu1 %v356_v48, %s3322_s13  ;;  %773 = vrot.lane.b32.xlu0 %v355_v49, %s3322_s13 }
  0xcd   :  { %v152_v44 = vpop.permute.xlu1 %151  ;;  %v150_v45 = vpop.permute.xlu0 %149 }
  0xce   :  { %v3745_v26 = vsub.f32 %v3459_v11, %v150_v45 }
  0xcf   :  { %427 = vrot.lane.b32.xlu1 %v3425_v4, %s3323_s4  ;;  %425 = vrot.lane.b32.xlu0 %v3427_v5, %s3323_s4 }
  0xd1   :  { %v276_v40 = vpop.permute.xlu1 %275  ;;  %v274_v41 = vpop.permute.xlu0 %273 }
  0xd2   :  { %v3648_v48 = vsub.f32 %v3449_v8, %v276_v40  ;;  %v3651_v49 = vsub.f32 %v3451_v9, %v274_v41 }
  0xd3   :  { %899 = vrot.lane.b32.xlu1 %v226_v39, %s3316_s7  ;;  %897 = vrot.lane.b32.xlu0 %v225_v38, %s3316_s7 }
  0xd4   :  { %v3657_v54 = vmul.f32 %v3648_v48, %v3642_v52  ;;  %v3661_v55 = vmul.f32 %v3651_v49, %v3645_v53 }
  0xd5   :  { %v280_v56 = vpop.permute.xlu1 %279  ;;  %v278_v57 = vpop.permute.xlu0 %277 }
  0xd6   :  { %5697 = vst [vmem:[#allocation17_spill] sm:$0xff] %v3657_v54  ;;  %5698 = vst [vmem:[#allocation18_spill] sm:$0xff] %v3661_v55  ;;  %v3767_v45 = vsub.f32 %v3459_v11, %v278_v57 }
  0xd7   :  { %431 = vrot.lane.b32.xlu1 %v3433_v6, %s3323_s4  ;;  %429 = vrot.lane.b32.xlu0 %v3435_v7, %s3323_s4 }
  0xd9   :  { %v3667_v28 = vpop.permute.xlu1 %155  ;;  %v3669_v39 = vpop.permute.xlu0 %153 }
  0xdb   :  { %903 = vrot.lane.b32.xlu1 %v228_v47, %s3316_s7  ;;  %901 = vrot.lane.b32.xlu0 %v227_v46, %s3316_s7 }
  0xdd   :  { %v3673_v38 = vpop.permute.xlu1 %159  ;;  %v3675_v29 = vpop.permute.xlu0 %157 }
  0xdf   :  { %619 = vrot.lane.b32.xlu1 %v3604_v58, %s3322_s13  ;;  %617 = vrot.lane.b32.xlu0 %v3607_v59, %s3322_s13 }
  0xe1   :  { %v3681_v36 = vpop.permute.xlu1 %283  ;;  %v3683_v37 = vpop.permute.xlu0 %281 }
  0xe3   :  { %623 = vrot.lane.b32.xlu1 %v3620_v30, %s3322_s13  ;;  %621 = vrot.lane.b32.xlu0 %v3623_v31, %s3322_s13 }
  0xe5   :  { %v3689_v46 = vpop.permute.xlu1 %287  ;;  %v3691_v47 = vpop.permute.xlu0 %285 }
  0xe7   :  { %779 = vrot.lane.b32.xlu1 %v358_v60, %s3322_s13  ;;  %777 = vrot.lane.b32.xlu0 %v357_v61, %s3322_s13 }
  0xe9   :  { %v3695_v40 = vpop.permute.xlu1 %163  ;;  %v3697_v41 = vpop.permute.xlu0 %161 }
  0xeb   :  { %783 = vrot.lane.b32.xlu1 %v360_v32, %s3322_s13  ;;  %781 = vrot.lane.b32.xlu0 %v359_v33, %s3322_s13  ;;  %v3085_v32 = vld [vmem:[#allocation4] sm:$0xff]  }
  0xec   :  { %2172 = vmatprep.subr.bf16.mxu0 %v3085_v32 }
  0xed   :  { %v3701_v55 = vpop.permute.xlu1 %167  ;;  %v3703_v54 = vpop.permute.xlu0 %165  ;;  %2173 = vmatpush3.bf16.msra.mxu0 %v3085_v32  ;;  %v3742_v32 = vsub.f32 %v3457_v10, %v152_v44  ;;  %v3764_v44 = vsub.f32 %v3457_v10, %v280_v56 }
  0xef   :  { %435 = vrot.lane.b32.xlu1 %v3449_v8, %s3323_s4  ;;  %433 = vrot.lane.b32.xlu0 %v3451_v9, %s3323_s4 }
  0xf1   :  { %v3709_v60 = vpop.permute.xlu1 %291  ;;  %v3711_v61 = vpop.permute.xlu0 %289 }
  0xf3   :  { %907 = vrot.lane.b32.xlu1 %v3604_v58, %s3316_s7  ;;  %905 = vrot.lane.b32.xlu0 %v3607_v59, %s3316_s7 }
  0xf5   :  { %v3717_v33 = vpop.permute.xlu1 %295  ;;  %v3719_v27 = vpop.permute.xlu0 %293 }
  0xf7   :  { %439 = vrot.lane.b32.xlu1 %v3457_v10, %s3323_s4  ;;  %437 = vrot.lane.b32.xlu0 %v3459_v11, %s3323_s4 }
  0xf9   :  { %v3725_v9 = vpop.permute.xlu1 %171  ;;  %v3727_v8 = vpop.permute.xlu0 %169 }
  0xfb   :  { %911 = vrot.lane.b32.xlu1 %v3620_v30, %s3316_s7  ;;  %909 = vrot.lane.b32.xlu0 %v3623_v31, %s3316_s7  ;;  %v3086_v31 = vld [vmem:[#allocation4 + $0x8] sm:$0xff]  }
  0xfc   :  { %2174 = vmatprep.subr.bf16.mxu0 %v3086_v31 }
  0xfd   :  { %v3733_v58 = vpop.permute.xlu1 %175  ;;  %v3735_v59 = vpop.permute.xlu0 %173  ;;  %2175 = vmatpush3.bf16.msra.mxu0 %v3086_v31 }
  0xff   :  { %627 = vrot.lane.b32.xlu1 %v3642_v52, %s3322_s13  ;;  %625 = vrot.lane.b32.xlu0 %v3645_v53, %s3322_s13 }
 0x101   :  { %v3747_v30 = vpop.permute.xlu1 %299  ;;  %v3749_v25 = vpop.permute.xlu0 %297 }
 0x102   :  { %5699 = vst [vmem:[#allocation19_spill] sm:$0xff] %v3749_v25 }
 0x103   :  { %631 = vrot.lane.b32.xlu1 %v3742_v32, %s3322_s13  ;;  %629 = vrot.lane.b32.xlu0 %v3745_v26, %s3322_s13 }
 0x105   :  { %v3755_v24 = vpop.permute.xlu1 %303  ;;  %v3757_v35 = vpop.permute.xlu0 %301 }
 0x107   :  { %787 = vrot.lane.b32.xlu1 %v3648_v48, %s3322_s13  ;;  %785 = vrot.lane.b32.xlu0 %v3651_v49, %s3322_s13 }
 0x109   :  { %v3769_v34 = vpop.permute.xlu1 %179  ;;  %v3771_v25 = vpop.permute.xlu0 %177 }
 0x10b   :  { %791 = vrot.lane.b32.xlu1 %v3764_v44, %s3322_s13  ;;  %789 = vrot.lane.b32.xlu0 %v3767_v45, %s3322_s13 }
 0x10d   :  { %v3777_v48 = vpop.permute.xlu1 %183  ;;  %v3779_v31 = vpop.permute.xlu0 %181 }
 0x10e   :  { %5700 = vst [vmem:[#allocation20_spill] sm:$0xff] %v3779_v31 }
 0x10f   :  { %443 = vrot.lane.b32.xlu1 %v3473_v12, %s3323_s4  ;;  %441 = vrot.lane.b32.xlu0 %v3475_v13, %s3323_s4 }
 0x111   :  { %v3785_v10 = vpop.permute.xlu1 %307  ;;  %v3787_v11 = vpop.permute.xlu0 %305 }
 0x112   :  { %5701 = vst [vmem:[#allocation21_spill] sm:$0xff] %v3785_v10  ;;  %5702 = vst [vmem:[#allocation22_spill] sm:$0xff] %v3787_v11  ;;  %v3839_v11 = vsub.f32 %v3473_v12, %v3681_v36 }
 0x113   :  { %915 = vrot.lane.b32.xlu1 %v3642_v52, %s3316_s7  ;;  %913 = vrot.lane.b32.xlu0 %v3645_v53, %s3316_s7  ;;  %v3811_v52 = vsub.f32 %v3473_v12, %v3667_v28  ;;  %v3815_v53 = vsub.f32 %v3475_v13, %v3669_v39  ;;  %v3827_v28 = vsub.f32 %v3483_v15, %v3675_v29 }
 0x114   :  { %v3855_v12 = vsub.f32 %v3483_v15, %v3691_v47 }
 0x115   :  { %v3793_v49 = vpop.permute.xlu1 %311  ;;  %v3795_v56 = vpop.permute.xlu0 %309  ;;  %5707 = vst [vmem:[#allocation27_spill] sm:$0xff] %v3815_v53  ;;  %5709 = vst [vmem:[#allocation29_spill] sm:$0xff] %v3827_v28 }
 0x116   :  { %5703 = vst [vmem:[#allocation23_spill] sm:$0xff] %v3793_v49  ;;  %5704 = vst [vmem:[#allocation24_spill] sm:$0xff] %v3795_v56 }
 0x117   :  { %447 = vrot.lane.b32.xlu1 %v3481_v14, %s3323_s4  ;;  %445 = vrot.lane.b32.xlu0 %v3483_v15, %s3323_s4  ;;  %5714 = vst [vmem:[#allocation34_spill] sm:$0xff] %v3855_v12 }
 0x119   :  { %v3801_v57 = vpop.permute.xlu1 %187  ;;  %v3803_v10 = vpop.permute.xlu0 %185 }
 0x11a   :  { %5705 = vst [vmem:[#allocation25_spill] sm:$0xff] %v3801_v57  ;;  %5706 = vst [vmem:[#allocation26_spill] sm:$0xff] %v3803_v10  ;;  %v3823_v10 = vsub.f32 %v3481_v14, %v3673_v38  ;;  %v3843_v38 = vsub.f32 %v3475_v13, %v3683_v37 }
 0x11b   :  { %919 = vrot.lane.b32.xlu1 %v3742_v32, %s3316_s7  ;;  %917 = vrot.lane.b32.xlu0 %v3745_v26, %s3316_s7 }
 0x11c   :  { %5708 = vst [vmem:[#allocation28_spill] sm:$0xff] %v3823_v10  ;;  %5712 = vst [vmem:[#allocation32_spill] sm:$0xff] %v3843_v38 }
 0x11d   :  { %v420_v56 = vpop.permute.xlu1 %419  ;;  %v418_v49 = vpop.permute.xlu0 %417 }
 0x11f   :  { %635 = vrot.lane.b32.xlu1 %v3811_v52, %s3322_s13  ;;  %633 = vrot.lane.b32.xlu0 %v3815_v53, %s3322_s13 }
 0x121   :  { %v3829_v57 = vpop.permute.xlu1 %191  ;;  %v3831_v39 = vpop.permute.xlu0 %189 }
 0x122   :  { %5710 = vst [vmem:[#allocation30_spill] sm:$0xff] %v3829_v57  ;;  %5711 = vst [vmem:[#allocation31_spill] sm:$0xff] %v3831_v39  ;;  %v3851_v39 = vsub.f32 %v3481_v14, %v3689_v46 }
 0x123   :  { %639 = vrot.lane.b32.xlu1 %v3823_v10, %s3322_s13  ;;  %637 = vrot.lane.b32.xlu0 %v3827_v28, %s3322_s13 }
 0x124   :  { %5713 = vst [vmem:[#allocation33_spill] sm:$0xff] %v3851_v39 }
 0x125   :  { %v424_v29 = vpop.permute.xlu1 %423  ;;  %v422_v31 = vpop.permute.xlu0 %421 }
 0x127   :  { %795 = vrot.lane.b32.xlu1 %v3839_v11, %s3322_s13  ;;  %793 = vrot.lane.b32.xlu0 %v3843_v38, %s3322_s13 }
 0x129   :  { %v3857_v36 = vpop.permute.xlu1 %315  ;;  %v3859_v13 = vpop.permute.xlu0 %313 }
 0x12a   :  { %5715 = vst [vmem:[#allocation35_spill] sm:$0xff] %v3857_v36  ;;  %5716 = vst [vmem:[#allocation36_spill] sm:$0xff] %v3859_v13  ;;  %v514_v13 = vsub.f32 %v3411_v3, %v420_v56  ;;  %v513_v36 = vsub.f32 %v3403_v1, %v418_v49 }
 0x12b   :  { %799 = vrot.lane.b32.xlu1 %v3851_v39, %s3322_s13  ;;  %797 = vrot.lane.b32.xlu0 %v3855_v12, %s3322_s13  ;;  %v3889_v12 = vsub.f32 %v3497_v16, %v3695_v40  ;;  %v3893_v39 = vsub.f32 %v3499_v17, %v3697_v41  ;;  %v3903_v40 = vsub.f32 %v3505_v18, %v3701_v55 }
 0x12c   :  { %v546_v3 = vmul.f32 %v514_v13, %v3585_v42  ;;  %v545_v1 = vmul.f32 %v513_v36, %v3587_v43  ;;  %v3907_v41 = vsub.f32 %v3507_v19, %v3703_v54  ;;  %v516_v42 = vsub.f32 %v3409_v2, %v424_v29 }
 0x12d   :  { %v3865_v37 = vpop.permute.xlu1 %319  ;;  %v3867_v57 = vpop.permute.xlu0 %317  ;;  %v515_v43 = vsub.f32 %v3401_v0, %v422_v31  ;;  %v3921_v54 = vsub.f32 %v3497_v16, %v3709_v60  ;;  %v3925_v13 = vsub.f32 %v3499_v17, %v3711_v61  ;;  %v3941_v60 = vsub.f32 %v3505_v18, %v3717_v33 }
 0x12e   :  { %5717 = vst [vmem:[#allocation37_spill] sm:$0xff] %v3865_v37  ;;  %5718 = vst [vmem:[#allocation38_spill] sm:$0xff] %v3867_v57  ;;  %v548_v0 = vmul.f32 %v516_v42, %v3595_v50  ;;  %v3945_v61 = vsub.f32 %v3507_v19, %v3719_v27 }
 0x12f   :  { %451 = vrot.lane.b32.xlu1 %v3497_v16, %s3323_s4  ;;  %449 = vrot.lane.b32.xlu0 %v3499_v17, %s3323_s4  ;;  %v547_v2 = vmul.f32 %v515_v43, %v3597_v51 }
 0x131   :  { %v612_v14 = vpop.permute.xlu1 %611  ;;  %v610_v15 = vpop.permute.xlu0 %609 }
 0x133   :  { %923 = vrot.lane.b32.xlu1 %v3811_v52, %s3316_s7  ;;  %921 = vrot.lane.b32.xlu0 %v3815_v53, %s3316_s7 }
 0x135   :  { %v616_v46 = vpop.permute.xlu1 %615  ;;  %v614_v47 = vpop.permute.xlu0 %613 }
 0x136   :  { %v707_v50 = vmul.f32 %v614_v47, %v547_v2 }
 0x137   :  { %455 = vrot.lane.b32.xlu1 %v3505_v18, %s3323_s4  ;;  %453 = vrot.lane.b32.xlu0 %v3507_v19, %s3323_s4 }
 0x139   :  { %v772_v57 = vpop.permute.xlu1 %771  ;;  %v770_v37 = vpop.permute.xlu0 %769 }
 0x13b   :  { %927 = vrot.lane.b32.xlu1 %v3823_v10, %s3316_s7  ;;  %925 = vrot.lane.b32.xlu0 %v3827_v28, %s3316_s7  ;;  %v706_v28 = vmul.f32 %v612_v14, %v546_v3  ;;  %v705_v10 = vmul.f32 %v610_v15, %v545_v1 }
 0x13d   :  { %v776_v38 = vpop.permute.xlu1 %775  ;;  %v774_v53 = vpop.permute.xlu0 %773  ;;  %v866_v55 = vmul.f32 %v772_v57, %v706_v28  ;;  %v865_v36 = vmul.f32 %v770_v37, %v705_v10  ;;  %v708_v57 = vmul.f32 %v616_v46, %v548_v0 }
 0x13e   :  { %v867_v33 = vmul.f32 %v774_v53, %v707_v50 }
 0x13f   :  { %643 = vrot.lane.b32.xlu1 %v3889_v12, %s3322_s13  ;;  %641 = vrot.lane.b32.xlu0 %v3893_v39, %s3322_s13  ;;  %v868_v18 = vmul.f32 %v776_v38, %v708_v57 }
 0x141   :  { %v3909_v49 = vpop.permute.xlu1 %427  ;;  %v3911_v56 = vpop.permute.xlu0 %425 }
 0x143   :  { %647 = vrot.lane.b32.xlu1 %v3903_v40, %s3322_s13  ;;  %645 = vrot.lane.b32.xlu0 %v3907_v41, %s3322_s13 }
 0x145   :  { %v900_v14 = vpop.permute.xlu1 %899  ;;  %v898_v15 = vpop.permute.xlu0 %897 }
 0x146   :  { %v3927_v3 = vmul.f32 %v900_v14, %v866_v55  ;;  %v3929_v1 = vmul.f32 %v898_v15, %v865_v36 }
 0x147   :  { %803 = vrot.lane.b32.xlu1 %v3921_v54, %s3322_s13  ;;  %801 = vrot.lane.b32.xlu0 %v3925_v13, %s3322_s13 }
 0x148   :  { %v1026_v16 = vand.u32 2147483647, %v3927_v3  ;;  %v1025_v17 = vand.u32 2147483647, %v3929_v1 }
 0x149   :  { %v3947_v31 = vpop.permute.xlu1 %431  ;;  %v3949_v10 = vpop.permute.xlu0 %429 }
 0x14a   :  { %v3951_v28 = vadd.f32 1e-06, %v1026_v16  ;;  %v3953_v51 = vadd.f32 1e-06, %v1025_v17 }
 0x14b   :  { %807 = vrot.lane.b32.xlu1 %v3941_v60, %s3322_s13  ;;  %805 = vrot.lane.b32.xlu0 %v3945_v61, %s3322_s13 }
 0x14c   :  { %v5676_v19 = vand.u32 2147483647, %v3953_v51  ;;  %v5673_v37 = vand.u32 2147483647, %v3951_v28  ;;  %vm2252_vm0 = vcmp.lt.f32.partialorder %v3953_v51, 0  ;;  %vm2253_vm1 = vcmp.eq.f32.partialorder %v3953_v51, 0 }
 0x14d   :  { %v904_v27 = vpop.permute.xlu1 %903  ;;  %v902_v29 = vpop.permute.xlu0 %901  ;;  %vm2278_vm3 = vcmp.lt.f32.partialorder %v3951_v28, 0  ;;  %vm2279_vm4 = vcmp.eq.f32.partialorder %v3951_v28, 0  ;;  %vm2265_vm14 = vcmp.ne.f32.partialorder %v3953_v51, %v3953_v51 }
 0x14e   :  { %v3961_v46 = vmul.f32 %v904_v27, %v868_v18  ;;  %v3963_v47 = vmul.f32 %v902_v29, %v867_v33  ;;  %3089 = vlog2.f32 %v5676_v19  ;;  %v518_v33 = vsub.f32 %v3425_v4, %v3909_v49 }
 0x14f   :  { %459 = vrot.lane.b32.xlu1 %v3521_v20, %s3323_s4  ;;  %457 = vrot.lane.b32.xlu0 %v3523_v21, %s3323_s4  ;;  %3091 = vlog2.f32 %v5673_v37  ;;  %v517_v27 = vsub.f32 %v3427_v5, %v3911_v56  ;;  %v4007_v29 = vsub.f32 %v3521_v20, %v3725_v9  ;;  %v4029_v56 = vsub.f32 %v3531_v23, %v3735_v59 }
 0x150   :  { %v1028_v53 = vand.u32 2147483647, %v3961_v46  ;;  %v1027_v38 = vand.u32 2147483647, %v3963_v47  ;;  %v550_v5 = vmul.f32 %v518_v33, %v3614_v62 }
 0x151   :  { %v620_v42 = vpop.permute.xlu1 %619  ;;  %v618_v43 = vpop.permute.xlu0 %617  ;;  %v549_v9 = vmul.f32 %v517_v27, %v3617_v63  ;;  %v520_v63 = vsub.f32 %v3433_v6, %v3947_v31 }
 0x152   :  { %v3975_v55 = vadd.f32 1e-06, %v1028_v53  ;;  %v3977_v36 = vadd.f32 1e-06, %v1027_v38  ;;  %v4011_v53 = vsub.f32 %v3523_v21, %v3727_v8  ;;  %v4025_v8 = vsub.f32 %v3529_v22, %v3733_v58 }
 0x153   :  { %931 = vrot.lane.b32.xlu1 %v3889_v12, %s3316_s7  ;;  %929 = vrot.lane.b32.xlu0 %v3893_v39, %s3316_s7  ;;  %v710_v19 = vmul.f32 %v620_v42, %v550_v5  ;;  %v709_v62 = vmul.f32 %v618_v43, %v549_v9  ;;  %v519_v58 = vsub.f32 %v3435_v7, %v3949_v10  ;;  %v5721_v42 = vld [vmem:[#allocation19_spill] sm:$0xff] }
 0x154   :  { %v5675_v14 = vand.u32 2147483647, %v3975_v55  ;;  %v5674_v15 = vand.u32 2147483647, %v3977_v36  ;;  %5719 = vst [vmem:[#allocation39_spill] sm:$0xff] %v4011_v53  ;;  %v4049_v6 = vsub.f32 %v3523_v21, %v5721_v42  ;;  %v4057_v7 = vsub.f32 %v3529_v22, %v3755_v24  ;;  %v5726_v21 = vld [vmem:[#allocation16_spill] sm:$0xff] }
 0x155   :  { %v3985_v0 = vpop.permute.xlu1 %623  ;;  %v3987_v2 = vpop.permute.xlu0 %621  ;;  %v4061_v10 = vsub.f32 %v3531_v23, %v3757_v35  ;;  %v5727_v24 = vand.u32 2147483647, %v3953_v51  ;;  %vm2330_vm5 = vcmp.lt.f32.partialorder %v3975_v55, 0  ;;  %vm2331_vm6 = vcmp.eq.f32.partialorder %v3975_v55, 0 }
 0x156   :  { %3093 = vlog2.f32 %v5675_v14  ;;  %5722 = vst [vmem:[#allocation19_spill] sm:$0xff] %v4049_v6  ;;  %5723 = vst [vmem:[#allocation41_spill] sm:$0xff] %v4057_v7  ;;  %vm2343_vm7 = vcmp.ne.f32.partialorder %v3975_v55, %v3975_v55  ;;  %vm2304_vm8 = vcmp.lt.f32.partialorder %v3977_v36, 0  ;;  %vm2305_vm9 = vcmp.eq.f32.partialorder %v3977_v36, 0 }
 0x157   :  { %3095 = vlog2.f32 %v5674_v15  ;;  %463 = vrot.lane.b32.xlu1 %v3529_v22, %s3323_s4  ;;  %461 = vrot.lane.b32.xlu0 %v3531_v23, %s3323_s4  ;;  %5724 = vst [vmem:[#allocation42_spill] sm:$0xff] %v4061_v10  ;;  %vm4079_vm2 = vcmp.eq.f32.partialorder %v5727_v24, 2139095040  ;;  %vm2317_vm11 = vcmp.ne.f32.partialorder %v3977_v36, %v3977_v36  ;;  %v5733_v42 = vand.u32 2147483647, %v3977_v36 }
 0x158   :  { %v3090_v16 = vpop.eup %3089  ;;  %vm2306_vm13 = vcmp.eq.f32.partialorder %v3977_v36, 1065353216  ;;  %vm2332_vm15 = vcmp.eq.f32.partialorder %v3975_v55, 1065353216 }
 0x159   :  { %v780_v17 = vpop.permute.xlu1 %779  ;;  %v778_v57 = vpop.permute.xlu0 %777  ;;  %v2250_v50 = vmul.f32 0.16666667, %v3090_v16  ;;  %vm4111_vm12 = vcmp.eq.f32.partialorder %v5733_v42, 2139095040 }
 0x15a   :  { %v3092_v18 = vpop.eup %3091  ;;  %v870_v59 = vmul.f32 %v780_v17, %v710_v19  ;;  %v869_v33 = vmul.f32 %v778_v57, %v709_v62  ;;  %v551_v19 = vmul.f32 %v519_v58, %v5726_v21  ;;  %v5730_v62 = vand.u32 2147483647, %v3975_v55 }
 0x15b   :  { %935 = vrot.lane.b32.xlu1 %v3903_v40, %s3316_s7  ;;  %933 = vrot.lane.b32.xlu0 %v3907_v41, %s3316_s7  ;;  %3097 = vpow2.f32 %v2250_v50  ;;  %v2276_v37 = vmul.f32 0.16666667, %v3092_v18 }
 0x15c   :  { %vm4101_vm10 = vcmp.eq.f32.partialorder %v5730_v62, 2139095040  ;;  %v5736_v62 = vld [vmem:[#allocation11_spill] sm:$0xff] }
 0x15d   :  { %v4013_v38 = vpop.permute.xlu1 %783  ;;  %v4015_v16 = vpop.permute.xlu0 %781  ;;  %3099 = vpow2.f32 %v2276_v37  ;;  %v4045_v37 = vsub.f32 %v3521_v20, %v3747_v30  ;;  %v5725_v20 = vld [vmem:[#allocation15_spill] sm:$0xff] }
 0x15e   :  { %v552_v30 = vmul.f32 %v520_v63, %v5725_v20 }
 0x15f   :  { %651 = vrot.lane.b32.xlu1 %v4007_v29, %s3322_s13  ;;  %649 = vrot.lane.b32.xlu0 %v4011_v53, %s3322_s13  ;;  %5720 = vst [vmem:[#allocation40_spill] sm:$0xff] %v4045_v37 }
 0x160   :  { %v3094_v4 = vpop.eup %3093  ;;  %v712_v58 = vmul.f32 %v3985_v0, %v552_v30 }
 0x161   :  { %v3096_v49 = vpop.eup %3095  ;;  %v2328_v50 = vmul.f32 0.16666667, %v3094_v4  ;;  %v4031_v18 = vpop.permute.xlu1 %435 }
 0x162   :  { %v4033_v15 = vpop.permute.xlu0 %433  ;;  %v2302_v14 = vmul.f32 0.16666667, %v3096_v49  ;;  %v872_v30 = vmul.f32 %v4013_v38, %v712_v58  ;;  %v5737_v38 = vld [vmem:[#allocation12_spill] sm:$0xff] }
 0x163   :  { %3101 = vpow2.f32 %v2328_v50  ;;  %655 = vrot.lane.b32.xlu1 %v4025_v8, %s3322_s13  ;;  %653 = vrot.lane.b32.xlu0 %v4029_v56, %s3322_s13 }
 0x164   :  { %3103 = vpow2.f32 %v2302_v14 }
 0x165   :  { %v908_v31 = vpop.permute.xlu1 %907  ;;  %v3098_v5 = vpop.eup %3097 }
 0x166   :  { %v906_v43 = vpop.permute.xlu0 %905  ;;  %v4051_v27 = vmul.f32 %v908_v31, %v870_v59  ;;  %v2258_v49 = vsel %vm2252_vm0, 2143289344, %v3098_v5 }
 0x167   :  { %v4053_v4 = vmul.f32 %v906_v43, %v869_v33  ;;  %811 = vrot.lane.b32.xlu1 %v4045_v37, %s3322_s13  ;;  %809 = vrot.lane.b32.xlu0 %v4049_v6, %s3322_s13  ;;  %v3100_v50 = vpop.eup %3099  ;;  %v711_v43 = vmul.f32 %v3987_v2, %v551_v19 }
 0x168   :  { %v1030_v14 = vand.u32 2147483647, %v4051_v27  ;;  %v2284_v24 = vsel %vm2278_vm3, 2143289344, %v3100_v50  ;;  %vm2291_vm3 = vcmp.ne.f32.partialorder %v3951_v28, %v3951_v28 }
 0x169   :  { %v1029_v17 = vand.u32 2147483647, %v4053_v4  ;;  %v4072_v22 = vpop.permute.xlu1 %439  ;;  %v2285_v63 = vsel %vm2279_vm4, 0, %v2284_v24  ;;  %vm1153_vm4 = vcmp.lt.f32.partialorder %v3929_v1, 0.0 }
 0x16a   :  { %v4074_v23 = vpop.permute.xlu0 %437  ;;  %v4086_v57 = vadd.f32 1e-06, %v1030_v14  ;;  %v2259_v14 = vsel %vm2253_vm1, 0, %v2258_v49  ;;  %v871_v49 = vmul.f32 %v4015_v16, %v711_v43  ;;  %vm1121_vm1 = vcmp.gt.f32.partialorder %v3929_v1, 0.0 }
 0x16b   :  { %v4088_v9 = vadd.f32 1e-06, %v1029_v17  ;;  %815 = vrot.lane.b32.xlu1 %v4057_v7, %s3322_s13  ;;  %813 = vrot.lane.b32.xlu0 %v4061_v10, %s3322_s13  ;;  %v2264_v16 = vsel %vm4079_vm2, 2139095040, %v2259_v14  ;;  %v5738_v14 = vand.u32 2147483647, %v3951_v28  ;;  %vm2254_vm2 = vcmp.eq.f32.partialorder %v3953_v51, 1065353216 }
 0x16c   :  { %v5678_v59 = vand.u32 2147483647, %v4086_v57  ;;  %v4243_v1 = vmul.f32 %v3767_v45, %v3745_v26  ;;  %v5749_v26 = vld [vmem:[#allocation22_spill] sm:$0xff] }
 0x16d   :  { %v3102_v33 = vpop.eup %3101  ;;  %v5677_v5 = vand.u32 2147483647, %v4088_v9  ;;  %v912_v20 = vpop.permute.xlu1 %911  ;;  %vm4169_vm0 = vcmp.eq.f32.partialorder %v5738_v14, 2139095040  ;;  %v5742_v14 = vld [vmem:[#allocation14_spill] sm:$0xff]  ;;  %v4263_v45 = vsub.f32 %v5737_v38, %v5749_v26  ;;  %v5753_v26 = vand.u32 2147483647, %v4088_v9 }
 0x16e   :  { %v910_v21 = vpop.permute.xlu0 %909  ;;  %v3104_v17 = vpop.eup %3103  ;;  %v2336_v0 = vsel %vm2330_vm5, 2143289344, %v3102_v33  ;;  %3105 = vlog2.f32 %v5678_v59  ;;  %v4141_v33 = vmul.f32 %v912_v20, %v872_v30  ;;  %v2290_v55 = vsel %vm4169_vm0, 2139095040, %v2285_v63 }
 0x16f   :  { %v2337_v2 = vsel %vm2331_vm6, 0, %v2336_v0  ;;  %v2310_v19 = vsel %vm2304_vm8, 2143289344, %v3104_v17  ;;  %3107 = vlog2.f32 %v5677_v5  ;;  %467 = vrot.lane.b32.xlu1 %v5736_v62, %s3323_s4  ;;  %465 = vrot.lane.b32.xlu0 %v5737_v38, %s3323_s4  ;;  %v4150_v17 = vmul.f32 %v910_v21, %v871_v49 }
 0x170   :  { %v2342_v50 = vsel %vm4101_vm10, 2139095040, %v2337_v2  ;;  %v2311_v58 = vsel %vm2305_vm9, 0, %v2310_v19  ;;  %v1032_v20 = vand.u32 2147483647, %v4141_v33  ;;  %v2268_v19 = vsel %vm2265_vm14, 2143289344, %v2264_v16 }
 0x171   :  { %v2346_v42 = vsel %vm2343_vm7, 2143289344, %v2342_v50  ;;  %v2316_v43 = vsel %vm4111_vm12, 2139095040, %v2311_v58  ;;  %v4152_v0 = vpop.permute.xlu1 %627  ;;  %v1031_v21 = vand.u32 2147483647, %v4150_v17  ;;  %v4183_v49 = vsub.f32 %v5736_v62, %v3769_v34 }
 0x172   :  { %v4156_v2 = vpop.permute.xlu0 %625  ;;  %v2320_v35 = vsel %vm2317_vm11, 2143289344, %v2316_v43  ;;  %v2347_v36 = vsel %vm2332_vm15, 1065353216, %v2346_v42  ;;  %v4177_v24 = vadd.f32 1e-06, %v1032_v20  ;;  %v2269_v63 = vsel %vm2254_vm2, 1065353216, %v2268_v19 }
 0x173   :  { %v2321_v31 = vsel %vm2306_vm13, 1065353216, %v2320_v35  ;;  %939 = vrot.lane.b32.xlu1 %v4007_v29, %s3316_s7  ;;  %937 = vrot.lane.b32.xlu0 %v4011_v53, %s3316_s7  ;;  %v4185_v58 = vadd.f32 1e-06, %v1031_v21  ;;  %v1188_v34 = vsub.f32 0.0, %v2347_v36  ;;  %v2294_v20 = vsel %vm2291_vm3, 2143289344, %v2290_v55  ;;  %v5741_v21 = vld [vmem:[#allocation13_spill] sm:$0xff] }
 0x174   :  { %v1187_v50 = vsub.f32 0.0, %v2321_v31  ;;  %v5682_v42 = vand.u32 2147483647, %v4177_v24  ;;  %vm1155_vm5 = vcmp.lt.f32.partialorder %v3963_v47, 0.0  ;;  %vm2280_vm6 = vcmp.eq.f32.partialorder %v3951_v28, 1065353216  ;;  %v5743_v28 = vld [vmem:[#allocation9_spill] sm:$0xff] }
 0x175   :  { %v4188_v43 = vpop.permute.xlu1 %631  ;;  %v2404_v16 = vand.u32 2147483647, %v4185_v58  ;;  %vm1154_vm7 = vcmp.lt.f32.partialorder %v3927_v3, 0.0  ;;  %vm1156_vm8 = vcmp.lt.f32.partialorder %v3961_v46, 0.0  ;;  %vm1123_vm9 = vcmp.gt.f32.partialorder %v3963_v47, 0.0 }
 0x176   :  { %v4190_v35 = vpop.permute.xlu0 %629  ;;  %3109 = vlog2.f32 %v5682_v42  ;;  %v1219_v19 = vsel %vm1155_vm5, %v1187_v50, 0.0  ;;  %v2295_v7 = vsel %vm2280_vm6, 1065353216, %v2294_v20  ;;  %v1185_v6 = vsub.f32 0.0, %v2269_v63  ;;  %v5744_v50 = vld [vmem:[#allocation10_spill] sm:$0xff] }
 0x177   :  { %471 = vrot.lane.b32.xlu1 %v5741_v21, %s3323_s4  ;;  %469 = vrot.lane.b32.xlu0 %v5742_v14, %s3323_s4  ;;  %3111 = vlog2.f32 %v2404_v16  ;;  %v1220_v42 = vsel %vm1156_vm8, %v1188_v34, 0.0  ;;  %v522_v53 = vsub.f32 %v5743_v28, %v4031_v18  ;;  %v1186_v37 = vsub.f32 0.0, %v2295_v7 }
 0x178   :  { %v3106_v30 = vpop.eup %3105  ;;  %v1217_v47 = vsel %vm1153_vm4, %v1185_v6, 0.0  ;;  %v1251_v20 = vsel %vm1123_vm9, %v2321_v31, %v1219_v19  ;;  %vm1124_vm10 = vcmp.gt.f32.partialorder %v3961_v46, 0.0  ;;  %vm1122_vm11 = vcmp.gt.f32.partialorder %v3927_v3, 0.0 }
 0x179   :  { %v3108_v51 = vpop.eup %3107  ;;  %v2380_v55 = vmul.f32 0.16666667, %v3106_v30  ;;  %v788_v5 = vpop.permute.xlu1 %787  ;;  %v521_v30 = vsub.f32 %v5744_v50, %v4033_v15  ;;  %v1218_v18 = vsel %vm1154_vm7, %v1186_v37, 0.0  ;;  %v1249_v34 = vsel %vm1121_vm1, %v2269_v63, %v1217_v47  ;;  %v5748_v63 = vld [vmem:[#allocation21_spill] sm:$0xff]  ;;  %v5751_v47 = vld [vmem:[#allocation24_spill] sm:$0xff] }
 0x17a   :  { %v786_v59 = vpop.permute.xlu0 %785  ;;  %v2354_v10 = vmul.f32 0.16666667, %v3108_v51  ;;  %v4233_v15 = vsub.f32 %v5737_v38, %v3771_v25  ;;  %v1250_v6 = vsel %vm1122_vm11, %v2295_v7, %v1218_v18  ;;  %vm1313_vm12 = vcmask 261120   ;;  %v5745_v7 = vld [vmem:[#allocation17_spill] sm:$0xff] }
 0x17b   :  { %3113 = vpow2.f32 %v2380_v55  ;;  %943 = vrot.lane.b32.xlu1 %v4025_v8, %s3316_s7  ;;  %941 = vrot.lane.b32.xlu0 %v4029_v56, %s3316_s7  ;;  %v4237_v46 = vmul.f32 %v3764_v44, %v3742_v32  ;;  %v1281_v3 = vpack.c.bf16 %v1250_v6, %v1249_v34  ;;  %v4247_v25 = vsub.f32 %v5741_v21, %v3777_v48  ;;  %v5747_v32 = vld [vmem:[#allocation20_spill] sm:$0xff]  ;;  %v5750_v48 = vld [vmem:[#allocation23_spill] sm:$0xff] }
 0x17c   :  { %3115 = vpow2.f32 %v2354_v10  ;;  %v1252_v10 = vsel %vm1124_vm10, %v2347_v36, %v1220_v42  ;;  %v554_v31 = vmul.f32 %v522_v53, %v5745_v7  ;;  %v5746_v36 = vld [vmem:[#allocation18_spill] sm:$0xff]  ;;  %v4255_v44 = vsub.f32 %v5742_v14, %v5747_v32  ;;  %v3220_v6 = vld [vmem:[#allocation2 + $0x50] sm:$0xff] }
 0x17d   :  { %v4227_v51 = vpop.permute.xlu1 %791  ;;  %v1282_v37 = vpack.c.bf16 %v1252_v10, %v1251_v20  ;;  %v553_v42 = vmul.f32 %v521_v30, %v5746_v36  ;;  %v4259_v19 = vsub.f32 %v5736_v62, %v5748_v63  ;;  %v4267_v53 = vsub.f32 %v5741_v21, %v5750_v48  ;;  %2176 = vmatprep.mubr.msk.bf16.mxu0 %vm1313_vm12, %v1281_v3  ;;  %v3219_v62 = vld [vmem:[#allocation2 + $0x58] sm:$0xff] }
 0x17e   :  { %v4229_v55 = vpop.permute.xlu0 %789  ;;  %v4276_v20 = vsub.f32 %v5742_v14, %v5751_v47  ;;  %v524_v18 = vsub.f32 %v3219_v62, %v4072_v22  ;;  %v714_v38 = vmul.f32 %v4152_v0, %v554_v31  ;;  %vm2382_vm13 = vcmp.lt.f32.partialorder %v4086_v57, 0 }
 0x17f   :  { %659 = vrot.lane.b32.xlu1 %v4183_v49, %s3322_s13  ;;  %657 = vrot.lane.b32.xlu0 %v4233_v15, %s3322_s13  ;;  %v713_v34 = vmul.f32 %v4156_v2, %v553_v42  ;;  %vm2383_vm14 = vcmp.eq.f32.partialorder %v4086_v57, 0  ;;  %v523_v10 = vsub.f32 %v3220_v6, %v4074_v23  ;;  %vm2384_vm15 = vcmp.eq.f32.partialorder %v4086_v57, 1065353216 }
 0x180   :  { %v3110_v30 = vpop.eup %3109  ;;  %2177 = vmatmul.mubr.msk.bf16.vlgmr.msra.gmra.mrb[0].mxu0 %vm1313_vm12, %v1282_v37  ;;  %vm1158_vm0 = vcmp.lt.f32.partialorder %v4051_v27, 0.0  ;;  %v874_v0 = vmul.f32 %v788_v5, %v714_v38  ;;  %vm2395_vm1 = vcmp.ne.f32.partialorder %v4086_v57, %v4086_v57  ;;  %vm2356_vm2 = vcmp.lt.f32.partialorder %v4088_v9, 0 }
 0x181   :  { %v4270_v28 = vpop.permute.xlu1 %443  ;;  %v3112_v21 = vpop.eup %3111  ;;  %v2432_v3 = vmul.f32 0.16666667, %v3110_v30  ;;  %v873_v2 = vmul.f32 %v786_v59, %v713_v34  ;;  %vm2357_vm3 = vcmp.eq.f32.partialorder %v4088_v9, 0  ;;  %vm1157_vm4 = vcmp.lt.f32.partialorder %v4053_v4, 0.0 }
 0x182   :  { %v4272_v50 = vpop.permute.xlu0 %441  ;;  %v2406_v22 = vmul.f32 0.16666667, %v3112_v21  ;;  %v5752_v36 = vand.u32 2147483647, %v4086_v57  ;;  %vm1126_vm6 = vcmp.gt.f32.partialorder %v4051_v27, 0.0  ;;  %vm2358_vm7 = vcmp.eq.f32.partialorder %v4088_v9, 1065353216 }
 0x183   :  { %663 = vrot.lane.b32.xlu1 %v4247_v25, %s3322_s13  ;;  %661 = vrot.lane.b32.xlu0 %v4255_v44, %s3322_s13  ;;  %3117 = vpow2.f32 %v2432_v3  ;;  %vm1125_vm8 = vcmp.gt.f32.partialorder %v4053_v4, 0.0  ;;  %vm2361_vm9 = vcmp.eq.f32.partialorder %v5753_v26, 2139095040  ;;  %vm2369_vm10 = vcmp.ne.f32.partialorder %v4088_v9, %v4088_v9  ;;  %v4367_v26 = vld [vmem:[#allocation2 + $0xe8] sm:$0xff] }
 0x184   :  { %3119 = vpow2.f32 %v2406_v22  ;;  %vm2387_vm5 = vcmp.eq.f32.partialorder %v5752_v36, 2139095040  ;;  %vm2434_vm11 = vcmp.lt.f32.partialorder %v4177_v24, 0  ;;  %v555_v57 = vmul.f32 %v523_v10, %v4243_v1 }
 0x185   :  { %v3114_v14 = vpop.eup %3113  ;;  %v916_v23 = vpop.permute.xlu1 %915 }
 0x186   :  { %v914_v37 = vpop.permute.xlu0 %913  ;;  %v3116_v7 = vpop.eup %3115  ;;  %v2388_v59 = vsel %vm2382_vm13, 2143289344, %v3114_v14  ;;  %v4298_v5 = vmul.f32 %v916_v23, %v874_v0  ;;  %v556_v14 = vmul.f32 %v524_v18, %v4237_v46  ;;  %vm2435_vm13 = vcmp.eq.f32.partialorder %v4177_v24, 0 }
 0x187   :  { %v4300_v31 = vmul.f32 %v914_v37, %v873_v2  ;;  %v2389_v42 = vsel %vm2383_vm14, 0, %v2388_v59  ;;  %v2362_v32 = vsel %vm2356_vm2, 2143289344, %v3116_v7  ;;  %819 = vrot.lane.b32.xlu1 %v4259_v19, %s3322_s13  ;;  %817 = vrot.lane.b32.xlu0 %v4263_v45, %s3322_s13  ;;  %vm2436_vm14 = vcmp.eq.f32.partialorder %v4177_v24, 1065353216 }
 0x188   :  { %v2394_v63 = vsel %vm2387_vm5, 2139095040, %v2389_v42  ;;  %v2363_v48 = vsel %vm2357_vm3, 0, %v2362_v32  ;;  %v1034_v30 = vand.u32 2147483647, %v4298_v5  ;;  %v716_v46 = vmul.f32 %v4188_v43, %v556_v14 }
 0x189   :  { %v2398_v47 = vsel %vm2395_vm1, 2143289344, %v2394_v63  ;;  %v2368_v62 = vsel %vm2361_vm9, 2139095040, %v2363_v48  ;;  %v1033_v38 = vand.u32 2147483647, %v4300_v31  ;;  %v4324_v34 = vpop.permute.xlu1 %447  ;;  %v715_v1 = vmul.f32 %v4190_v35, %v555_v57 }
 0x18a   :  { %v4326_v21 = vpop.permute.xlu0 %445  ;;  %v2399_v6 = vsel %vm2384_vm15, 1065353216, %v2398_v47  ;;  %v2372_v3 = vsel %vm2369_vm10, 2143289344, %v2368_v62  ;;  %v4331_v22 = vadd.f32 1e-06, %v1034_v30  ;;  %vm2447_vm15 = vcmp.ne.f32.partialorder %v4177_v24, %v4177_v24  ;;  %v4378_v62 = vld [vmem:[#allocation2 + $0xe0] sm:$0xff] }
 0x18b   :  { %v1190_v0 = vsub.f32 0.0, %v2399_v6  ;;  %v2373_v2 = vsel %vm2358_vm7, 1065353216, %v2372_v3  ;;  %v4336_v23 = vadd.f32 1e-06, %v1033_v38  ;;  %823 = vrot.lane.b32.xlu1 %v4267_v53, %s3322_s13  ;;  %821 = vrot.lane.b32.xlu0 %v4276_v20, %s3322_s13  ;;  %v5754_v32 = vand.u32 2147483647, %v4177_v24 }
 0x18c   :  { %v1189_v37 = vsub.f32 0.0, %v2373_v2  ;;  %v2482_v7 = vand.u32 2147483647, %v4331_v22  ;;  %vm2408_vm1 = vcmp.lt.f32.partialorder %v4185_v58, 0  ;;  %v876_v63 = vmul.f32 %v4227_v51, %v716_v46 }
 0x18d   :  { %v1222_v9 = vsel %vm1158_vm0, %v1190_v0, 0.0  ;;  %v2456_v18 = vand.u32 2147483647, %v4336_v23  ;;  %v920_v59 = vpop.permute.xlu1 %919  ;;  %v3118_v10 = vpop.eup %3117  ;;  %vm4359_vm0 = vcmp.eq.f32.partialorder %v5754_v32, 2139095040  ;;  %v875_v51 = vmul.f32 %v4229_v55, %v715_v1 }
 0x18e   :  { %v918_v36 = vpop.permute.xlu0 %917  ;;  %v1221_v42 = vsel %vm1157_vm4, %v1189_v37, 0.0  ;;  %3121 = vlog2.f32 %v2482_v7  ;;  %v3120_v35 = vpop.eup %3119  ;;  %v1254_v48 = vsel %vm1126_vm6, %v2399_v6, %v1222_v9  ;;  %v2440_v47 = vsel %vm2434_vm11, 2143289344, %v3118_v10 }
 0x18f   :  { %3123 = vlog2.f32 %v2456_v18  ;;  %475 = vrot.lane.b32.xlu1 %v4367_v26, %s3323_s4  ;;  %v1253_v30 = vsel %vm1125_vm8, %v2373_v2, %v1221_v42  ;;  %473 = vrot.lane.b32.xlu0 %v4378_v62, %s3323_s4  ;;  %v2441_v38 = vsel %vm2435_vm13, 0, %v2440_v47  ;;  %vm2409_vm2 = vcmp.eq.f32.partialorder %v4185_v58, 0 }
 0x190   :  { %vm4387_vm3 = vcmp.eq.f32.partialorder %v2404_v16, 2139095040  ;;  %v2414_v4 = vsel %vm2408_vm1, 2143289344, %v3120_v35  ;;  %v2446_v3 = vsel %vm4359_vm0, 2139095040, %v2441_v38  ;;  %v4397_v2 = vmul.f32 %v920_v59, %v876_v63  ;;  %v3223_v63 = vld [vmem:[#allocation2 + $0xf8] sm:$0xff] }
 0x191   :  { %v4391_v6 = vpop.permute.xlu1 %635  ;;  %v2415_v0 = vsel %vm2409_vm2, 0, %v2414_v4  ;;  %v4399_v14 = vmul.f32 %v918_v36, %v875_v51  ;;  %v2450_v16 = vsel %vm2447_vm15, 2143289344, %v2446_v3  ;;  %vm2421_vm4 = vcmp.ne.f32.partialorder %v4185_v58, %v4185_v58  ;;  %v3224_v51 = vld [vmem:[#allocation2 + $0xf0] sm:$0xff] }
 0x192   :  { %v4393_v55 = vpop.permute.xlu0 %633  ;;  %v2420_v37 = vsel %vm4387_vm3, 2139095040, %v2415_v0  ;;  %v1283_v57 = vpack.c.bf16 %v1254_v48, %v1253_v30  ;;  %v2451_v9 = vsel %vm2436_vm14, 1065353216, %v2450_v16  ;;  %vm2410_vm5 = vcmp.eq.f32.partialorder %v4185_v58, 1065353216 }
 0x193   :  { %947 = vrot.lane.b32.xlu1 %v4183_v49, %s3316_s7  ;;  %v2424_v46 = vsel %vm2421_vm4, 2143289344, %v2420_v37  ;;  %v1036_v59 = vand.u32 2147483647, %v4397_v2  ;;  %945 = vrot.lane.b32.xlu0 %v4233_v15, %s3316_s7  ;;  %v1192_v36 = vsub.f32 0.0, %v2451_v9  ;;  %v1035_v1 = vand.u32 2147483647, %v4399_v14 }
 0x194   :  { %v2425_v42 = vsel %vm2410_vm5, 1065353216, %v2424_v46  ;;  %2180 = vmatprep.mubr.msk.bf16.mxu0 %vm1313_vm12, %v1283_v57  ;;  %vm1160_vm6 = vcmp.lt.f32.partialorder %v4141_v33, 0.0  ;;  %vm1159_vm7 = vcmp.lt.f32.partialorder %v4150_v17, 0.0  ;;  %vm1128_vm8 = vcmp.gt.f32.partialorder %v4141_v33, 0.0  ;;  %v3225_v46 = vld [vmem:[#allocation2 + $0x68] sm:$0xff]  ;;  %v5759_v33 = vld [vmem:[#allocation25_spill] sm:$0xff] }
 0x195   :  { %v4418_v10 = vpop.permute.xlu1 %639  ;;  %v1191_v24 = vsub.f32 0.0, %v2425_v42  ;;  %v4422_v43 = vadd.f32 1e-06, %v1036_v59  ;;  %v4426_v58 = vadd.f32 1e-06, %v1035_v1  ;;  %v1224_v48 = vsel %vm1160_vm6, %v1192_v36, 0.0 }
 0x196   :  { %v4420_v32 = vpop.permute.xlu0 %637  ;;  %vm1127_vm9 = vcmp.gt.f32.partialorder %v4150_v17, 0.0  ;;  %v1256_v16 = vsel %vm1128_vm8, %v2451_v9, %v1224_v48  ;;  %v526_v59 = vsub.f32 %v3225_v46, %v4270_v28  ;;  %v4443_v17 = vsub.f32 %v4367_v26, %v5759_v33  ;;  %v3226_v36 = vld [vmem:[#allocation2 + $0x60] sm:$0xff] }
 0x197   :  { %479 = vrot.lane.b32.xlu1 %v3223_v63, %s3323_s4  ;;  %v1223_v30 = vsel %vm1159_vm7, %v1191_v24, 0.0  ;;  %v5686_v47 = vand.u32 2147483647, %v4422_v43  ;;  %477 = vrot.lane.b32.xlu0 %v3224_v51, %s3323_s4  ;;  %v5685_v57 = vand.u32 2147483647, %v4426_v58  ;;  %v525_v9 = vsub.f32 %v3226_v36, %v4272_v50  ;;  %v5760_v24 = vld [vmem:[#allocation26_spill] sm:$0xff] }
 0x198   :  { %v3122_v35 = vpop.eup %3121  ;;  %v1255_v37 = vsel %vm1127_vm9, %v2425_v42, %v1223_v30  ;;  %v398_v28 = vmul.f32 %v3839_v11, %v3811_v52  ;;  %v5761_v30 = vld [vmem:[#allocation27_spill] sm:$0xff]  ;;  %v5763_v50 = vld [vmem:[#allocation28_spill] sm:$0xff]  ;;  %v5765_v33 = vld [vmem:[#allocation29_spill] sm:$0xff]  ;;  %vm2486_vm10 = vcmp.lt.f32.partialorder %v4331_v22, 0  ;;  %vm2487_vm11 = vcmp.eq.f32.partialorder %v4331_v22, 0 }
 0x199   :  { %v3124_v38 = vpop.eup %3123  ;;  %v2484_v27 = vmul.f32 0.16666667, %v3122_v35  ;;  %v796_v4 = vpop.permute.xlu1 %795  ;;  %3125 = vlog2.f32 %v5686_v47  ;;  %v4456_v35 = vsub.f32 %v4378_v62, %v5760_v24  ;;  %v1284_v48 = vpack.c.bf16 %v1256_v16, %v1255_v37  ;;  %v5766_v36 = vld [vmem:[#allocation34_spill] sm:$0xff]  ;;  %v5768_v37 = vld [vmem:[#allocation31_spill] sm:$0xff] }
 0x19a   :  { %v794_v3 = vpop.permute.xlu0 %793  ;;  %v2458_v0 = vmul.f32 0.16666667, %v3124_v38  ;;  %v5762_v38 = vld [vmem:[#allocation32_spill] sm:$0xff]  ;;  %v558_v11 = vmul.f32 %v526_v59, %v398_v28  ;;  %v5767_v52 = vld [vmem:[#allocation30_spill] sm:$0xff]  ;;  %v4477_v24 = vsub.f32 %v3224_v51, %v5768_v37  ;;  %vm2488_vm13 = vcmp.eq.f32.partialorder %v4331_v22, 1065353216 }
 0x19b   :  { %3127 = vpow2.f32 %v2484_v27  ;;  %951 = vrot.lane.b32.xlu1 %v4247_v25, %s3316_s7  ;;  %949 = vrot.lane.b32.xlu0 %v4255_v44, %s3316_s7  ;;  %v397_v27 = vmul.f32 %v5762_v38, %v5761_v30  ;;  %v4474_v16 = vsub.f32 %v3223_v63, %v5767_v52  ;;  %v5769_v30 = vld [vmem:[#allocation35_spill] sm:$0xff]  ;;  %v5770_v59 = vld [vmem:[#allocation36_spill] sm:$0xff]  ;;  %v5772_v52 = vld [vmem:[#allocation38_spill] sm:$0xff]  ;;  %vm4506_vm14 = vcmp.eq.f32.partialorder %v2482_v7, 2139095040 }
 0x19c   :  { %3129 = vpow2.f32 %v2458_v0  ;;  %v5764_v0 = vld [vmem:[#allocation33_spill] sm:$0xff]  ;;  %2181 = vmatmul.mubr.msk.bf16.gmra.mrb[4].mxu0 %vm1313_vm12, %v1284_v48  ;;  %v4481_v38 = vsub.f32 %v4367_v26, %v5769_v30  ;;  %v4489_v28 = vsub.f32 %v4378_v62, %v5770_v59  ;;  %v4495_v47 = vsub.f32 %v3224_v51, %v5772_v52 }
 0x19d   :  { %3131 = vlog2.f32 %v5685_v57  ;;  %v4448_v42 = vpop.permute.xlu1 %799  ;;  %v4464_v46 = vmul.f32 %v5764_v0, %v5763_v50  ;;  %v4468_v57 = vmul.f32 %v5766_v36, %v5765_v33  ;;  %v557_v50 = vmul.f32 %v525_v9, %v397_v27  ;;  %v5771_v48 = vld [vmem:[#allocation37_spill] sm:$0xff] }
 0x19e   :  { %v4450_v1 = vpop.permute.xlu0 %797  ;;  %v4492_v36 = vsub.f32 %v3223_v63, %v5771_v48  ;;  %v718_v37 = vmul.f32 %v4391_v6, %v558_v11  ;;  %vm2499_vm15 = vcmp.ne.f32.partialorder %v4331_v22, %v4331_v22  ;;  %vm2460_vm0 = vcmp.lt.f32.partialorder %v4336_v23, 0  ;;  %v3228_v48 = vld [vmem:[#allocation2 + $0x70] sm:$0xff] }
 0x19f   :  { %667 = vrot.lane.b32.xlu1 %v4443_v17, %s3322_s13  ;;  %665 = vrot.lane.b32.xlu0 %v4456_v35, %s3322_s13  ;;  %v717_v26 = vmul.f32 %v4393_v55, %v557_v50  ;;  %vm2461_vm1 = vcmp.eq.f32.partialorder %v4336_v23, 0  ;;  %vm4518_vm2 = vcmp.eq.f32.partialorder %v2456_v18, 2139095040  ;;  %vm1130_vm3 = vcmp.gt.f32.partialorder %v4298_v5, 0.0  ;;  %v3227_v50 = vld [vmem:[#allocation2 + $0x78] sm:$0xff] }
 0x1a0   :  { %v878_v6 = vmul.f32 %v796_v4, %v718_v37  ;;  %v528_v59 = vsub.f32 %v3227_v50, %v4324_v34  ;;  %v527_v52 = vsub.f32 %v3228_v48, %v4326_v21  ;;  %vm2462_vm4 = vcmp.eq.f32.partialorder %v4336_v23, 1065353216 }
 0x1a1   :  { %v4483_v0 = vpop.permute.xlu1 %451  ;;  %v877_v9 = vmul.f32 %v794_v3, %v717_v26  ;;  %vm2473_vm5 = vcmp.ne.f32.partialorder %v4336_v23, %v4336_v23  ;;  %vm1162_vm6 = vcmp.lt.f32.partialorder %v4298_v5, 0.0  ;;  %vm1161_vm7 = vcmp.lt.f32.partialorder %v4300_v31, 0.0 }
 0x1a2   :  { %v4485_v33 = vpop.permute.xlu0 %449  ;;  %vm1129_vm8 = vcmp.gt.f32.partialorder %v4300_v31, 0.0  ;;  %vm2538_vm9 = vcmp.lt.f32.partialorder %v4422_v43, 0 }
 0x1a3   :  { %671 = vrot.lane.b32.xlu1 %v4474_v16, %s3322_s13  ;;  %v3126_v62 = vpop.eup %3125  ;;  %669 = vrot.lane.b32.xlu0 %v4477_v24, %s3322_s13 }
 0x1a4   :  { %v2536_v7 = vmul.f32 0.16666667, %v3126_v62 }
 0x1a5   :  { %v3128_v55 = vpop.eup %3127  ;;  %v924_v27 = vpop.permute.xlu1 %923 }
 0x1a6   :  { %v922_v11 = vpop.permute.xlu0 %921  ;;  %v3130_v30 = vpop.eup %3129  ;;  %v2492_v4 = vsel %vm2486_vm10, 2143289344, %v3128_v55  ;;  %v4527_v18 = vmul.f32 %v924_v27, %v878_v6  ;;  %3133 = vpow2.f32 %v2536_v7  ;;  %vm2539_vm10 = vcmp.eq.f32.partialorder %v4422_v43, 0 }
 0x1a7   :  { %v3132_v37 = vpop.eup %3131  ;;  %v2493_v3 = vsel %vm2487_vm11, 0, %v2492_v4  ;;  %v2466_v26 = vsel %vm2460_vm0, 2143289344, %v3130_v30  ;;  %v4533_v62 = vmul.f32 %v922_v11, %v877_v9  ;;  %827 = vrot.lane.b32.xlu1 %v4481_v38, %s3322_s13  ;;  %825 = vrot.lane.b32.xlu0 %v4489_v28, %s3322_s13  ;;  %vm2540_vm11 = vcmp.eq.f32.partialorder %v4422_v43, 1065353216 }
 0x1a8   :  { %v2498_v34 = vsel %vm4506_vm14, 2139095040, %v2493_v3  ;;  %v2467_v21 = vsel %vm2461_vm1, 0, %v2466_v26  ;;  %v2510_v6 = vmul.f32 0.16666667, %v3132_v37  ;;  %v1038_v55 = vand.u32 2147483647, %v4527_v18 }
 0x1a9   :  { %v2502_v7 = vsel %vm2499_vm15, 2143289344, %v2498_v34  ;;  %v2472_v9 = vsel %vm4518_vm2, 2139095040, %v2467_v21  ;;  %v4552_v63 = vpop.permute.xlu1 %455  ;;  %v560_v37 = vmul.f32 %v528_v59, %v4464_v46  ;;  %v1037_v51 = vand.u32 2147483647, %v4533_v62 }
 0x1aa   :  { %v4554_v27 = vpop.permute.xlu0 %453  ;;  %v2503_v11 = vsel %vm2488_vm13, 1065353216, %v2502_v7  ;;  %v2476_v30 = vsel %vm2473_vm5, 2143289344, %v2472_v9  ;;  %3135 = vpow2.f32 %v2510_v6  ;;  %v4558_v4 = vadd.f32 1e-06, %v1038_v55 }
 0x1ab   :  { %v1194_v50 = vsub.f32 0.0, %v2503_v11  ;;  %v2477_v48 = vsel %vm2462_vm4, 1065353216, %v2476_v30  ;;  %831 = vrot.lane.b32.xlu1 %v4492_v36, %s3322_s13  ;;  %v559_v3 = vmul.f32 %v527_v52, %v4468_v57  ;;  %829 = vrot.lane.b32.xlu0 %v4495_v47, %s3322_s13  ;;  %v720_v46 = vmul.f32 %v4418_v10, %v560_v37 }
 0x1ac   :  { %v1193_v23 = vsub.f32 0.0, %v2477_v48  ;;  %v2586_v22 = vand.u32 2147483647, %v4558_v4  ;;  %v4571_v59 = vadd.f32 1e-06, %v1037_v51  ;;  %vm2551_vm14 = vcmp.ne.f32.partialorder %v4422_v43, %v4422_v43 }
 0x1ad   :  { %v1226_v26 = vsel %vm1162_vm6, %v1194_v50, 0.0  ;;  %v928_v34 = vpop.permute.xlu1 %927  ;;  %v719_v55 = vmul.f32 %v4420_v32, %v559_v3  ;;  %v880_v7 = vmul.f32 %v4448_v42, %v720_v46  ;;  %v5777_v50 = vand.u32 2147483647, %v4422_v43 }
 0x1ae   :  { %v926_v21 = vpop.permute.xlu0 %925  ;;  %v1225_v6 = vsel %vm1161_vm7, %v1193_v23, 0.0  ;;  %3137 = vlog2.f32 %v2586_v22  ;;  %v1258_v57 = vsel %vm1130_vm3, %v2503_v11, %v1226_v26  ;;  %v5688_v10 = vand.u32 2147483647, %v4571_v59 }
 0x1af   :  { %v1257_v52 = vsel %vm1129_vm8, %v2477_v48, %v1225_v6  ;;  %955 = vrot.lane.b32.xlu1 %v4443_v17, %s3316_s7  ;;  %v879_v9 = vmul.f32 %v4450_v1, %v719_v55  ;;  %953 = vrot.lane.b32.xlu0 %v4456_v35, %s3316_s7  ;;  %v4589_v5 = vmul.f32 %v928_v34, %v880_v7  ;;  %vm2543_vm13 = vcmp.eq.f32.partialorder %v5777_v50, 2139095040 }
 0x1b0   :  { %v3134_v31 = vpop.eup %3133  ;;  %3139 = vlog2.f32 %v5688_v10  ;;  %v1285_v1 = vpack.c.bf16 %v1258_v57, %v1257_v52  ;;  %vm2512_vm15 = vcmp.lt.f32.partialorder %v4426_v58, 0  ;;  %vm2513_vm0 = vcmp.eq.f32.partialorder %v4426_v58, 0 }
 0x1b1   :  { %v4591_v32 = vpop.permute.xlu1 %643  ;;  %v2544_v11 = vsel %vm2538_vm9, 2143289344, %v3134_v31  ;;  %v4596_v30 = vmul.f32 %v926_v21, %v879_v9  ;;  %v1040_v37 = vand.u32 2147483647, %v4589_v5  ;;  %v5778_v57 = vand.u32 2147483647, %v4426_v58 }
 0x1b2   :  { %v4593_v42 = vpop.permute.xlu0 %641  ;;  %v2545_v48 = vsel %vm2539_vm10, 0, %v2544_v11  ;;  %2184 = vmatprep.mubr.msk.bf16.mxu0 %vm1313_vm12, %v1285_v1  ;;  %vm2525_vm2 = vcmp.ne.f32.partialorder %v4426_v58, %v4426_v58  ;;  %vm1164_vm3 = vcmp.lt.f32.partialorder %v4397_v2, 0.0  ;;  %vm2514_vm4 = vcmp.eq.f32.partialorder %v4426_v58, 1065353216  ;;  %v3229_v58 = vld [vmem:[#allocation2 + $0x88] sm:$0xff] }
 0x1b3   :  { %959 = vrot.lane.b32.xlu1 %v4474_v16, %s3316_s7  ;;  %v2550_v23 = vsel %vm2543_vm13, 2139095040, %v2545_v48  ;;  %v1039_v3 = vand.u32 2147483647, %v4596_v30  ;;  %957 = vrot.lane.b32.xlu0 %v4477_v24, %s3316_s7  ;;  %v4612_v34 = vadd.f32 1e-06, %v1040_v37  ;;  %vm2517_vm1 = vcmp.eq.f32.partialorder %v5778_v57, 2139095040 }
 0x1b4   :  { %v3136_v51 = vpop.eup %3135  ;;  %v2554_v26 = vsel %vm2551_vm14, 2143289344, %v2550_v23  ;;  %vm1132_vm5 = vcmp.gt.f32.partialorder %v4397_v2, 0.0  ;;  %vm1131_vm6 = vcmp.gt.f32.partialorder %v4399_v14, 0.0  ;;  %vm1163_vm7 = vcmp.lt.f32.partialorder %v4399_v14, 0.0 }
 0x1b5   :  { %v2518_v46 = vsel %vm2512_vm15, 2143289344, %v3136_v51  ;;  %v4614_v21 = vpop.permute.xlu1 %647  ;;  %v2555_v55 = vsel %vm2540_vm11, 1065353216, %v2554_v26  ;;  %v4622_v7 = vadd.f32 1e-06, %v1039_v3  ;;  %v5687_v11 = vand.u32 2147483647, %v4612_v34 }
 0x1b6   :  { %v4616_v6 = vpop.permute.xlu0 %645  ;;  %v2519_v52 = vsel %vm2513_vm0, 0, %v2518_v46  ;;  %v1196_v9 = vsub.f32 0.0, %v2555_v55  ;;  %v402_v14 = vmul.f32 %v3921_v54, %v3889_v12  ;;  %v404_v12 = vmul.f32 %v3941_v60, %v3903_v40 }
 0x1b7   :  { %v2524_v31 = vsel %vm2517_vm1, 2139095040, %v2519_v52  ;;  %3141 = vlog2.f32 %v5687_v11  ;;  %v2612_v26 = vand.u32 2147483647, %v4622_v7  ;;  %v530_v52 = vsub.f32 %v3229_v58, %v4483_v0 }
 0x1b8   :  { %v3138_v1 = vpop.eup %3137  ;;  %v2528_v43 = vsel %vm2525_vm2, 2143289344, %v2524_v31  ;;  %v1228_v50 = vsel %vm1164_vm3, %v1196_v9, 0.0  ;;  %v3230_v31 = vld [vmem:[#allocation2 + $0x80] sm:$0xff]  ;;  %v401_v0 = vmul.f32 %v3925_v13, %v3893_v39  ;;  %v403_v39 = vmul.f32 %v3945_v61, %v3907_v41 }
 0x1b9   :  { %v2529_v48 = vsel %vm2514_vm4, 1065353216, %v2528_v43  ;;  %v2588_v37 = vmul.f32 0.16666667, %v3138_v1  ;;  %v804_v51 = vpop.permute.xlu1 %803  ;;  %v1260_v57 = vsel %vm1132_vm5, %v2555_v55, %v1228_v50  ;;  %v529_v1 = vsub.f32 %v3230_v31, %v4485_v33 }
 0x1ba   :  { %v802_v23 = vpop.permute.xlu0 %801  ;;  %v1195_v3 = vsub.f32 0.0, %v2529_v48  ;;  %v3140_v46 = vpop.eup %3139  ;;  %v562_v50 = vmul.f32 %v530_v52, %v402_v14  ;;  %vm2590_vm8 = vcmp.lt.f32.partialorder %v4558_v4, 0  ;;  %vm2591_vm9 = vcmp.eq.f32.partialorder %v4558_v4, 0 }
 0x1bb   :  { %3143 = vpow2.f32 %v2588_v37  ;;  %v2562_v43 = vmul.f32 0.16666667, %v3140_v46  ;;  %v561_v37 = vmul.f32 %v529_v1, %v401_v0  ;;  %vm1166_vm10 = vcmp.lt.f32.partialorder %v4527_v18, 0.0  ;;  %v3231_v1 = vld [vmem:[#allocation2 + $0x98] sm:$0xff] }
 0x1bc   :  { %v1227_v9 = vsel %vm1163_vm7, %v1195_v3, 0.0  ;;  %3145 = vlog2.f32 %v2612_v26  ;;  %vm2592_vm11 = vcmp.eq.f32.partialorder %v4558_v4, 1065353216  ;;  %vm4664_vm13 = vcmp.eq.f32.partialorder %v2586_v22, 2139095040 }
 0x1bd   :  { %v1259_v2 = vsel %vm1131_vm6, %v2529_v48, %v1227_v9  ;;  %v4639_v11 = vpop.permute.xlu1 %807  ;;  %3147 = vpow2.f32 %v2562_v43  ;;  %v722_v48 = vmul.f32 %v4591_v32, %v562_v50  ;;  %v721_v46 = vmul.f32 %v4593_v42, %v561_v37 }
 0x1be   :  { %v4641_v10 = vpop.permute.xlu0 %805  ;;  %v1286_v55 = vpack.c.bf16 %v1260_v57, %v1259_v2  ;;  %vm2603_vm14 = vcmp.ne.f32.partialorder %v4558_v4, %v4558_v4  ;;  %vm2564_vm15 = vcmp.lt.f32.partialorder %v4571_v59, 0  ;;  %vm2565_vm0 = vcmp.eq.f32.partialorder %v4571_v59, 0  ;;  %v3232_v2 = vld [vmem:[#allocation2 + $0x90] sm:$0xff] }
 0x1bf   :  { %v882_v13 = vmul.f32 %v804_v51, %v722_v48  ;;  %v881_v57 = vmul.f32 %v802_v23, %v721_v46  ;;  %vm2566_vm1 = vcmp.eq.f32.partialorder %v4571_v59, 1065353216  ;;  %v532_v43 = vsub.f32 %v3231_v1, %v4552_v63 }
 0x1c0   :  { %2185 = vmatmul.mubr.msk.bf16.gmra.mrb[8].mxu0 %vm1313_vm12, %v1286_v55  ;;  %v531_v14 = vsub.f32 %v3232_v2, %v4554_v27  ;;  %v5781_v27 = vand.u32 2147483647, %v4571_v59  ;;  %vm2577_vm3 = vcmp.ne.f32.partialorder %v4571_v59, %v4571_v59  ;;  %vm1134_vm4 = vcmp.gt.f32.partialorder %v4527_v18, 0.0 }
 0x1c1   :  { %v4648_v33 = vpop.permute.xlu1 %459  ;;  %v3142_v58 = vpop.eup %3141  ;;  %vm1133_vm5 = vcmp.gt.f32.partialorder %v4533_v62, 0.0  ;;  %vm1165_vm6 = vcmp.lt.f32.partialorder %v4533_v62, 0.0  ;;  %vm2642_vm7 = vcmp.lt.f32.partialorder %v4612_v34, 0 }
 0x1c2   :  { %v4650_v3 = vpop.permute.xlu0 %457  ;;  %v2640_v54 = vmul.f32 0.16666667, %v3142_v58  ;;  %vm2569_vm2 = vcmp.eq.f32.partialorder %v5781_v27, 2139095040 }
 0x1c4   :  { %3149 = vpow2.f32 %v2640_v54 }
 0x1c5   :  { %v3144_v52 = vpop.eup %3143  ;;  %v932_v40 = vpop.permute.xlu1 %931 }
 0x1c6   :  { %v930_v41 = vpop.permute.xlu0 %929  ;;  %v3146_v60 = vpop.eup %3145  ;;  %v2596_v61 = vsel %vm2590_vm8, 2143289344, %v3144_v52  ;;  %v4671_v42 = vmul.f32 %v932_v40, %v882_v13  ;;  %v564_v40 = vmul.f32 %v532_v43, %v404_v12  ;;  %vm2643_vm8 = vcmp.eq.f32.partialorder %v4612_v34, 0 }
 0x1c7   :  { %v4673_v51 = vmul.f32 %v930_v41, %v881_v57  ;;  %v2597_v22 = vsel %vm2591_vm9, 0, %v2596_v61  ;;  %v2614_v23 = vmul.f32 0.16666667, %v3146_v60  ;;  %v3148_v9 = vpop.eup %3147  ;;  %v563_v41 = vmul.f32 %v531_v14, %v403_v39 }
 0x1c8   :  { %v2602_v31 = vsel %vm4664_vm13, 2139095040, %v2597_v22  ;;  %v1042_v0 = vand.u32 2147483647, %v4671_v42  ;;  %v2570_v50 = vsel %vm2564_vm15, 2143289344, %v3148_v9  ;;  %vm2644_vm9 = vcmp.eq.f32.partialorder %v4612_v34, 1065353216 }
 0x1c9   :  { %v2606_v55 = vsel %vm2603_vm14, 2143289344, %v2602_v31  ;;  %3151 = vpow2.f32 %v2614_v23  ;;  %v1041_v37 = vand.u32 2147483647, %v4673_v51  ;;  %v4690_v48 = vpop.permute.xlu1 %463  ;;  %v2571_v58 = vsel %vm2565_vm0, 0, %v2570_v50 }
 0x1ca   :  { %v4692_v46 = vpop.permute.xlu0 %461  ;;  %v2607_v63 = vsel %vm2592_vm11, 1065353216, %v2606_v55  ;;  %v4700_v54 = vadd.f32 1e-06, %v1042_v0  ;;  %v2576_v57 = vsel %vm2569_vm2, 2139095040, %v2571_v58  ;;  %v724_v31 = vmul.f32 %v4614_v21, %v564_v40 }
 0x1cb   :  { %v1198_v13 = vsub.f32 0.0, %v2607_v63  ;;  %v4704_v52 = vadd.f32 1e-06, %v1041_v37  ;;  %v2580_v32 = vsel %vm2577_vm3, 2143289344, %v2576_v57  ;;  %v723_v12 = vmul.f32 %v4616_v6, %v563_v41 }
 0x1cc   :  { %v2690_v4 = vand.u32 2147483647, %v4700_v54  ;;  %v2581_v61 = vsel %vm2566_vm1, 1065353216, %v2580_v32  ;;  %v884_v43 = vmul.f32 %v4639_v11, %v724_v31  ;;  %v5782_v55 = vand.u32 2147483647, %v4612_v34 }
 0x1cd   :  { %v1230_v60 = vsel %vm1166_vm10, %v1198_v13, 0.0  ;;  %v936_v22 = vpop.permute.xlu1 %935  ;;  %v1197_v9 = vsub.f32 0.0, %v2581_v61  ;;  %v2664_v18 = vand.u32 2147483647, %v4704_v52  ;;  %v883_v21 = vmul.f32 %v4641_v10, %v723_v12 }
 0x1ce   :  { %v934_v23 = vpop.permute.xlu0 %933  ;;  %3153 = vlog2.f32 %v2690_v4  ;;  %v3150_v59 = vpop.eup %3149  ;;  %v1262_v39 = vsel %vm1134_vm4, %v2607_v63, %v1230_v60  ;;  %vm2647_vm10 = vcmp.eq.f32.partialorder %v5782_v55, 2139095040  ;;  %v4734_v11 = vmul.f32 %v936_v22, %v884_v43 }
 0x1cf   :  { %v1229_v1 = vsel %vm1165_vm6, %v1197_v9, 0.0  ;;  %v2648_v2 = vsel %vm2642_vm7, 2143289344, %v3150_v59  ;;  %3155 = vlog2.f32 %v2664_v18  ;;  %v4736_v10 = vmul.f32 %v934_v23, %v883_v21 }
 0x1d0   :  { %v1261_v6 = vsel %vm1133_vm5, %v2581_v61, %v1229_v1  ;;  %v2649_v50 = vsel %vm2643_vm8, 0, %v2648_v2  ;;  %vm2655_vm11 = vcmp.ne.f32.partialorder %v4612_v34, %v4612_v34  ;;  %vm2616_vm13 = vcmp.lt.f32.partialorder %v4622_v7, 0 }
 0x1d1   :  { %v4728_v14 = vpop.permute.xlu1 %651  ;;  %v2654_v37 = vsel %vm2647_vm10, 2139095040, %v2649_v50  ;;  %v1287_v63 = vpack.c.bf16 %v1262_v39, %v1261_v6  ;;  %vm2617_vm14 = vcmp.eq.f32.partialorder %v4622_v7, 0  ;;  %v1044_v13 = vand.u32 2147483647, %v4734_v11 }
 0x1d2   :  { %v4730_v0 = vpop.permute.xlu0 %649  ;;  %v2658_v27 = vsel %vm2655_vm11, 2143289344, %v2654_v37  ;;  %vm2621_vm15 = vcmp.eq.f32.partialorder %v2612_v26, 2139095040  ;;  %v1043_v40 = vand.u32 2147483647, %v4736_v10  ;;  %vm2629_vm0 = vcmp.ne.f32.partialorder %v4622_v7, %v4622_v7 }
 0x1d3   :  { %v3152_v62 = vpop.eup %3151  ;;  %v2659_v57 = vsel %vm2644_vm9, 1065353216, %v2658_v27  ;;  %2188 = vmatprep.mubr.msk.bf16.mxu0 %vm1313_vm12, %v1287_v63  ;;  %v4755_v23 = vadd.f32 1e-06, %v1044_v13  ;;  %vm1168_vm1 = vcmp.lt.f32.partialorder %v4589_v5, 0.0  ;;  %vm2618_vm2 = vcmp.eq.f32.partialorder %v4622_v7, 1065353216  ;;  %v3234_v63 = vld [vmem:[#allocation2 + $0xa0] sm:$0xff] }
 0x1d4   :  { %v2622_v58 = vsel %vm2616_vm13, 2143289344, %v3152_v62  ;;  %v1200_v61 = vsub.f32 0.0, %v2659_v57  ;;  %v4759_v26 = vadd.f32 1e-06, %v1043_v40  ;;  %vm1136_vm3 = vcmp.gt.f32.partialorder %v4589_v5, 0.0  ;;  %v3233_v62 = vld [vmem:[#allocation2 + $0xa8] sm:$0xff] }
 0x1d5   :  { %v2623_v32 = vsel %vm2617_vm14, 0, %v2622_v58  ;;  %v4749_v41 = vpop.permute.xlu1 %655  ;;  %v2742_v59 = vand.u32 2147483647, %v4755_v23  ;;  %vm1135_vm4 = vcmp.gt.f32.partialorder %v4596_v30, 0.0  ;;  %vm1167_vm5 = vcmp.lt.f32.partialorder %v4596_v30, 0.0  ;;  %v5783_v13 = vld [vmem:[#allocation40_spill] sm:$0xff] }
 0x1d6   :  { %v4751_v60 = vpop.permute.xlu0 %653  ;;  %v2628_v22 = vsel %vm2621_vm15, 2139095040, %v2623_v32  ;;  %v1232_v31 = vsel %vm1168_vm1, %v1200_v61, 0.0  ;;  %v2716_v55 = vand.u32 2147483647, %v4759_v26  ;;  %v534_v37 = vsub.f32 %v3233_v62, %v4648_v33  ;;  %v5784_v32 = vld [vmem:[#allocation39_spill] sm:$0xff] }
 0x1d7   :  { %v2632_v34 = vsel %vm2629_vm0, 2143289344, %v2628_v22  ;;  %3157 = vlog2.f32 %v2742_v59  ;;  %v1264_v6 = vsel %vm1136_vm3, %v2659_v57, %v1232_v31  ;;  %v533_v5 = vsub.f32 %v3234_v63, %v4650_v3  ;;  %v5785_v40 = vld [vmem:[#allocation19_spill] sm:$0xff] }
 0x1d8   :  { %v3154_v9 = vpop.eup %3153  ;;  %v2633_v12 = vsel %vm2618_vm2, 1065353216, %v2632_v34  ;;  %v406_v57 = vmul.f32 %v5783_v13, %v4007_v29  ;;  %v405_v61 = vmul.f32 %v5785_v40, %v5784_v32  ;;  %vm2694_vm6 = vcmp.lt.f32.partialorder %v4700_v54, 0  ;;  %v3236_v32 = vld [vmem:[#allocation2 + $0xb0] sm:$0xff] }
 0x1d9   :  { %v1199_v39 = vsub.f32 0.0, %v2633_v12  ;;  %v2692_v1 = vmul.f32 0.16666667, %v3154_v9  ;;  %v812_v43 = vpop.permute.xlu1 %811  ;;  %v3156_v7 = vpop.eup %3155  ;;  %vm2695_vm7 = vcmp.eq.f32.partialorder %v4700_v54, 0  ;;  %vm2696_vm8 = vcmp.eq.f32.partialorder %v4700_v54, 1065353216 }
 0x1da   :  { %v810_v21 = vpop.permute.xlu0 %809  ;;  %v2666_v27 = vmul.f32 0.16666667, %v3156_v7  ;;  %v566_v33 = vmul.f32 %v534_v37, %v406_v57  ;;  %v565_v34 = vmul.f32 %v533_v5, %v405_v61  ;;  %vm1170_vm9 = vcmp.lt.f32.partialorder %v4671_v42, 0.0  ;;  %v3235_v5 = vld [vmem:[#allocation2 + $0xb8] sm:$0xff] }
 0x1db   :  { %v1231_v2 = vsel %vm1167_vm5, %v1199_v39, 0.0  ;;  %3159 = vpow2.f32 %v2692_v1  ;;  %v5786_v39 = vld [vmem:[#allocation41_spill] sm:$0xff]  ;;  %v5787_v1 = vld [vmem:[#allocation42_spill] sm:$0xff]  ;;  %vm4797_vm10 = vcmp.eq.f32.partialorder %v2690_v4, 2139095040  ;;  %vm2707_vm11 = vcmp.ne.f32.partialorder %v4700_v54, %v4700_v54 }
 0x1dc   :  { %v1263_v50 = vsel %vm1135_vm4, %v2633_v12, %v1231_v2  ;;  %3161 = vlog2.f32 %v2716_v55  ;;  %v726_v31 = vmul.f32 %v4728_v14, %v566_v33  ;;  %v725_v12 = vmul.f32 %v4730_v0, %v565_v34 }
 0x1dd   :  { %v4772_v30 = vpop.permute.xlu1 %815  ;;  %3163 = vpow2.f32 %v2666_v27  ;;  %v1288_v22 = vpack.c.bf16 %v1264_v6, %v1263_v50  ;;  %v408_v29 = vmul.f32 %v5786_v39, %v4025_v8  ;;  %v407_v7 = vmul.f32 %v5787_v1, %v4029_v56 }
 0x1de   :  { %v4774_v58 = vpop.permute.xlu0 %813  ;;  %v886_v2 = vmul.f32 %v812_v43, %v726_v31  ;;  %v885_v50 = vmul.f32 %v810_v21, %v725_v12  ;;  %vm2668_vm13 = vcmp.lt.f32.partialorder %v4704_v52, 0  ;;  %vm2669_vm14 = vcmp.eq.f32.partialorder %v4704_v52, 0 }
 0x1df   :  { %2189 = vmatmul.mubr.msk.bf16.gmra.mrb[12].mxu0 %vm1313_vm12, %v1288_v22  ;;  %vm2670_vm15 = vcmp.eq.f32.partialorder %v4704_v52, 1065353216  ;;  %v536_v27 = vsub.f32 %v3235_v5, %v4690_v48  ;;  %v535_v40 = vsub.f32 %v3236_v32, %v4692_v46  ;;  %vm2673_vm0 = vcmp.eq.f32.partialorder %v2664_v18, 2139095040 }
 0x1e0   :  { %vm2681_vm1 = vcmp.ne.f32.partialorder %v4704_v52, %v4704_v52  ;;  %vm1138_vm2 = vcmp.gt.f32.partialorder %v4671_v42, 0.0  ;;  %vm1137_vm3 = vcmp.gt.f32.partialorder %v4673_v51, 0.0  ;;  %vm1169_vm4 = vcmp.lt.f32.partialorder %v4673_v51, 0.0 }
 0x1e1   :  { %v4781_v3 = vpop.permute.xlu1 %467  ;;  %v3158_v6 = vpop.eup %3157  ;;  %v567_v0 = vmul.f32 %v535_v40, %v407_v7  ;;  %vm2746_vm5 = vcmp.lt.f32.partialorder %v4755_v23, 0 }
 0x1e2   :  { %v4783_v9 = vpop.permute.xlu0 %465  ;;  %v2744_v8 = vmul.f32 0.16666667, %v3158_v6 }
 0x1e3   :  { %v727_v5 = vmul.f32 %v4751_v60, %v567_v0 }
 0x1e4   :  { %3165 = vpow2.f32 %v2744_v8 }
 0x1e5   :  { %v3160_v14 = vpop.eup %3159  ;;  %v940_v56 = vpop.permute.xlu1 %939 }
 0x1e6   :  { %v938_v62 = vpop.permute.xlu0 %937  ;;  %v2700_v37 = vsel %vm2694_vm6, 2143289344, %v3160_v14  ;;  %v4805_v43 = vmul.f32 %v940_v56, %v886_v2  ;;  %v3162_v63 = vpop.eup %3161  ;;  %v568_v14 = vmul.f32 %v536_v27, %v408_v29  ;;  %vm2747_vm6 = vcmp.eq.f32.partialorder %v4755_v23, 0 }
 0x1e7   :  { %v4807_v21 = vmul.f32 %v938_v62, %v885_v50  ;;  %v2701_v4 = vsel %vm2695_vm7, 0, %v2700_v37  ;;  %v3164_v13 = vpop.eup %3163  ;;  %v2718_v61 = vmul.f32 0.16666667, %v3162_v63  ;;  %vm2748_vm7 = vcmp.eq.f32.partialorder %v4755_v23, 1065353216 }
 0x1e8   :  { %v2706_v57 = vsel %vm4797_vm10, 2139095040, %v2701_v4  ;;  %v1046_v22 = vand.u32 2147483647, %v4805_v43  ;;  %v2674_v48 = vsel %vm2668_vm13, 2143289344, %v3164_v13  ;;  %v728_v4 = vmul.f32 %v4749_v41, %v568_v14 }
 0x1e9   :  { %v2710_v33 = vsel %vm2707_vm11, 2143289344, %v2706_v57  ;;  %v1045_v34 = vand.u32 2147483647, %v4807_v21  ;;  %v4825_v31 = vpop.permute.xlu1 %471  ;;  %v2675_v39 = vsel %vm2669_vm14, 0, %v2674_v48  ;;  %3167 = vpow2.f32 %v2718_v61 }
 0x1ea   :  { %v4827_v12 = vpop.permute.xlu0 %469  ;;  %v2711_v46 = vsel %vm2696_vm8, 1065353216, %v2710_v33  ;;  %v4833_v1 = vadd.f32 1e-06, %v1046_v22  ;;  %v2680_v18 = vsel %vm2673_vm0, 2139095040, %v2675_v39  ;;  %v888_v27 = vmul.f32 %v4772_v30, %v728_v4 }
 0x1eb   :  { %v1202_v6 = vsub.f32 0.0, %v2711_v46  ;;  %v4837_v2 = vadd.f32 1e-06, %v1045_v34  ;;  %v2684_v50 = vsel %vm2681_vm1, 2143289344, %v2680_v18  ;;  %v887_v13 = vmul.f32 %v4774_v58, %v727_v5 }
 0x1ec   :  { %v2794_v8 = vand.u32 2147483647, %v4833_v1  ;;  %v2685_v56 = vsel %vm2670_vm15, 1065353216, %v2684_v50  ;;  %vm2751_vm8 = vcmp.eq.f32.partialorder %v2742_v59, 2139095040  ;;  %vm2720_vm10 = vcmp.lt.f32.partialorder %v4759_v26, 0 }
 0x1ed   :  { %v1234_v54 = vsel %vm1170_vm9, %v1202_v6, 0.0  ;;  %v944_v62 = vpop.permute.xlu1 %943  ;;  %v1201_v63 = vsub.f32 0.0, %v2685_v56  ;;  %v2768_v29 = vand.u32 2147483647, %v4837_v2  ;;  %vm2759_vm9 = vcmp.ne.f32.partialorder %v4755_v23, %v4755_v23 }
 0x1ee   :  { %v942_v37 = vpop.permute.xlu0 %941  ;;  %3169 = vlog2.f32 %v2794_v8  ;;  %v1266_v52 = vsel %vm1138_vm2, %v2711_v46, %v1234_v54  ;;  %v3166_v41 = vpop.eup %3165  ;;  %v4860_v60 = vmul.f32 %v944_v62, %v888_v27  ;;  %vm2721_vm11 = vcmp.eq.f32.partialorder %v4759_v26, 0 }
 0x1ef   :  { %v1233_v7 = vsel %vm1169_vm4, %v1201_v63, 0.0  ;;  %3171 = vlog2.f32 %v2768_v29  ;;  %v2752_v51 = vsel %vm2746_vm5, 2143289344, %v3166_v41  ;;  %v4862_v32 = vmul.f32 %v942_v37, %v887_v13  ;;  %v3237_v41 = vld [vmem:[#allocation2 + $0xc8] sm:$0xff] }
 0x1f0   :  { %v1265_v57 = vsel %vm1137_vm3, %v2685_v56, %v1233_v7  ;;  %v2753_v30 = vsel %vm2747_vm6, 0, %v2752_v51  ;;  %v1048_v33 = vand.u32 2147483647, %v4860_v60  ;;  %vm2725_vm13 = vcmp.eq.f32.partialorder %v2716_v55, 2139095040 }
 0x1f1   :  { %v4857_v42 = vpop.permute.xlu1 %659  ;;  %v1289_v58 = vpack.c.bf16 %v1266_v52, %v1265_v57  ;;  %v2758_v22 = vsel %vm2751_vm8, 2139095040, %v2753_v30  ;;  %v1047_v46 = vand.u32 2147483647, %v4862_v32  ;;  %vm2733_vm14 = vcmp.ne.f32.partialorder %v4759_v26, %v4759_v26  ;;  %v3238_v30 = vld [vmem:[#allocation2 + $0xc0] sm:$0xff] }
 0x1f2   :  { %v4864_v40 = vpop.permute.xlu0 %657  ;;  %v2762_v48 = vsel %vm2759_vm9, 2143289344, %v2758_v22  ;;  %v4880_v23 = vadd.f32 1e-06, %v1048_v33  ;;  %vm1172_vm15 = vcmp.lt.f32.partialorder %v4734_v11, 0.0  ;;  %vm2722_vm0 = vcmp.eq.f32.partialorder %v4759_v26, 1065353216 }
 0x1f3   :  { %v3168_v61 = vpop.eup %3167  ;;  %2192 = vmatprep.mubr.msk.bf16.mxu0 %vm1313_vm12, %v1289_v58  ;;  %v2763_v39 = vsel %vm2748_vm7, 1065353216, %v2762_v48  ;;  %v4886_v0 = vadd.f32 1e-06, %v1047_v46  ;;  %vm1140_vm1 = vcmp.gt.f32.partialorder %v4734_v11, 0.0  ;;  %vm1171_vm2 = vcmp.lt.f32.partialorder %v4736_v10, 0.0 }
 0x1f4   :  { %v2726_v34 = vsel %vm2720_vm10, 2143289344, %v3168_v61  ;;  %v1204_v50 = vsub.f32 0.0, %v2763_v39  ;;  %v2846_v55 = vand.u32 2147483647, %v4880_v23  ;;  %vm1139_vm3 = vcmp.gt.f32.partialorder %v4736_v10, 0.0 }
 0x1f5   :  { %v4876_v59 = vpop.permute.xlu1 %663  ;;  %v2727_v6 = vsel %vm2721_vm11, 0, %v2726_v34  ;;  %v2820_v26 = vand.u32 2147483647, %v4886_v0  ;;  %v538_v57 = vsub.f32 %v3237_v41, %v4781_v3  ;;  %v537_v58 = vsub.f32 %v3238_v30, %v4783_v9 }
 0x1f6   :  { %v4882_v18 = vpop.permute.xlu0 %661  ;;  %v2732_v14 = vsel %vm2725_vm13, 2139095040, %v2727_v6  ;;  %v1236_v62 = vsel %vm1172_vm15, %v1204_v50, 0.0  ;;  %3173 = vlog2.f32 %v2846_v55  ;;  %v410_v22 = vmul.f32 %v4259_v19, %v4183_v49 }
 0x1f7   :  { %v2736_v56 = vsel %vm2733_vm14, 2143289344, %v2732_v14  ;;  %v1268_v27 = vsel %vm1140_vm1, %v2763_v39, %v1236_v62  ;;  %v409_v3 = vmul.f32 %v4263_v45, %v4233_v15  ;;  %v412_v49 = vmul.f32 %v4267_v53, %v4247_v25 }
 0x1f8   :  { %v3170_v54 = vpop.eup %3169  ;;  %v2737_v37 = vsel %vm2722_vm0, 1065353216, %v2736_v56  ;;  %v570_v48 = vmul.f32 %v538_v57, %v410_v22  ;;  %v411_v19 = vmul.f32 %v4276_v20, %v4255_v44  ;;  %vm2798_vm4 = vcmp.lt.f32.partialorder %v4833_v1, 0  ;;  %v3239_v56 = vld [vmem:[#allocation2 + $0xd8] sm:$0xff] }
 0x1f9   :  { %v2796_v63 = vmul.f32 0.16666667, %v3170_v54  ;;  %v820_v4 = vpop.permute.xlu1 %819  ;;  %v1203_v5 = vsub.f32 0.0, %v2737_v37  ;;  %v3172_v7 = vpop.eup %3171  ;;  %v569_v34 = vmul.f32 %v537_v58, %v409_v3  ;;  %vm2799_vm5 = vcmp.eq.f32.partialorder %v4833_v1, 0 }
 0x1fa   :  { %v818_v52 = vpop.permute.xlu0 %817  ;;  %v2770_v51 = vmul.f32 0.16666667, %v3172_v7  ;;  %v730_v46 = vmul.f32 %v4857_v42, %v570_v48  ;;  %vm2800_vm6 = vcmp.eq.f32.partialorder %v4833_v1, 1065353216  ;;  %vm2811_vm7 = vcmp.ne.f32.partialorder %v4833_v1, %v4833_v1 }
 0x1fb   :  { %3175 = vpow2.f32 %v2796_v63  ;;  %v1235_v13 = vsel %vm1171_vm2, %v1203_v5, 0.0  ;;  %v729_v15 = vmul.f32 %v4864_v40, %v569_v34  ;;  %vm1174_vm8 = vcmp.lt.f32.partialorder %v4805_v43, 0.0  ;;  %v3240_v5 = vld [vmem:[#allocation2 + $0xd0] sm:$0xff] }
 0x1fc   :  { %v1267_v11 = vsel %vm1139_vm3, %v2737_v37, %v1235_v13  ;;  %3177 = vlog2.f32 %v2820_v26  ;;  %v890_v42 = vmul.f32 %v820_v4, %v730_v46  ;;  %vm4928_vm9 = vcmp.eq.f32.partialorder %v2794_v8, 2139095040 }
 0x1fd   :  { %v4901_v61 = vpop.permute.xlu1 %823  ;;  %3179 = vpow2.f32 %v2770_v51  ;;  %v1290_v33 = vpack.c.bf16 %v1268_v27, %v1267_v11  ;;  %vm2772_vm10 = vcmp.lt.f32.partialorder %v4837_v2, 0  ;;  %v889_v53 = vmul.f32 %v818_v52, %v729_v15 }
 0x1fe   :  { %v4905_v10 = vpop.permute.xlu0 %821  ;;  %vm2773_vm11 = vcmp.eq.f32.partialorder %v4837_v2, 0  ;;  %vm2774_vm13 = vcmp.eq.f32.partialorder %v4837_v2, 1065353216  ;;  %v540_v62 = vsub.f32 %v3239_v56, %v4825_v31  ;;  %v539_v52 = vsub.f32 %v3240_v5, %v4827_v12 }
 0x1ff   :  { %2193 = vmatmul.mubr.msk.bf16.gmra.mrb[16].mxu0 %vm1313_vm12, %v1290_v33  ;;  %vm2777_vm14 = vcmp.eq.f32.partialorder %v2768_v29, 2139095040  ;;  %vm2785_vm15 = vcmp.ne.f32.partialorder %v4837_v2, %v4837_v2  ;;  %v4971_v34 = vmul.f32 %v4481_v38, %v4443_v17  ;;  %vm1142_vm0 = vcmp.gt.f32.partialorder %v4805_v43, 0.0 }
 0x200   :  { %v3174_v45 = vpop.eup %3173  ;;  %v572_v3 = vmul.f32 %v540_v62, %v412_v49  ;;  %v571_v48 = vmul.f32 %v539_v52, %v411_v19  ;;  %vm1141_vm1 = vcmp.gt.f32.partialorder %v4807_v21, 0.0  ;;  %vm1173_vm2 = vcmp.lt.f32.partialorder %v4807_v21, 0.0 }
 0x201   :  { %v4910_v9 = vpop.permute.xlu1 %475  ;;  %v2848_v44 = vmul.f32 0.16666667, %v3174_v45  ;;  %vm2850_vm3 = vcmp.lt.f32.partialorder %v4880_v23, 0 }
 0x202   :  { %v4913_v39 = vpop.permute.xlu0 %473  ;;  %v731_v25 = vmul.f32 %v4882_v18, %v571_v48 }
 0x203   :  { %3181 = vpow2.f32 %v2848_v44 }
 0x205   :  { %v3176_v6 = vpop.eup %3175  ;;  %v948_v20 = vpop.permute.xlu1 %947 }
 0x206   :  { %v2804_v40 = vsel %vm2798_vm4, 2143289344, %v3176_v6  ;;  %v4935_v50 = vmul.f32 %v948_v20, %v890_v42  ;;  %v946_v14 = vpop.permute.xlu0 %945  ;;  %v3178_v54 = vpop.eup %3177  ;;  %v732_v6 = vmul.f32 %v4876_v59, %v572_v3  ;;  %v891_v59 = vmul.f32 %v4905_v10, %v731_v25 }
 0x207   :  { %v2805_v8 = vsel %vm2799_vm5, 0, %v2804_v40  ;;  %v4940_v37 = vmul.f32 %v946_v14, %v889_v53  ;;  %v3180_v63 = vpop.eup %3179  ;;  %v2822_v7 = vmul.f32 0.16666667, %v3178_v54  ;;  %vm1176_vm4 = vcmp.lt.f32.partialorder %v4860_v60, 0.0 }
 0x208   :  { %v2810_v4 = vsel %vm4928_vm9, 2139095040, %v2805_v8  ;;  %v1050_v27 = vand.u32 2147483647, %v4935_v50  ;;  %v2778_v31 = vsel %vm2772_vm10, 2143289344, %v3180_v63  ;;  %v892_v19 = vmul.f32 %v4901_v61, %v732_v6 }
 0x209   :  { %v2814_v13 = vsel %vm2811_vm7, 2143289344, %v2810_v4  ;;  %v1049_v41 = vand.u32 2147483647, %v4940_v37  ;;  %v4954_v57 = vpop.permute.xlu1 %479  ;;  %v2779_v51 = vsel %vm2773_vm11, 0, %v2778_v31  ;;  %3183 = vpow2.f32 %v2822_v7 }
 0x20a   :  { %v2815_v12 = vsel %vm2800_vm6, 1065353216, %v2814_v13  ;;  %v4960_v11 = vadd.f32 1e-06, %v1050_v27  ;;  %v4962_v30 = vpop.permute.xlu0 %477  ;;  %v2784_v29 = vsel %vm2777_vm14, 2139095040, %v2779_v51  ;;  %vm2851_vm5 = vcmp.eq.f32.partialorder %v4880_v23, 0 }
 0x20b   :  { %v1206_v58 = vsub.f32 0.0, %v2815_v12  ;;  %v4966_v22 = vadd.f32 1e-06, %v1049_v41  ;;  %v2788_v33 = vsel %vm2785_vm15, 2143289344, %v2784_v29  ;;  %vm2852_vm6 = vcmp.eq.f32.partialorder %v4880_v23, 1065353216 }
 0x20c   :  { %v2898_v1 = vand.u32 2147483647, %v4960_v11  ;;  %v2789_v15 = vsel %vm2774_vm13, 1065353216, %v2788_v33  ;;  %vm2855_vm7 = vcmp.eq.f32.partialorder %v2846_v55, 2139095040  ;;  %vm2824_vm9 = vcmp.lt.f32.partialorder %v4886_v0, 0  ;;  %v3242_v33 = vld [vmem:[#allocation2 + $0xe0] sm:$0xff] }
 0x20d   :  { %v1238_v46 = vsel %vm1174_vm8, %v1206_v58, 0.0  ;;  %v952_v45 = vpop.permute.xlu1 %951  ;;  %v1205_v42 = vsub.f32 0.0, %v2789_v15  ;;  %v2872_v17 = vand.u32 2147483647, %v4966_v22  ;;  %v3182_v44 = vpop.eup %3181  ;;  %vm2863_vm8 = vcmp.ne.f32.partialorder %v4880_v23, %v4880_v23 }
 0x20e   :  { %3185 = vlog2.f32 %v2898_v1  ;;  %v950_v49 = vpop.permute.xlu0 %949  ;;  %v1270_v38 = vsel %vm1142_vm0, %v2815_v12, %v1238_v46  ;;  %v2856_v21 = vsel %vm2850_vm3, 2143289344, %v3182_v44  ;;  %v4992_v53 = vmul.f32 %v952_v45, %v892_v19  ;;  %v3241_v12 = vld [vmem:[#allocation2 + $0xe8] sm:$0xff]  ;;  %v3243_v44 = vld [vmem:[#allocation2 + $0xf8] sm:$0xff] }
 0x20f   :  { %v1237_v2 = vsel %vm1173_vm2, %v1205_v42, 0.0  ;;  %3187 = vlog2.f32 %v2872_v17  ;;  %v4994_v20 = vmul.f32 %v950_v49, %v891_v59  ;;  %v2857_v10 = vsel %vm2851_vm5, 0, %v2856_v21 }
 0x210   :  { %v1269_v18 = vsel %vm1141_vm1, %v2789_v15, %v1237_v2  ;;  %v2862_v54 = vsel %vm2855_vm7, 2139095040, %v2857_v10  ;;  %v1052_v8 = vand.u32 2147483647, %v4992_v53  ;;  %vm2825_vm10 = vcmp.eq.f32.partialorder %v4886_v0, 0 }
 0x211   :  { %v668_v43 = vpop.permute.xlu1 %667  ;;  %v1291_v40 = vpack.c.bf16 %v1270_v38, %v1269_v18  ;;  %v2866_v56 = vsel %vm2863_vm8, 2143289344, %v2862_v54  ;;  %v1051_v63 = vand.u32 2147483647, %v4994_v20  ;;  %vm2829_vm11 = vcmp.eq.f32.partialorder %v2820_v26, 2139095040 }
 0x212   :  { %v666_v61 = vpop.permute.xlu0 %665  ;;  %v2867_v4 = vsel %vm2852_vm6, 1065353216, %v2866_v56  ;;  %v5010_v23 = vadd.f32 1e-06, %v1052_v8  ;;  %vm2837_vm13 = vcmp.ne.f32.partialorder %v4886_v0, %v4886_v0  ;;  %vm2826_vm14 = vcmp.eq.f32.partialorder %v4886_v0, 1065353216 }
 0x213   :  { %v3184_v14 = vpop.eup %3183  ;;  %2196 = vmatprep.mubr.msk.bf16.mxu0 %vm1313_vm12, %v1291_v40  ;;  %v1208_v7 = vsub.f32 0.0, %v2867_v4  ;;  %v5016_v13 = vadd.f32 1e-06, %v1051_v63  ;;  %v542_v51 = vsub.f32 %v3241_v12, %v4910_v9  ;;  %v541_v3 = vsub.f32 %v3242_v33, %v4913_v39 }
 0x214   :  { %v2830_v62 = vsel %vm2824_vm9, 2143289344, %v3184_v14  ;;  %v2950_v26 = vand.u32 2147483647, %v5010_v23  ;;  %v413_v15 = vmul.f32 %v4489_v28, %v4456_v35  ;;  %vm1144_vm15 = vcmp.gt.f32.partialorder %v4860_v60, 0.0 }
 0x215   :  { %v5006_v55 = vpop.permute.xlu1 %671  ;;  %v2831_v5 = vsel %vm2825_vm10, 0, %v2830_v62  ;;  %v1240_v58 = vsel %vm1176_vm4, %v1208_v7, 0.0  ;;  %vm1175_vm0 = vcmp.lt.f32.partialorder %v4862_v32, 0.0  ;;  %v2924_v6 = vand.u32 2147483647, %v5016_v13 }
 0x216   :  { %v5012_v52 = vpop.permute.xlu0 %669  ;;  %v2836_v27 = vsel %vm2829_vm11, 2139095040, %v2831_v5  ;;  %3189 = vlog2.f32 %v2950_v26  ;;  %v1272_v42 = vsel %vm1144_vm15, %v2867_v4, %v1240_v58  ;;  %vm1143_vm1 = vcmp.gt.f32.partialorder %v4862_v32, 0.0  ;;  %v3244_v32 = vld [vmem:[#allocation2 + $0xf0] sm:$0xff] }
 0x217   :  { %v2840_v41 = vsel %vm2837_vm13, 2143289344, %v2836_v27  ;;  %v574_v35 = vmul.f32 %v542_v51, %v4971_v34  ;;  %v573_v60 = vmul.f32 %v541_v3, %v413_v15  ;;  %v544_v18 = vsub.f32 %v3243_v44, %v4954_v57 }
 0x218   :  { %v3186_v31 = vpop.eup %3185  ;;  %v2841_v29 = vsel %vm2826_vm14, 1065353216, %v2840_v41  ;;  %v543_v34 = vsub.f32 %v3244_v32, %v4962_v30  ;;  %v416_v14 = vmul.f32 %v4492_v36, %v4474_v16  ;;  %vm2902_vm2 = vcmp.lt.f32.partialorder %v4960_v11, 0 }
 0x219   :  { %v2900_v48 = vmul.f32 0.16666667, %v3186_v31  ;;  %v828_v46 = vpop.permute.xlu1 %827  ;;  %v1207_v0 = vsub.f32 0.0, %v2841_v29  ;;  %v3188_v45 = vpop.eup %3187  ;;  %v734_v38 = vmul.f32 %v668_v43, %v574_v35  ;;  %v733_v59 = vmul.f32 %v666_v61, %v573_v60 }
 0x21a   :  { %v826_v9 = vpop.permute.xlu0 %825  ;;  %v2874_v25 = vmul.f32 0.16666667, %v3188_v45  ;;  %v415_v43 = vmul.f32 %v4495_v47, %v4477_v24  ;;  %vm2903_vm3 = vcmp.eq.f32.partialorder %v4960_v11, 0  ;;  %vm2904_vm4 = vcmp.eq.f32.partialorder %v4960_v11, 1065353216 }
 0x21b   :  { %3191 = vpow2.f32 %v2900_v48  ;;  %v1239_v39 = vsel %vm1175_vm0, %v1207_v0, 0.0  ;;  %v894_v21 = vmul.f32 %v828_v46, %v734_v38  ;;  %v893_v10 = vmul.f32 %v826_v9, %v733_v59 }
 0x21c   :  { %v1271_v28 = vsel %vm1143_vm1, %v2841_v29, %v1239_v39  ;;  %3193 = vlog2.f32 %v2924_v6  ;;  %vm2915_vm5 = vcmp.ne.f32.partialorder %v4960_v11, %v4960_v11  ;;  %vm5053_vm6 = vcmp.eq.f32.partialorder %v2898_v1, 2139095040 }
 0x21d   :  { %v832_v49 = vpop.permute.xlu1 %831  ;;  %3195 = vpow2.f32 %v2874_v25  ;;  %v1292_v2 = vpack.c.bf16 %v1272_v42, %v1271_v28  ;;  %vm2876_vm7 = vcmp.lt.f32.partialorder %v4966_v22, 0  ;;  %v576_v47 = vmul.f32 %v544_v18, %v416_v14 }
 0x21e   :  { %v830_v19 = vpop.permute.xlu0 %829  ;;  %vm2877_vm8 = vcmp.eq.f32.partialorder %v4966_v22, 0  ;;  %v575_v56 = vmul.f32 %v543_v34, %v415_v43  ;;  %vm2889_vm9 = vcmp.ne.f32.partialorder %v4966_v22, %v4966_v22  ;;  %vm2881_vm10 = vcmp.eq.f32.partialorder %v2872_v17, 2139095040 }
 0x21f   :  { %2197 = vmatmul.mubr.msk.bf16.gmra.mrb[20].mxu0 %vm1313_vm12, %v1292_v2  ;;  %v736_v1 = vmul.f32 %v5006_v55, %v576_v47  ;;  %vm1178_vm11 = vcmp.lt.f32.partialorder %v4935_v50, 0.0  ;;  %vm2878_vm13 = vcmp.eq.f32.partialorder %v4966_v22, 1065353216  ;;  %vm1146_vm14 = vcmp.gt.f32.partialorder %v4935_v50, 0.0 }
 0x220   :  { %v3190_v30 = vpop.eup %3189  ;;  %v735_v27 = vmul.f32 %v5012_v52, %v575_v56  ;;  %vm1177_vm15 = vcmp.lt.f32.partialorder %v4940_v37, 0.0  ;;  %vm1145_vm0 = vcmp.gt.f32.partialorder %v4940_v37, 0.0  ;;  %vm2954_vm1 = vcmp.lt.f32.partialorder %v5010_v23, 0 }
 0x221   :  { %v956_v40 = vpop.permute.xlu1 %955  ;;  %v2952_v8 = vmul.f32 0.16666667, %v3190_v30  ;;  %v896_v29 = vmul.f32 %v832_v49, %v736_v1 }
 0x222   :  { %v5043_v61 = vmul.f32 %v956_v40, %v894_v21  ;;  %v954_v54 = vpop.permute.xlu0 %953  ;;  %v895_v48 = vmul.f32 %v830_v19, %v735_v27 }
 0x223   :  { %v5049_v57 = vmul.f32 %v954_v54, %v893_v10  ;;  %3197 = vpow2.f32 %v2952_v8 }
 0x224   :  { %v1054_v24 = vand.u32 2147483647, %v5043_v61 }
 0x225   :  { %v3192_v36 = vpop.eup %3191  ;;  %v1053_v62 = vand.u32 2147483647, %v5049_v57  ;;  %v960_v41 = vpop.permute.xlu1 %959 }
 0x226   :  { %v2908_v63 = vsel %vm2902_vm2, 2143289344, %v3192_v36  ;;  %v5066_v4 = vadd.f32 1e-06, %v1054_v24  ;;  %v3194_v5 = vpop.eup %3193  ;;  %v958_v33 = vpop.permute.xlu0 %957  ;;  %v5087_v0 = vmul.f32 %v960_v41, %v896_v29  ;;  %vm2955_vm2 = vcmp.eq.f32.partialorder %v5010_v23, 0 }
 0x227   :  { %v2909_v7 = vsel %vm2903_vm3, 0, %v2908_v63  ;;  %v5071_v31 = vadd.f32 1e-06, %v1053_v62  ;;  %v3196_v12 = vpop.eup %3195  ;;  %v2926_v58 = vmul.f32 0.16666667, %v3194_v5  ;;  %v5091_v42 = vmul.f32 %v958_v33, %v895_v48 }
 0x228   :  { %v2914_v51 = vsel %vm5053_vm6, 2139095040, %v2909_v7  ;;  %v3002_v55 = vand.u32 2147483647, %v5066_v4  ;;  %v2882_v52 = vsel %vm2876_vm7, 2143289344, %v3196_v12  ;;  %v1056_v60 = vand.u32 2147483647, %v5087_v0 }
 0x229   :  { %v2918_v3 = vsel %vm2915_vm5, 2143289344, %v2914_v51  ;;  %v2883_v15 = vsel %vm2877_vm8, 0, %v2882_v52  ;;  %3199 = vpow2.f32 %v2926_v58  ;;  %v2976_v17 = vand.u32 2147483647, %v5071_v31 }
 0x22a   :  { %v2919_v46 = vsel %vm2904_vm4, 1065353216, %v2918_v3  ;;  %v2888_v45 = vsel %vm2881_vm10, 2139095040, %v2883_v15  ;;  %3201 = vlog2.f32 %v3002_v55  ;;  %v1055_v49 = vand.u32 2147483647, %v5091_v42 }
 0x22b   :  { %v1210_v9 = vsub.f32 0.0, %v2919_v46  ;;  %v2892_v11 = vsel %vm2889_vm9, 2143289344, %v2888_v45  ;;  %3203 = vlog2.f32 %v2976_v17  ;;  %v5107_v19 = vadd.f32 1e-06, %v1056_v60 }
 0x22c   :  { %v2893_v25 = vsel %vm2878_vm13, 1065353216, %v2892_v11  ;;  %v5109_v50 = vadd.f32 1e-06, %v1055_v49  ;;  %vm2956_vm3 = vcmp.eq.f32.partialorder %v5010_v23, 1065353216  ;;  %vm2959_vm4 = vcmp.eq.f32.partialorder %v2950_v26, 2139095040 }
 0x22d   :  { %v1242_v39 = vsel %vm1178_vm11, %v1210_v9, 0.0  ;;  %v1209_v35 = vsub.f32 0.0, %v2893_v25  ;;  %v3198_v38 = vpop.eup %3197  ;;  %vm2967_vm5 = vcmp.ne.f32.partialorder %v5010_v23, %v5010_v23  ;;  %v3054_v37 = vand.u32 2147483647, %v5107_v19 }
 0x22e   :  { %v1274_v28 = vsel %vm1146_vm14, %v2919_v46, %v1242_v39  ;;  %v2960_v59 = vsel %vm2954_vm1, 2143289344, %v3198_v38  ;;  %vm2928_vm6 = vcmp.lt.f32.partialorder %v5016_v13, 0  ;;  %vm2929_vm7 = vcmp.eq.f32.partialorder %v5016_v13, 0 }
 0x22f   :  { %v1241_v22 = vsel %vm1177_vm15, %v1209_v35, 0.0  ;;  %v2961_v18 = vsel %vm2955_vm2, 0, %v2960_v59  ;;  %v3028_v34 = vand.u32 2147483647, %v5109_v50  ;;  %vm2933_vm8 = vcmp.eq.f32.partialorder %v2924_v6, 2139095040 }
 0x230   :  { %v1273_v2 = vsel %vm1145_vm0, %v2893_v25, %v1241_v22  ;;  %v2966_v32 = vsel %vm2959_vm4, 2139095040, %v2961_v18  ;;  %3205 = vlog2.f32 %v3054_v37  ;;  %vm2941_vm9 = vcmp.ne.f32.partialorder %v5016_v13, %v5016_v13 }
 0x231   :  { %v1293_v44 = vpack.c.bf16 %v1274_v28, %v1273_v2  ;;  %v2970_v40 = vsel %vm2967_vm5, 2143289344, %v2966_v32  ;;  %3207 = vlog2.f32 %v3028_v34  ;;  %vm1180_vm10 = vcmp.lt.f32.partialorder %v4992_v53, 0.0 }
 0x232   :  { %v2971_v14 = vsel %vm2956_vm3, 1065353216, %v2970_v40  ;;  %vm2930_vm11 = vcmp.eq.f32.partialorder %v5016_v13, 1065353216  ;;  %vm1148_vm13 = vcmp.gt.f32.partialorder %v4992_v53, 0.0  ;;  %vm1179_vm14 = vcmp.lt.f32.partialorder %v4994_v20, 0.0 }
 0x233   :  { %v3200_v21 = vpop.eup %3199  ;;  %2200 = vmatprep.mubr.msk.bf16.mxu0 %vm1313_vm12, %v1293_v44  ;;  %v1212_v30 = vsub.f32 0.0, %v2971_v14  ;;  %vm1147_vm15 = vcmp.gt.f32.partialorder %v4994_v20, 0.0  ;;  %vm3006_vm0 = vcmp.lt.f32.partialorder %v5066_v4, 0  ;;  %vm3007_vm1 = vcmp.eq.f32.partialorder %v5066_v4, 0 }
 0x234   :  { %v3202_v10 = vpop.eup %3201  ;;  %v2934_v26 = vsel %vm2928_vm6, 2143289344, %v3200_v21  ;;  %vm3011_vm2 = vcmp.eq.f32.partialorder %v3002_v55, 2139095040  ;;  %vm3019_vm3 = vcmp.ne.f32.partialorder %v5066_v4, %v5066_v4  ;;  %vm2980_vm4 = vcmp.lt.f32.partialorder %v5071_v31, 0 }
 0x235   :  { %v2935_v43 = vsel %vm2929_vm7, 0, %v2934_v26  ;;  %v3004_v54 = vmul.f32 0.16666667, %v3202_v10  ;;  %v3204_v47 = vpop.eup %3203  ;;  %v1244_v24 = vsel %vm1180_vm10, %v1212_v30, 0.0  ;;  %vm3008_vm5 = vcmp.eq.f32.partialorder %v5066_v4, 1065353216 }
 0x236   :  { %v2940_v16 = vsel %vm2933_vm8, 2139095040, %v2935_v43  ;;  %v2978_v36 = vmul.f32 0.16666667, %v3204_v47  ;;  %v1276_v56 = vsel %vm1148_vm13, %v2971_v14, %v1244_v24  ;;  %vm2981_vm6 = vcmp.eq.f32.partialorder %v5071_v31, 0 }
 0x237   :  { %v2944_v6 = vsel %vm2941_vm9, 2143289344, %v2940_v16  ;;  %3209 = vpow2.f32 %v3004_v54  ;;  %vm2985_vm7 = vcmp.eq.f32.partialorder %v2976_v17, 2139095040  ;;  %vm2993_vm8 = vcmp.ne.f32.partialorder %v5071_v31, %v5071_v31 }
 0x238   :  { %v2945_v23 = vsel %vm2930_vm11, 1065353216, %v2944_v6  ;;  %3211 = vpow2.f32 %v2978_v36  ;;  %vm1182_vm9 = vcmp.lt.f32.partialorder %v5043_v61, 0.0  ;;  %vm2982_vm10 = vcmp.eq.f32.partialorder %v5071_v31, 1065353216 }
 0x239   :  { %v1211_v8 = vsub.f32 0.0, %v2945_v23  ;;  %vm1150_vm11 = vcmp.gt.f32.partialorder %v5043_v61, 0.0  ;;  %vm1149_vm13 = vcmp.gt.f32.partialorder %v5049_v57, 0.0 }
 0x23a   :  { %v3206_v5 = vpop.eup %3205 }
 0x23b   :  { %v1243_v62 = vsel %vm1179_vm14, %v1211_v8, 0.0  ;;  %v3208_v7 = vpop.eup %3207  ;;  %v3056_v13 = vmul.f32 0.16666667, %v3206_v5  ;;  %vm1181_vm14 = vcmp.lt.f32.partialorder %v5049_v57, 0.0 }
 0x23c   :  { %v1275_v63 = vsel %vm1147_vm15, %v2945_v23, %v1243_v62  ;;  %v3030_v27 = vmul.f32 0.16666667, %v3208_v7  ;;  %vm3058_vm15 = vcmp.lt.f32.partialorder %v5107_v19, 0 }
 0x23d   :  { %v1294_v1 = vpack.c.bf16 %v1276_v56, %v1275_v63  ;;  %3213 = vpow2.f32 %v3056_v13 }
 0x23e   :  { %3215 = vpow2.f32 %v3030_v27 }
 0x23f   :  { %2201 = vmatmul.mubr.msk.bf16.gmra.mrb[24].mxu0 %vm1313_vm12, %v1294_v1 }
 0x241   :  { %v3210_v41 = vpop.eup %3209 }
 0x242   :  { %v3012_v53 = vsel %vm3006_vm0, 2143289344, %v3210_v41  ;;  %v3212_v12 = vpop.eup %3211  ;;  %vm3059_vm0 = vcmp.eq.f32.partialorder %v5107_v19, 0 }
 0x243   :  { %v3013_v20 = vsel %vm3007_vm1, 0, %v3012_v53  ;;  %v2986_v29 = vsel %vm2980_vm4, 2143289344, %v3212_v12  ;;  %vm3071_vm1 = vcmp.ne.f32.partialorder %v5107_v19, %v5107_v19  ;;  %vm3033_vm4 = vcmp.eq.f32.partialorder %v5109_v50, 0 }
 0x244   :  { %v3018_v51 = vsel %vm3011_vm2, 2139095040, %v3013_v20  ;;  %v2987_v3 = vsel %vm2981_vm6, 0, %v2986_v29  ;;  %vm3063_vm2 = vcmp.eq.f32.partialorder %v3054_v37, 2139095040  ;;  %vm3060_vm6 = vcmp.eq.f32.partialorder %v5107_v19, 1065353216 }
 0x245   :  { %v3022_v58 = vsel %vm3019_vm3, 2143289344, %v3018_v51  ;;  %v2992_v52 = vsel %vm2985_vm7, 2139095040, %v2987_v3  ;;  %vm3032_vm3 = vcmp.lt.f32.partialorder %v5109_v50, 0  ;;  %vm3045_vm7 = vcmp.ne.f32.partialorder %v5109_v50, %v5109_v50 }
 0x246   :  { %v3023_v33 = vsel %vm3008_vm5, 1065353216, %v3022_v58  ;;  %v2996_v48 = vsel %vm2993_vm8, 2143289344, %v2992_v52  ;;  %vm3037_vm5 = vcmp.eq.f32.partialorder %v3028_v34, 2139095040  ;;  %vm3034_vm8 = vcmp.eq.f32.partialorder %v5109_v50, 1065353216 }
 0x247   :  { %v1214_v55 = vsub.f32 0.0, %v3023_v33  ;;  %v2997_v46 = vsel %vm2982_vm10, 1065353216, %v2996_v48  ;;  %v3214_v9 = vpop.eup %3213  ;;  %vm1152_vm10 = vcmp.gt.f32.partialorder %v5087_v0, 0.0 }
 0x248   :  { %v1213_v15 = vsub.f32 0.0, %v2997_v46  ;;  %v3216_v31 = vpop.eup %3215  ;;  %v3064_v61 = vsel %vm3058_vm15, 2143289344, %v3214_v9 }
 0x249   :  { %v1246_v4 = vsel %vm1182_vm9, %v1214_v55, 0.0  ;;  %v3065_v57 = vsel %vm3059_vm0, 0, %v3064_v61  ;;  %v3038_v39 = vsel %vm3032_vm3, 2143289344, %v3216_v31  ;;  %vm1184_vm9 = vcmp.lt.f32.partialorder %v5087_v0, 0.0 }
 0x24a   :  { %v1278_v45 = vsel %vm1150_vm11, %v3023_v33, %v1246_v4  ;;  %v1245_v11 = vsel %vm1181_vm14, %v1213_v15, 0.0  ;;  %v3070_v25 = vsel %vm3063_vm2, 2139095040, %v3065_v57  ;;  %v3039_v35 = vsel %vm3033_vm4, 0, %v3038_v39 }
 0x24b   :  { %v1277_v17 = vsel %vm1149_vm13, %v2997_v46, %v1245_v11  ;;  %v3074_v60 = vsel %vm3071_vm1, 2143289344, %v3070_v25  ;;  %v3044_v49 = vsel %vm3037_vm5, 2139095040, %v3039_v35  ;;  %vm1183_vm11 = vcmp.lt.f32.partialorder %v5091_v42, 0.0 }
 0x24c   :  { %v1295_v28 = vpack.c.bf16 %v1278_v45, %v1277_v17  ;;  %v3075_v22 = vsel %vm3060_vm6, 1065353216, %v3074_v60  ;;  %v3048_v38 = vsel %vm3045_vm7, 2143289344, %v3044_v49  ;;  %vm1151_vm13 = vcmp.gt.f32.partialorder %v5091_v42, 0.0 }
 0x24d   :  { %v1216_v2 = vsub.f32 0.0, %v3075_v22  ;;  %v3049_v59 = vsel %vm3034_vm8, 1065353216, %v3048_v38 }
 0x24e   :  { %2204 = vmatprep.mubr.msk.bf16.mxu0 %vm1313_vm12, %v1295_v28  ;;  %v1215_v44 = vsub.f32 0.0, %v3049_v59 }
 0x24f   :  { %v1248_v18 = vsel %vm1184_vm9, %v1216_v2, 0.0 }
 0x250   :  { %v1280_v19 = vsel %vm1152_vm10, %v3075_v22, %v1248_v18  ;;  %v1247_v37 = vsel %vm1183_vm11, %v1215_v44, 0.0 }
 0x251   :  { %v1279_v50 = vsel %vm1151_vm13, %v3049_v59, %v1247_v37 }
 0x252   :  { %v1296_v40 = vpack.c.bf16 %v1280_v19, %v1279_v50 }
 0x253   :  { %v5175_v21 = vpop.f32.mrb[0].mxu0 }
 0x254   :  { %v5177_v32 = vpop.f32.mrb[1].mxu0  ;;  %v1595_v0 = vmul.f32 %v5175_v21, %v5175_v21  ;;  %2205 = vmatmul.mubr.msk.bf16.gmra.mrb[28].mxu0 %vm1313_vm12, %v1296_v40  ;;  %v1526_v30 = vsel %vm1313_vm12, %v5175_v21, 0.0 }
 0x255   :  { %v1593_v34 = vmul.f32 %v5177_v32, %v5177_v32  ;;  %v5181_v10 = vpop.f32.mrb[2].mxu0  ;;  %v1523_v42 = vsel %vm1313_vm12, %v5177_v32, 0.0 }
 0x256   :  { %v5183_v26 = vpop.f32.mrb[3].mxu0  ;;  %v1596_v47 = vmul.f32 %v5181_v10, %v5181_v10  ;;  %v1628_v36 = vsel %vm1313_vm12, %v1595_v0, 0.0  ;;  %v1528_v8 = vsel %vm1313_vm12, %v5181_v10, 0.0 }
 0x257   :  { %v1524_v14 = vsel %vm1313_vm12, %v5183_v26, 0.0  ;;  %v1594_v43 = vmul.f32 %v5183_v26, %v5183_v26  ;;  %v1625_v16 = vsel %vm1313_vm12, %v1593_v34, 0.0 }
 0x258   :  { %v1525_v54 = vadd.f32 %v1524_v14, %v1523_v42  ;;  %v1630_v63 = vsel %vm1313_vm12, %v1596_v47, 0.0 }
 0x259   :  { %v1626_v6 = vsel %vm1313_vm12, %v1594_v43, 0.0 }
 0x25a   :  { %v1527_v24 = vadd.f32 %v1526_v30, %v1525_v54  ;;  %v1627_v23 = vadd.f32 %v1626_v6, %v1625_v16 }
 0x25c   :  { %v1629_v56 = vadd.f32 %v1628_v36, %v1627_v23  ;;  %v1529_v62 = vadd.f32 %v1528_v8, %v1527_v24 }
 0x25e   :  { %v1631_v1 = vadd.f32 %v1630_v63, %v1629_v56 }
 0x26f   :  { %v5204_v5 = vpop.f32.mrb[4].mxu0 }
 0x270   :  { %v5206_v7 = vpop.f32.mrb[5].mxu0  ;;  %v1599_v12 = vmul.f32 %v5204_v5, %v5204_v5  ;;  %v1534_v55 = vsel %vm1313_vm12, %v5204_v5, 0.0 }
 0x271   :  { %v1530_v13 = vsel %vm1313_vm12, %v5206_v7, 0.0  ;;  %v1597_v27 = vmul.f32 %v5206_v7, %v5206_v7  ;;  %v5212_v41 = vpop.f32.mrb[6].mxu0 }
 0x272   :  { %v1531_v53 = vadd.f32 %v1530_v13, %v1529_v62  ;;  %v5214_v20 = vpop.f32.mrb[7].mxu0  ;;  %v1600_v52 = vmul.f32 %v5212_v41, %v5212_v41  ;;  %v1636_v15 = vsel %vm1313_vm12, %v1599_v12, 0.0  ;;  %v1536_v9 = vsel %vm1313_vm12, %v5212_v41, 0.0 }
 0x273   :  { %v1632_v51 = vsel %vm1313_vm12, %v1597_v27, 0.0  ;;  %v1532_v58 = vsel %vm1313_vm12, %v5214_v20, 0.0  ;;  %v1598_v29 = vmul.f32 %v5214_v20, %v5214_v20 }
 0x274   :  { %v1633_v33 = vadd.f32 %v1632_v51, %v1631_v1  ;;  %v1533_v3 = vadd.f32 %v1532_v58, %v1531_v53  ;;  %v1638_v11 = vsel %vm1313_vm12, %v1600_v52, 0.0 }
 0x275   :  { %v1634_v48 = vsel %vm1313_vm12, %v1598_v29, 0.0 }
 0x276   :  { %v1535_v4 = vadd.f32 %v1534_v55, %v1533_v3  ;;  %v1635_v46 = vadd.f32 %v1634_v48, %v1633_v33 }
 0x278   :  { %v1637_v45 = vadd.f32 %v1636_v15, %v1635_v46  ;;  %v1537_v31 = vadd.f32 %v1536_v9, %v1535_v4 }
 0x27a   :  { %v1639_v61 = vadd.f32 %v1638_v11, %v1637_v45 }
 0x293   :  { %v5232_v17 = vpop.f32.mrb[8].mxu0 }
 0x294   :  { %v5234_v57 = vpop.f32.mrb[9].mxu0  ;;  %v1603_v49 = vmul.f32 %v5232_v17, %v5232_v17  ;;  %v1542_v18 = vsel %vm1313_vm12, %v5232_v17, 0.0 }
 0x295   :  { %v1538_v39 = vsel %vm1313_vm12, %v5234_v57, 0.0  ;;  %v1601_v25 = vmul.f32 %v5234_v57, %v5234_v57  ;;  %v5240_v35 = vpop.f32.mrb[10].mxu0 }
 0x296   :  { %v1539_v28 = vadd.f32 %v1538_v39, %v1537_v31  ;;  %v5242_v60 = vpop.f32.mrb[11].mxu0  ;;  %v1604_v19 = vmul.f32 %v5240_v35, %v5240_v35  ;;  %v1644_v40 = vsel %vm1313_vm12, %v1603_v49, 0.0  ;;  %v1544_v0 = vsel %vm1313_vm12, %v5240_v35, 0.0 }
 0x297   :  { %v1640_v22 = vsel %vm1313_vm12, %v1601_v25, 0.0  ;;  %v1540_v38 = vsel %vm1313_vm12, %v5242_v60, 0.0  ;;  %v1602_v2 = vmul.f32 %v5242_v60, %v5242_v60 }
 0x298   :  { %v1641_v59 = vadd.f32 %v1640_v22, %v1639_v61  ;;  %v1541_v44 = vadd.f32 %v1540_v38, %v1539_v28  ;;  %v1646_v43 = vsel %vm1313_vm12, %v1604_v19, 0.0 }
 0x299   :  { %v1642_v37 = vsel %vm1313_vm12, %v1602_v2, 0.0 }
 0x29a   :  { %v1543_v50 = vadd.f32 %v1542_v18, %v1541_v44  ;;  %v1643_v34 = vadd.f32 %v1642_v37, %v1641_v59 }
 0x29c   :  { %v1645_v42 = vadd.f32 %v1644_v40, %v1643_v34  ;;  %v1545_v14 = vadd.f32 %v1544_v0, %v1543_v50 }
 0x29e   :  { %v1647_v54 = vadd.f32 %v1646_v43, %v1645_v42  ;;  %v3087_v42 = vld [vmem:[#allocation6] sm:$0xff]  }
 0x29f   :  { %2208 = vmatprep.subr.bf16.mxu1 %v3087_v42 }
 0x2a0   :  { %2209 = vmatpush3.bf16.msra.mxu1 %v3087_v42 }
 0x2b2   :  { %v5260_v30 = vpop.f32.mrb[12].mxu0 }
 0x2b3   :  { %v5262_v16 = vpop.f32.mrb[13].mxu0  ;;  %v1607_v8 = vmul.f32 %v5260_v30, %v5260_v30  ;;  %v1550_v27 = vsel %vm1313_vm12, %v5260_v30, 0.0 }
 0x2b4   :  { %v1546_v47 = vsel %vm1313_vm12, %v5262_v16, 0.0  ;;  %v1605_v6 = vmul.f32 %v5262_v16, %v5262_v16  ;;  %v5268_v24 = vpop.f32.mrb[14].mxu0 }
 0x2b5   :  { %v1547_v23 = vadd.f32 %v1546_v47, %v1545_v14  ;;  %v5270_v36 = vpop.f32.mrb[15].mxu0  ;;  %v1608_v53 = vmul.f32 %v5268_v24, %v5268_v24  ;;  %v1652_v29 = vsel %vm1313_vm12, %v1607_v8, 0.0  ;;  %v1552_v33 = vsel %vm1313_vm12, %v5268_v24, 0.0  ;;  %v3088_v14 = vld [vmem:[#allocation6 + $0x8] sm:$0xff]  }
 0x2b6   :  { %v1648_v56 = vsel %vm1313_vm12, %v1605_v6, 0.0  ;;  %v1548_v62 = vsel %vm1313_vm12, %v5270_v36, 0.0  ;;  %v1606_v63 = vmul.f32 %v5270_v36, %v5270_v36  ;;  %2210 = vmatprep.subr.bf16.mxu1 %v3088_v14 }
 0x2b7   :  { %v1649_v1 = vadd.f32 %v1648_v56, %v1647_v54  ;;  %v1549_v13 = vadd.f32 %v1548_v62, %v1547_v23  ;;  %v1654_v52 = vsel %vm1313_vm12, %v1608_v53, 0.0  ;;  %2211 = vmatpush3.bf16.msra.mxu1 %v3088_v14 }
 0x2b8   :  { %v1650_v12 = vsel %vm1313_vm12, %v1606_v63, 0.0 }
 0x2b9   :  { %v1551_v51 = vadd.f32 %v1550_v27, %v1549_v13  ;;  %v1651_v58 = vadd.f32 %v1650_v12, %v1649_v1 }
 0x2bb   :  { %v1653_v3 = vadd.f32 %v1652_v29, %v1651_v58  ;;  %v1553_v55 = vadd.f32 %v1552_v33, %v1551_v51 }
 0x2bd   :  { %v1655_v48 = vadd.f32 %v1654_v52, %v1653_v3 }
 0x2d2   :  { %v5288_v4 = vpop.f32.mrb[16].mxu0 }
 0x2d3   :  { %v5290_v46 = vpop.f32.mrb[17].mxu0  ;;  %v1611_v61 = vmul.f32 %v5288_v4, %v5288_v4  ;;  %v1558_v38 = vsel %vm1313_vm12, %v5288_v4, 0.0 }
 0x2d4   :  { %v1554_v15 = vsel %vm1313_vm12, %v5290_v46, 0.0  ;;  %v1609_v9 = vmul.f32 %v5290_v46, %v5290_v46  ;;  %v5296_v45 = vpop.f32.mrb[18].mxu0 }
 0x2d5   :  { %v1555_v31 = vadd.f32 %v1554_v15, %v1553_v55  ;;  %v5298_v11 = vpop.f32.mrb[19].mxu0  ;;  %v1612_v2 = vmul.f32 %v5296_v45, %v5296_v45  ;;  %v1660_v19 = vsel %vm1313_vm12, %v1611_v61, 0.0  ;;  %v1560_v37 = vsel %vm1313_vm12, %v5296_v45, 0.0 }
 0x2d6   :  { %v1656_v39 = vsel %vm1313_vm12, %v1609_v9, 0.0  ;;  %v1556_v25 = vsel %vm1313_vm12, %v5298_v11, 0.0  ;;  %v1610_v28 = vmul.f32 %v5298_v11, %v5298_v11 }
 0x2d7   :  { %v1657_v49 = vadd.f32 %v1656_v39, %v1655_v48  ;;  %v1557_v22 = vadd.f32 %v1556_v25, %v1555_v31  ;;  %v1662_v40 = vsel %vm1313_vm12, %v1612_v2, 0.0 }
 0x2d8   :  { %v1658_v59 = vsel %vm1313_vm12, %v1610_v28, 0.0 }
 0x2d9   :  { %v1559_v44 = vadd.f32 %v1558_v38, %v1557_v22  ;;  %v1659_v18 = vadd.f32 %v1658_v59, %v1657_v49 }
 0x2db   :  { %v1661_v50 = vadd.f32 %v1660_v19, %v1659_v18  ;;  %v1561_v34 = vadd.f32 %v1560_v37, %v1559_v44 }
 0x2dd   :  { %v1663_v0 = vadd.f32 %v1662_v40, %v1661_v50 }
 0x2f2   :  { %v5316_v43 = vpop.f32.mrb[20].mxu0 }
 0x2f3   :  { %v5318_v54 = vpop.f32.mrb[21].mxu0  ;;  %v1615_v62 = vmul.f32 %v5316_v43, %v5316_v43  ;;  %v1566_v12 = vsel %vm1313_vm12, %v5316_v43, 0.0 }
 0x2f4   :  { %v1562_v47 = vsel %vm1313_vm12, %v5318_v54, 0.0  ;;  %v1613_v6 = vmul.f32 %v5318_v54, %v5318_v54  ;;  %v5324_v23 = vpop.f32.mrb[22].mxu0 }
 0x2f5   :  { %v1563_v8 = vadd.f32 %v1562_v47, %v1561_v34  ;;  %v5326_v56 = vpop.f32.mrb[23].mxu0  ;;  %v1616_v51 = vmul.f32 %v5324_v23, %v5324_v23  ;;  %v1668_v3 = vsel %vm1313_vm12, %v1615_v62, 0.0  ;;  %v1568_v55 = vsel %vm1313_vm12, %v5324_v23, 0.0 }
 0x2f6   :  { %v1664_v63 = vsel %vm1313_vm12, %v1613_v6, 0.0  ;;  %v1564_v1 = vsel %vm1313_vm12, %v5326_v56, 0.0  ;;  %v1614_v13 = vmul.f32 %v5326_v56, %v5326_v56 }
 0x2f7   :  { %v1665_v27 = vadd.f32 %v1664_v63, %v1663_v0  ;;  %v1565_v53 = vadd.f32 %v1564_v1, %v1563_v8  ;;  %v1670_v15 = vsel %vm1313_vm12, %v1616_v51, 0.0 }
 0x2f8   :  { %v1666_v58 = vsel %vm1313_vm12, %v1614_v13, 0.0 }
 0x2f9   :  { %v1567_v29 = vadd.f32 %v1566_v12, %v1565_v53  ;;  %v1667_v33 = vadd.f32 %v1666_v58, %v1665_v27 }
 0x2fb   :  { %v1669_v52 = vadd.f32 %v1668_v3, %v1667_v33  ;;  %v1569_v48 = vadd.f32 %v1568_v55, %v1567_v29 }
 0x2fd   :  { %v1671_v9 = vadd.f32 %v1670_v15, %v1669_v52 }
 0x312   :  { %v5344_v31 = vpop.f32.mrb[24].mxu0 }
 0x313   :  { %v5346_v61 = vpop.f32.mrb[25].mxu0  ;;  %v1619_v38 = vmul.f32 %v5344_v31, %v5344_v31  ;;  %v1574_v37 = vsel %vm1313_vm12, %v5344_v31, 0.0 }
 0x314   :  { %v1570_v39 = vsel %vm1313_vm12, %v5346_v61, 0.0  ;;  %v1617_v25 = vmul.f32 %v5346_v61, %v5346_v61  ;;  %v5352_v28 = vpop.f32.mrb[26].mxu0 }
 0x315   :  { %v1571_v49 = vadd.f32 %v1570_v39, %v1569_v48  ;;  %v5354_v22 = vpop.f32.mrb[27].mxu0  ;;  %v1620_v50 = vmul.f32 %v5352_v28, %v5352_v28  ;;  %v1676_v42 = vsel %vm1313_vm12, %v1619_v38, 0.0  ;;  %v1576_v14 = vsel %vm1313_vm12, %v5352_v28, 0.0 }
 0x316   :  { %v1672_v2 = vsel %vm1313_vm12, %v1617_v25, 0.0  ;;  %v1572_v59 = vsel %vm1313_vm12, %v5354_v22, 0.0  ;;  %v1618_v44 = vmul.f32 %v5354_v22, %v5354_v22 }
 0x317   :  { %v1673_v18 = vadd.f32 %v1672_v2, %v1671_v9  ;;  %v1573_v19 = vadd.f32 %v1572_v59, %v1571_v49  ;;  %v1678_v8 = vsel %vm1313_vm12, %v1620_v50, 0.0 }
 0x318   :  { %v1674_v34 = vsel %vm1313_vm12, %v1618_v44, 0.0 }
 0x319   :  { %v1575_v40 = vadd.f32 %v1574_v37, %v1573_v19  ;;  %v1675_v0 = vadd.f32 %v1674_v34, %v1673_v18 }
 0x31b   :  { %v1677_v47 = vadd.f32 %v1676_v42, %v1675_v0  ;;  %v1577_v6 = vadd.f32 %v1576_v14, %v1575_v40 }
 0x31d   :  { %v1679_v62 = vadd.f32 %v1678_v8, %v1677_v47 }
 0x327   :  { %v5372_v63 = vpop.f32.mrb[28].mxu0 }
 0x328   :  { %v1508_v1 = vpop.f32.mrb[29].mxu0  ;;  %v1623_v58 = vmul.f32 %v5372_v63, %v5372_v63  ;;  %v1582_v48 = vsel %vm1313_vm12, %v5372_v63, 0.0 }
 0x329   :  { %v1578_v13 = vsel %vm1313_vm12, %v1508_v1, 0.0  ;;  %v1621_v27 = vmul.f32 %v1508_v1, %v1508_v1  ;;  %v5375_v53 = vpop.f32.mrb[30].mxu0 }
 0x32a   :  { %v1579_v12 = vadd.f32 %v1578_v13, %v1577_v6  ;;  %v1511_v51 = vpop.f32.mrb[31].mxu0  ;;  %v1624_v15 = vmul.f32 %v5375_v53, %v5375_v53  ;;  %v1684_v49 = vsel %vm1313_vm12, %v1623_v58, 0.0  ;;  %v1584_v38 = vsel %vm1313_vm12, %v5375_v53, 0.0 }
 0x32b   :  { %v1680_v29 = vsel %vm1313_vm12, %v1621_v27, 0.0  ;;  %v1580_v33 = vsel %vm1313_vm12, %v1511_v51, 0.0  ;;  %v1622_v3 = vmul.f32 %v1511_v51, %v1511_v51 }
 0x32c   :  { %v1681_v55 = vadd.f32 %v1680_v29, %v1679_v62  ;;  %v1581_v52 = vadd.f32 %v1580_v33, %v1579_v12  ;;  %v1686_v44 = vsel %vm1313_vm12, %v1624_v15, 0.0 }
 0x32d   :  { %v1682_v9 = vsel %vm1313_vm12, %v1622_v3, 0.0  ;;  %v1706_v3 = vlaneseq }
 0x32e   :  { %v1583_v39 = vadd.f32 %v1582_v48, %v1581_v52  ;;  %v1683_v25 = vadd.f32 %v1682_v9, %v1681_v55  ;;  %v1698_v52 = vld [vmem:[%s5652_s2] sm:$0x1] }
 0x32f   :  { %v1707_v55 = vshrl.u32 %v1706_v3, 7 }
 0x330   :  { %v1585_v2 = vadd.f32 %v1584_v38, %v1583_v39  ;;  %v1685_v59 = vadd.f32 %v1684_v49, %v1683_v25  ;;  %v1702_v39 = vld [vmem:[%s5653_s3] sm:$0x1] }
 0x331   :  { %v1708_v48 = vsub.s32 0, %v1707_v55 }
 0x332   :  { %v1586_v18 = vrot.slane %v1585_v2, 4  ;;  %v1687_v19 = vadd.f32 %v1686_v44, %v1685_v59 }
 0x334   :  { %v1587_v37 = vadd.f32 %v1586_v18, %v1585_v2  ;;  %v1688_v50 = vrot.slane %v1687_v19, 4 }
 0x336   :  { %v1588_v34 = vrot.slane %v1587_v37, 2  ;;  %v1689_v40 = vadd.f32 %v1688_v50, %v1687_v19 }
 0x338   :  { %v1589_v0 = vadd.f32 %v1588_v34, %v1587_v37  ;;  %v1690_v42 = vrot.slane %v1689_v40, 2 }
 0x33a   :  { %v1590_v14 = vrot.slane %v1589_v0, 1  ;;  %v1691_v47 = vadd.f32 %v1690_v42, %v1689_v40 }
 0x33c   :  { %v1591_v6 = vadd.f32 %v1590_v14, %v1589_v0  ;;  %v1692_v8 = vrot.slane %v1691_v47, 1 }
 0x33e   :  { %v1592_v62 = vmul.f32 0.00390625, %v1591_v6  ;;  %v1693_v13 = vadd.f32 %v1692_v8, %v1691_v47 }
 0x340   :  { %v1694_v27 = vmul.f32 0.00390625, %v1693_v13  ;;  %v1695_v12 = vmul.f32 %v1592_v62, %v1592_v62 }
 0x342   :  { %v1696_v58 = vsub.f32 %v1694_v27, %v1695_v12 }
 0x344   :  { %v1697_v29 = vmax.f32 %v1696_v58, 0.0 }
 0x346   :  { %v1699_v33 = vadd.f32 1e-05, %v1697_v29 }
 0x348   :  { %3217 = vrsqrt.f32 %v1699_v33 }
 0x352   :  { %v3218_v15 = vpop.eup %3217 }
 0x353   :  { %v1701_v9 = vmul.f32 %v3218_v15, %v1698_v52 }
 0x355   :  { %v1703_v25 = vmul.f32 %v1701_v9, %v1592_v62  ;;  %v1709_v49 = vrot.slane %v1701_v9, %v1708_v48 }
 0x357   :  { %v1704_v38 = vsub.f32 %v1702_v39, %v1703_v25  ;;  %v1739_v2 = vmul.f32 %v1709_v49, %v1508_v1  ;;  %v1740_v59 = vmul.f32 %v1709_v49, %v1511_v51  ;;  %v5397_v44 = vmul.f32 %v1709_v49, %v5177_v32 }
 0x358   :  { %v5400_v18 = vmul.f32 %v1709_v49, %v5183_v26  ;;  %v1713_v19 = vmul.f32 %v5175_v21, %v1709_v49  ;;  %v1714_v37 = vmul.f32 %v5181_v10, %v1709_v49  ;;  %v1715_v50 = vmul.f32 %v1709_v49, %v5206_v7 }
 0x359   :  { %v5405_v34 = vrot.slane %v1704_v38, %v1708_v48  ;;  %v1716_v40 = vmul.f32 %v1709_v49, %v5214_v20  ;;  %v1717_v0 = vmul.f32 %v5204_v5, %v1709_v49  ;;  %v1718_v1 = vmul.f32 %v5212_v41, %v1709_v49 }
 0x35a   :  { %v1719_v32 = vmul.f32 %v1709_v49, %v5234_v57  ;;  %v1720_v51 = vmul.f32 %v1709_v49, %v5242_v60  ;;  %v1721_v26 = vmul.f32 %v5232_v17, %v1709_v49  ;;  %v1722_v21 = vmul.f32 %v5240_v35, %v1709_v49 }
 0x35b   :  { %v1777_v10 = vadd.f32 %v5405_v34, %v1739_v2  ;;  %v1778_v7 = vadd.f32 %v5405_v34, %v1740_v59  ;;  %v1723_v42 = vmul.f32 %v1709_v49, %v5262_v16  ;;  %v1724_v20 = vmul.f32 %v1709_v49, %v5270_v36 }
 0x35c   :  { %v1725_v5 = vmul.f32 %v5260_v30, %v1709_v49  ;;  %v1726_v41 = vmul.f32 %v5268_v24, %v1709_v49  ;;  %v1727_v57 = vmul.f32 %v1709_v49, %v5290_v46  ;;  %v1728_v60 = vmul.f32 %v1709_v49, %v5298_v11 }
 0x35d   :  { %v1809_v14 = vmax.f32 %v1777_v10, 0.0  ;;  %v1810_v17 = vmax.f32 %v1778_v7, 0.0  ;;  %v1729_v35 = vmul.f32 %v5288_v4, %v1709_v49  ;;  %v1730_v47 = vmul.f32 %v5296_v45, %v1709_v49 }
 0x35e   :  { %v1731_v6 = vmul.f32 %v1709_v49, %v5318_v54  ;;  %v1732_v16 = vmul.f32 %v1709_v49, %v5326_v56  ;;  %v1733_v36 = vmul.f32 %v5316_v43, %v1709_v49  ;;  %v1734_v30 = vmul.f32 %v5324_v23, %v1709_v49 }
 0x35f   :  { %v5428_v8 = vpack.c.bf16 %v1810_v17, %v1809_v14  ;;  %v1735_v24 = vmul.f32 %v1709_v49, %v5346_v61  ;;  %v1736_v46 = vmul.f32 %v1709_v49, %v5354_v22  ;;  %v1737_v11 = vmul.f32 %v5344_v31, %v1709_v49 }
 0x360   :  { %v1738_v4 = vmul.f32 %v5352_v28, %v1709_v49  ;;  %v1741_v45 = vmul.f32 %v5372_v63, %v1709_v49  ;;  %v1742_v54 = vmul.f32 %v5375_v53, %v1709_v49  ;;  %v1751_v56 = vadd.f32 %v5405_v34, %v1713_v19 }
 0x361   :  { %v1752_v43 = vadd.f32 %v5405_v34, %v1714_v37  ;;  %v1753_v23 = vadd.f32 %v5405_v34, %v1715_v50  ;;  %v1754_v62 = vadd.f32 %v5405_v34, %v1716_v40  ;;  %v1755_v61 = vadd.f32 %v5405_v34, %v1717_v0 }
 0x362   :  { %v1756_v22 = vadd.f32 %v5405_v34, %v1718_v1  ;;  %v1757_v31 = vadd.f32 %v5405_v34, %v1719_v32  ;;  %v1758_v28 = vadd.f32 %v5405_v34, %v1720_v51  ;;  %v1759_v63 = vadd.f32 %v5405_v34, %v1721_v26 }
 0x363   :  { %v1760_v53 = vadd.f32 %v5405_v34, %v1722_v21  ;;  %v1761_v13 = vadd.f32 %v5405_v34, %v1723_v42  ;;  %v1762_v27 = vadd.f32 %v5405_v34, %v1724_v20  ;;  %v1763_v12 = vadd.f32 %v5405_v34, %v1725_v5 }
 0x364   :  { %v1764_v58 = vadd.f32 %v5405_v34, %v1726_v41  ;;  %v1765_v29 = vadd.f32 %v5405_v34, %v1727_v57  ;;  %v1766_v33 = vadd.f32 %v5405_v34, %v1728_v60  ;;  %v1767_v3 = vadd.f32 %v5405_v34, %v1729_v35 }
 0x365   :  { %v1768_v55 = vadd.f32 %v5405_v34, %v1730_v47  ;;  %v1769_v52 = vadd.f32 %v5405_v34, %v1731_v6  ;;  %v1770_v48 = vadd.f32 %v5405_v34, %v1732_v16  ;;  %v1771_v15 = vadd.f32 %v5405_v34, %v1733_v36 }
 0x366   :  { %v1772_v9 = vadd.f32 %v5405_v34, %v1734_v30  ;;  %v1773_v39 = vadd.f32 %v5405_v34, %v1735_v24  ;;  %v1774_v25 = vadd.f32 %v5405_v34, %v1736_v46  ;;  %v1775_v49 = vadd.f32 %v5405_v34, %v1737_v11 }
 0x367   :  { %v1776_v38 = vadd.f32 %v5405_v34, %v1738_v4  ;;  %v1779_v2 = vadd.f32 %v5405_v34, %v1741_v45  ;;  %v1780_v59 = vadd.f32 %v5405_v34, %v1742_v54  ;;  %v1783_v19 = vmax.f32 %v1751_v56, 0.0 }
 0x368   :  { %v1784_v37 = vmax.f32 %v1752_v43, 0.0  ;;  %v1785_v50 = vmax.f32 %v1753_v23, 0.0  ;;  %v1786_v40 = vmax.f32 %v1754_v62, 0.0  ;;  %v1787_v0 = vmax.f32 %v1755_v61, 0.0 }
 0x369   :  { %v1788_v1 = vmax.f32 %v1756_v22, 0.0  ;;  %v1789_v32 = vmax.f32 %v1757_v31, 0.0  ;;  %v1790_v51 = vmax.f32 %v1758_v28, 0.0  ;;  %v1791_v26 = vmax.f32 %v1759_v63, 0.0 }
 0x36a   :  { %v1792_v21 = vmax.f32 %v1760_v53, 0.0  ;;  %v1793_v10 = vmax.f32 %v1761_v13, 0.0  ;;  %v1794_v7 = vmax.f32 %v1762_v27, 0.0  ;;  %v1795_v42 = vmax.f32 %v1763_v12, 0.0 }
 0x36b   :  { %v1796_v20 = vmax.f32 %v1764_v58, 0.0  ;;  %v1797_v5 = vmax.f32 %v1765_v29, 0.0  ;;  %v1798_v41 = vmax.f32 %v1766_v33, 0.0  ;;  %v1799_v57 = vmax.f32 %v1767_v3, 0.0 }
 0x36c   :  { %v1800_v60 = vmax.f32 %v1768_v55, 0.0  ;;  %v1801_v14 = vmax.f32 %v1769_v52, 0.0  ;;  %v1802_v17 = vmax.f32 %v1770_v48, 0.0  ;;  %v1803_v35 = vmax.f32 %v1771_v15, 0.0 }
 0x36d   :  { %v1804_v47 = vmax.f32 %v1772_v9, 0.0  ;;  %v1805_v6 = vmax.f32 %v1773_v39, 0.0  ;;  %v1806_v16 = vmax.f32 %v1774_v25, 0.0  ;;  %v1807_v36 = vmax.f32 %v1775_v49, 0.0 }
 0x36e   :  { %v1808_v30 = vmax.f32 %v1776_v38, 0.0  ;;  %v1811_v24 = vmax.f32 %v1779_v2, 0.0  ;;  %v1812_v46 = vmax.f32 %v1780_v59, 0.0  ;;  %v1749_v11 = vadd.f32 %v5405_v34, %v5397_v44 }
 0x36f   :  { %v1750_v4 = vadd.f32 %v5405_v34, %v5400_v18  ;;  %v1814_v45 = vpack.c.bf16 %v1784_v37, %v1783_v19  ;;  %v1815_v54 = vpack.c.bf16 %v1786_v40, %v1785_v50  ;;  %v1816_v56 = vpack.c.bf16 %v1788_v1, %v1787_v0  ;;  %v5488_v18 = vld [vmem:[%s5655_s5] ss:$0 sm:$0xff] }
 0x370   :  { %v1781_v43 = vmax.f32 %v1749_v11, 0.0  ;;  %v1817_v23 = vpack.c.bf16 %v1790_v51, %v1789_v32  ;;  %v1818_v62 = vpack.c.bf16 %v1792_v21, %v1791_v26  ;;  %v1819_v61 = vpack.c.bf16 %v1794_v7, %v1793_v10 }
 0x371   :  { %v1782_v22 = vmax.f32 %v1750_v4, 0.0  ;;  %v1820_v31 = vpack.c.bf16 %v1796_v20, %v1795_v42  ;;  %v1821_v28 = vpack.c.bf16 %v1798_v41, %v1797_v5  ;;  %v1822_v63 = vpack.c.bf16 %v1800_v60, %v1799_v57 }
 0x372   :  { %v1823_v53 = vpack.c.bf16 %v1802_v17, %v1801_v14  ;;  %v1824_v13 = vpack.c.bf16 %v1804_v47, %v1803_v35  ;;  %v1825_v27 = vpack.c.bf16 %v1806_v16, %v1805_v6  ;;  %v1826_v12 = vpack.c.bf16 %v1808_v30, %v1807_v36 }
 0x373   :  { %v1813_v58 = vpack.c.bf16 %v1782_v22, %v1781_v43  ;;  %v1828_v44 = vpack.c.bf16 %v1812_v46, %v1811_v24 }
 0x375   :  { %2212 = vmatprep.mubr.msk.bf16.mxu1 %vm1313_vm12, %v1813_v58 }
 0x376   :  { %2213 = vmatmul.mubr.msk.bf16.vlgmr.msra.gmra.mrb[0].mxu1 %vm1313_vm12, %v1814_v45 }
 0x377   :  { %2216 = vmatprep.mubr.msk.bf16.mxu1 %vm1313_vm12, %v1815_v54 }
 0x37e   :  { %2217 = vmatmul.mubr.msk.bf16.gmra.mrb[4].mxu1 %vm1313_vm12, %v1816_v56 }
 0x37f   :  { %2220 = vmatprep.mubr.msk.bf16.mxu1 %vm1313_vm12, %v1817_v23 }
 0x386   :  { %2221 = vmatmul.mubr.msk.bf16.gmra.mrb[8].mxu1 %vm1313_vm12, %v1818_v62 }
 0x387   :  { %2224 = vmatprep.mubr.msk.bf16.mxu1 %vm1313_vm12, %v1819_v61 }
 0x38e   :  { %2225 = vmatmul.mubr.msk.bf16.gmra.mrb[12].mxu1 %vm1313_vm12, %v1820_v31 }
 0x38f   :  { %2228 = vmatprep.mubr.msk.bf16.mxu1 %vm1313_vm12, %v1821_v28 }
 0x396   :  { %2229 = vmatmul.mubr.msk.bf16.gmra.mrb[16].mxu1 %vm1313_vm12, %v1822_v63 }
 0x397   :  { %2232 = vmatprep.mubr.msk.bf16.mxu1 %vm1313_vm12, %v1823_v53 }
 0x39e   :  { %2233 = vmatmul.mubr.msk.bf16.gmra.mrb[20].mxu1 %vm1313_vm12, %v1824_v13 }
 0x39f   :  { %2236 = vmatprep.mubr.msk.bf16.mxu1 %vm1313_vm12, %v1825_v27 }
 0x3a6   :  { %2237 = vmatmul.mubr.msk.bf16.gmra.mrb[24].mxu1 %vm1313_vm12, %v1826_v12 }
 0x3a7   :  { %2240 = vmatprep.mubr.msk.bf16.mxu1 %vm1313_vm12, %v5428_v8 }
 0x3ae   :  { %2241 = vmatmul.mubr.msk.bf16.gmra.mrb[28].mxu1 %vm1313_vm12, %v1828_v44 }
 0x449   :  { %v2214_v34 = vpop.f32.mrb[0].mxu1 }
 0x44a   :  { %v1943_v29 = vadd.f32 %v2214_v34, %v5488_v18  ;;  %v1934_v33 = vpop.f32.mrb[1].mxu1 }
 0x44b   :  { %v1935_v3 = vadd.f32 %v5488_v18, %v1934_v33  ;;  %v2215_v55 = vpop.f32.mrb[2].mxu1 }
 0x44c   :  { %2063 = vst.msk [vmem:[%s5656_s6 + $0x10] sm:$0xff] %vm1313_vm12, %v1943_v29  ;;  %v1946_v8 = vadd.f32 %v2215_v55, %v5488_v18  ;;  %v1937_v52 = vpop.f32.mrb[3].mxu1 }
 0x44d   :  { %2061 = vst.msk [vmem:[%s5656_s6] sm:$0xff] %vm1313_vm12, %v1935_v3  ;;  %v1938_v48 = vadd.f32 %v5488_v18, %v1937_v52 }
 0x44e   :  { %2064 = vst.msk [vmem:[%s5656_s6 + $0x18] sm:$0xff] %vm1313_vm12, %v1946_v8 }
 0x44f   :  { %2062 = vst.msk [vmem:[%s5656_s6 + $0x8] sm:$0xff] %vm1313_vm12, %v1938_v48 }
 0x451   :  { %v2218_v15 = vpop.f32.mrb[4].mxu1 }
 0x452   :  { %v1959_v9 = vadd.f32 %v2218_v15, %v5488_v18  ;;  %v1950_v39 = vpop.f32.mrb[5].mxu1 }
 0x453   :  { %v1951_v25 = vadd.f32 %v5488_v18, %v1950_v39  ;;  %v2219_v49 = vpop.f32.mrb[6].mxu1 }
 0x454   :  { %2067 = vst.msk [vmem:[%s5656_s6 + $0x30] sm:$0xff] %vm1313_vm12, %v1959_v9  ;;  %v1962_v38 = vadd.f32 %v2219_v49, %v5488_v18  ;;  %v1953_v2 = vpop.f32.mrb[7].mxu1 }
 0x455   :  { %2065 = vst.msk [vmem:[%s5656_s6 + $0x20] sm:$0xff] %vm1313_vm12, %v1951_v25  ;;  %v1954_v59 = vadd.f32 %v5488_v18, %v1953_v2 }
 0x456   :  { %2068 = vst.msk [vmem:[%s5656_s6 + $0x38] sm:$0xff] %vm1313_vm12, %v1962_v38 }
 0x457   :  { %2066 = vst.msk [vmem:[%s5656_s6 + $0x28] sm:$0xff] %vm1313_vm12, %v1954_v59 }
 0x459   :  { %v2222_v19 = vpop.f32.mrb[8].mxu1 }
 0x45a   :  { %v1975_v37 = vadd.f32 %v2222_v19, %v5488_v18  ;;  %v1966_v50 = vpop.f32.mrb[9].mxu1 }
 0x45b   :  { %v1967_v40 = vadd.f32 %v5488_v18, %v1966_v50  ;;  %v2223_v0 = vpop.f32.mrb[10].mxu1 }
 0x45c   :  { %2071 = vst.msk [vmem:[%s5656_s6 + $0x50] sm:$0xff] %vm1313_vm12, %v1975_v37  ;;  %v1978_v1 = vadd.f32 %v2223_v0, %v5488_v18  ;;  %v1969_v32 = vpop.f32.mrb[11].mxu1 }
 0x45d   :  { %2069 = vst.msk [vmem:[%s5656_s6 + $0x40] sm:$0xff] %vm1313_vm12, %v1967_v40  ;;  %v1970_v51 = vadd.f32 %v5488_v18, %v1969_v32 }
 0x45e   :  { %2072 = vst.msk [vmem:[%s5656_s6 + $0x58] sm:$0xff] %vm1313_vm12, %v1978_v1 }
 0x45f   :  { %2070 = vst.msk [vmem:[%s5656_s6 + $0x48] sm:$0xff] %vm1313_vm12, %v1970_v51 }
 0x461   :  { %v2226_v26 = vpop.f32.mrb[12].mxu1 }
 0x462   :  { %v1991_v21 = vadd.f32 %v2226_v26, %v5488_v18  ;;  %v1982_v10 = vpop.f32.mrb[13].mxu1 }
 0x463   :  { %v1983_v7 = vadd.f32 %v5488_v18, %v1982_v10  ;;  %v2227_v42 = vpop.f32.mrb[14].mxu1 }
 0x464   :  { %2075 = vst.msk [vmem:[%s5656_s6 + $0x70] sm:$0xff] %vm1313_vm12, %v1991_v21  ;;  %v1994_v20 = vadd.f32 %v2227_v42, %v5488_v18  ;;  %v1985_v5 = vpop.f32.mrb[15].mxu1 }
 0x465   :  { %2073 = vst.msk [vmem:[%s5656_s6 + $0x60] sm:$0xff] %vm1313_vm12, %v1983_v7  ;;  %v1986_v41 = vadd.f32 %v5488_v18, %v1985_v5 }
 0x466   :  { %2076 = vst.msk [vmem:[%s5656_s6 + $0x78] sm:$0xff] %vm1313_vm12, %v1994_v20 }
 0x467   :  { %2074 = vst.msk [vmem:[%s5656_s6 + $0x68] sm:$0xff] %vm1313_vm12, %v1986_v41 }
 0x469   :  { %v2230_v57 = vpop.f32.mrb[16].mxu1 }
 0x46a   :  { %v2007_v60 = vadd.f32 %v2230_v57, %v5488_v18  ;;  %v1998_v14 = vpop.f32.mrb[17].mxu1 }
 0x46b   :  { %v1999_v17 = vadd.f32 %v5488_v18, %v1998_v14  ;;  %v2231_v35 = vpop.f32.mrb[18].mxu1 }
 0x46c   :  { %2079 = vst.msk [vmem:[%s5656_s6 + $0x90] sm:$0xff] %vm1313_vm12, %v2007_v60  ;;  %v2010_v47 = vadd.f32 %v2231_v35, %v5488_v18  ;;  %v2001_v6 = vpop.f32.mrb[19].mxu1 }
 0x46d   :  { %2077 = vst.msk [vmem:[%s5656_s6 + $0x80] sm:$0xff] %vm1313_vm12, %v1999_v17  ;;  %v2002_v16 = vadd.f32 %v5488_v18, %v2001_v6 }
 0x46e   :  { %2080 = vst.msk [vmem:[%s5656_s6 + $0x98] sm:$0xff] %vm1313_vm12, %v2010_v47 }
 0x46f   :  { %2078 = vst.msk [vmem:[%s5656_s6 + $0x88] sm:$0xff] %vm1313_vm12, %v2002_v16 }
 0x471   :  { %v2234_v36 = vpop.f32.mrb[20].mxu1 }
 0x472   :  { %v2023_v30 = vadd.f32 %v2234_v36, %v5488_v18  ;;  %v2014_v24 = vpop.f32.mrb[21].mxu1 }
 0x473   :  { %v2015_v46 = vadd.f32 %v5488_v18, %v2014_v24  ;;  %v2235_v11 = vpop.f32.mrb[22].mxu1 }
 0x474   :  { %2083 = vst.msk [vmem:[%s5656_s6 + $0xb0] sm:$0xff] %vm1313_vm12, %v2023_v30  ;;  %v2026_v4 = vadd.f32 %v2235_v11, %v5488_v18  ;;  %v2017_v45 = vpop.f32.mrb[23].mxu1 }
 0x475   :  { %2081 = vst.msk [vmem:[%s5656_s6 + $0xa0] sm:$0xff] %vm1313_vm12, %v2015_v46  ;;  %v2018_v54 = vadd.f32 %v5488_v18, %v2017_v45 }
 0x476   :  { %2084 = vst.msk [vmem:[%s5656_s6 + $0xb8] sm:$0xff] %vm1313_vm12, %v2026_v4 }
 0x477   :  { %2082 = vst.msk [vmem:[%s5656_s6 + $0xa8] sm:$0xff] %vm1313_vm12, %v2018_v54 }
 0x479   :  { %v2238_v56 = vpop.f32.mrb[24].mxu1 }
 0x47a   :  { %v2039_v43 = vadd.f32 %v2238_v56, %v5488_v18  ;;  %v2030_v23 = vpop.f32.mrb[25].mxu1 }
 0x47b   :  { %v2031_v62 = vadd.f32 %v5488_v18, %v2030_v23  ;;  %v2239_v61 = vpop.f32.mrb[26].mxu1 }
 0x47c   :  { %2087 = vst.msk [vmem:[%s5656_s6 + $0xd0] sm:$0xff] %vm1313_vm12, %v2039_v43  ;;  %v2042_v22 = vadd.f32 %v2239_v61, %v5488_v18  ;;  %v2033_v31 = vpop.f32.mrb[27].mxu1 }
 0x47d   :  { %2085 = vst.msk [vmem:[%s5656_s6 + $0xc0] sm:$0xff] %vm1313_vm12, %v2031_v62  ;;  %v2034_v28 = vadd.f32 %v5488_v18, %v2033_v31 }
 0x47e   :  { %2088 = vst.msk [vmem:[%s5656_s6 + $0xd8] sm:$0xff] %vm1313_vm12, %v2042_v22 }
 0x47f   :  { %2086 = vst.msk [vmem:[%s5656_s6 + $0xc8] sm:$0xff] %vm1313_vm12, %v2034_v28 }
 0x481   :  { %v2242_v63 = vpop.f32.mrb[28].mxu1 }
 0x482   :  { %v2055_v53 = vadd.f32 %v2242_v63, %v5488_v18  ;;  %v2046_v13 = vpop.f32.mrb[29].mxu1 }
 0x483   :  { %v2047_v27 = vadd.f32 %v5488_v18, %v2046_v13  ;;  %v2243_v12 = vpop.f32.mrb[30].mxu1 }
 0x484   :  { %2091 = vst.msk [vmem:[%s5656_s6 + $0xf0] sm:$0xff] %vm1313_vm12, %v2055_v53  ;;  %v2058_v58 = vadd.f32 %v2243_v12, %v5488_v18  ;;  %v2049_v44 = vpop.f32.mrb[31].mxu1 }
 0x485   :  { %2089 = vst.msk [vmem:[%s5656_s6 + $0xe0] sm:$0xff] %vm1313_vm12, %v2047_v27  ;;  %v2050_v34 = vadd.f32 %v5488_v18, %v2049_v44 }
 0x486   :  { %2092 = vst.msk [vmem:[%s5656_s6 + $0xf8] sm:$0xff] %vm1313_vm12, %v2058_v58 }
 0x487   :  { %2090 = vst.msk [vmem:[%s5656_s6 + $0xe8] sm:$0xff] %vm1313_vm12, %v2050_v34 }
 0x488   :  { %2097 = vsyncpa [#allocation3], 1 }
 0x489   :  { %2098 = vsyncpa [#allocation5], 1 }

</bundles_post_ra>
